<compile_context>
chip_gen: v7x
topology: tpu7x:2x2x1
jax: 0.10.0
libtpu: 0.0.40
codegen_flags: <defaults>
</compile_context>

<pallas_src>
import math

import jax
import jax.numpy as jnp
import numpy as np
from jax.experimental import pallas as pl
from jax.experimental.pallas import tpu as pltpu

# ---- model constants (from the PyTorch module) ------------------------------
N_bead_type = 19
N_feature = 30
d = 16
max_N_beads = 5

HEADS = ["B", "C", "D", "E", "F", "G", "H", "I"]
HEAD_SIZES = [N_bead_type, 2, 2, 2, 2, 1, 1, 1]               # per-bead feature count
HEAD_ACT_IS_SIGMOID = [True, True, True, True, True, False, False, False]
FEAT_OFFSETS = np.concatenate([[0], np.cumsum(HEAD_SIZES)[:-1]])  # [0,19,21,23,25,27,28,29]
PAIRS = [(i, j) for i in range(max_N_beads) for j in range(i + 1, max_N_beads)]
N_PAIRS = len(PAIRS)

N_FLAT = max_N_beads * N_feature      # 150 (flattened N_hat features, bead-major)
N_PAD = 256                            # lane-padded N_hat output slab width
A_FLAT = max_N_beads * max_N_beads     # 25
A_PAD = 128                            # lane-padded A_hat output slab width

# bf16 MXU operands + f32 accumulation (recommended for v6e/v7x, harmless on v5e).
MATMUL_DTYPE = jnp.bfloat16

# batch tile: 128 rows keeps per-tile activations ~10 MB (fits v7x's 64 MiB VMEM with
# big headroom; v5e/v6e could use 256-512 but 128 already amortizes per-step overhead).
MAX_TILE_B = 128
VMEM_LIMIT_BYTES = 48 * 1024 * 1024

# row offsets inside the two packed weight buffers (all 128-aligned)
R_W2 = 0                                # 9 blocks of (128, 256)
R_WAI2 = 9 * 128                        # (128, 256)
R_WI2 = R_WAI2 + 128                    # (128, 256)
R_W3 = R_WI2 + 128                      # (2048, 256)
W256_ROWS = R_W3 + 8 * 256              # 3456

R_WP = 0                                # (256, 128)  (0.5 folded in)
R_WQ = 256                              # (256, 128)
R_WI3 = 512                             # (256, 128)
R_WI4 = 768                             # (128, 1) in column 0
W128_ROWS = R_WI4 + 128                  # 896


# ---- small helpers (used both in-kernel and in the plain-JAX reference) ------
def _leaky(x):
    return jnp.where(x > 0, x, 0.01 * x)          # nn.LeakyReLU default slope 0.01


def _sigmoid(x):
    # numerically stable, exact reformulation: sigmoid(x) = 0.5*(tanh(x/2)+1) (EUP tanh)
    return 0.5 * (jnp.tanh(0.5 * x) + 1.0)


def _mm(x, w):
    # MXU matmul: cast activations to the (pre-cast) weight dtype, accumulate in f32.
    return jnp.dot(x.astype(w.dtype), w, preferred_element_type=jnp.float32)


def _round_up(x, m):
    return ((x + m - 1) // m) * m


# ---- deterministic parameter initialization (PyTorch-Linear-style uniform) ---
def init_linear(key, fan_in, fan_out):
    kw, kb = jax.random.split(key)
    bound = 1.0 / math.sqrt(fan_in)
    w = jax.random.uniform(kw, (fan_in, fan_out), jnp.float32, -bound, bound)
    b = jax.random.uniform(kb, (fan_out,), jnp.float32, -bound, bound)
    return w, b


def init_mlp(key, dims):
    keys = jax.random.split(key, len(dims))
    return [init_linear(k, fi, fo) for k, (fi, fo) in zip(keys, dims)]


def init_params(key):
    params = {}
    head_out = dict(zip(HEADS, HEAD_SIZES))
    names = HEADS + ["A_i", "A_ii", "A_iii"]
    keys = jax.random.split(key, len(names))
    kmap = dict(zip(names, keys))
    for name, nout in head_out.items():
        params[f"phi_{name}"] = init_mlp(
            kmap[name], [(d, 128), (128, 256), (256, max_N_beads * nout)])
    params["phi_A_i"] = init_mlp(kmap["A_i"], [(N_feature, 128), (128, 256)])
    params["phi_A_ii"] = init_mlp(kmap["A_ii"], [(d, 128), (128, 256)])
    params["phi_A_iii"] = init_mlp(
        kmap["A_iii"], [(256 + 256, 128), (128, 256), (256, 128), (128, 1)])
    return params


# ---- host-side parameter packing (fusion / permutation / block-diag) ---------
def _pack_params(params, compute_dtype):
    f32 = np.float32

    def A(x):
        return np.asarray(x, dtype=f32)

    # fused layer 1: 8 heads + phi_A_ii share the same input z
    first = [params[f"phi_{h}"][0] for h in HEADS] + [params["phi_A_ii"][0]]
    w1_all = np.concatenate([A(w) for w, _ in first], axis=1)            # (16, 1152)
    b1_all = np.concatenate([A(b) for _, b in first])                    # (1152,)

    # layer 2: per-head weights / biases (packed into the 256-col buffer / aux row)
    second = [params[f"phi_{h}"][1] for h in HEADS] + [params["phi_A_ii"][1]]
    b2_flat = np.concatenate([A(b) for _, b in second])                  # (2304,)

    # heads layer 3: block-stacked, columns pre-permuted to bead-major N_hat order
    w3_bd = np.zeros((len(HEADS) * 256, N_PAD), f32)                     # (2048, 256)
    b3_all = np.zeros(N_PAD, f32)
    act_is_sig = np.ones(N_PAD, bool)                                    # True -> sigmoid
    for h, (name, s) in enumerate(zip(HEADS, HEAD_SIZES)):
        w3, b3 = params[f"phi_{name}"][2]
        w3, b3 = A(w3), A(b3)
        for k in range(max_N_beads):
            dst = k * N_feature + int(FEAT_OFFSETS[h])
            w3_bd[256 * h:256 * (h + 1), dst:dst + s] = w3[:, k * s:(k + 1) * s]
            b3_all[dst:dst + s] = b3[k * s:(k + 1) * s]
            if not HEAD_ACT_IS_SIGMOID[h]:
                act_is_sig[dst:dst + s] = False

    # single-tanh activation affine: sigmoid(x)=0.5*tanh(0.5x)+0.5 ; tanh(x)=1*tanh(1x)+0
    c0 = np.where(act_is_sig, 0.5, 1.0).astype(f32)
    c1 = np.where(act_is_sig, 0.5, 1.0).astype(f32)
    c2 = np.where(act_is_sig, 0.5, 0.0).astype(f32)

    # phi_A_i: block-diagonal layer 1 over the 5 beads (zero rows for the padded lanes)
    wai1, bai1 = params["phi_A_i"][0]
    wai1, bai1 = A(wai1), A(bai1)
    wai1_bd = np.zeros((N_PAD, max_N_beads * 128), f32)                  # (256, 640)
    for k in range(max_N_beads):
        wai1_bd[k * N_feature:(k + 1) * N_feature, k * 128:(k + 1) * 128] = wai1
    bai1_t = np.tile(bai1, max_N_beads)                                  # (640,)
    wai2, bai2 = params["phi_A_i"][1]

    # phi_A_iii: split layer-1 weight into pair-half (0.5 folded in) / Q-half
    wi1, bi1 = params["phi_A_iii"][0]
    wi1 = A(wi1)
    wp, wq = 0.5 * wi1[:256], wi1[256:]
    wi2, bi2 = params["phi_A_iii"][1]
    wi3, bi3 = params["phi_A_iii"][2]
    wi4, bi4 = params["phi_A_iii"][3]

    # packed weight buffer #1: 256-column matrices
    w256 = np.zeros((W256_ROWS, 256), f32)
    for h in range(len(second)):
        w256[R_W2 + 128 * h:R_W2 + 128 * (h + 1)] = A(second[h][0])
    w256[R_WAI2:R_WAI2 + 128] = A(wai2)
    w256[R_WI2:R_WI2 + 128] = A(wi2)
    w256[R_W3:R_W3 + 2048] = w3_bd

    # packed weight buffer #2: 128-column matrices (+ wi4 in column 0)
    w128 = np.zeros((W128_ROWS, 128), f32)
    w128[R_WP:R_WP + 256] = wp
    w128[R_WQ:R_WQ + 256] = wq
    w128[R_WI3:R_WI3 + 256] = A(wi3)
    w128[R_WI4:R_WI4 + 128, 0:1] = A(wi4)

    # constant scatter rows for A_hat and the flattened identity (lane-padded to 128)
    s_scat = np.zeros((N_PAIRS, A_PAD), f32)
    for p, (i, j) in enumerate(PAIRS):
        s_scat[p, i * max_N_beads + j] = 1.0
        s_scat[p, j * max_N_beads + i] = 1.0
    eye_pad = np.zeros(A_PAD, f32)
    for k in range(max_N_beads):
        eye_pad[k * max_N_beads + k] = 1.0

    # pack all row vectors (biases / affine coefs / eye) into one lane-aligned aux row
    aux_chunks, aux_off, cursor = [], {}, 0

    def add_row(name, vec):
        nonlocal cursor
        vec = A(vec).reshape(-1)
        n = vec.shape[0]
        padded = _round_up(n, 128)
        buf = np.zeros(padded, f32)
        buf[:n] = vec
        aux_chunks.append(buf)
        aux_off[name] = (cursor, n)
        cursor += padded

    add_row("b1", b1_all)
    add_row("b2", b2_flat)
    add_row("b3", b3_all)
    add_row("c0", c0)
    add_row("c1", c1)
    add_row("c2", c2)
    add_row("bai1", bai1_t)
    add_row("bai2", bai2)
    add_row("bi1", bi1)
    add_row("bi2", bi2)
    add_row("bi3", bi3)
    add_row("eye", eye_pad)
    aux = np.concatenate(aux_chunks)[None, :]                            # (1, NAUX)

    cd = compute_dtype
    inputs = [
        jnp.asarray(w1_all, cd),          # (16, 1152)
        jnp.asarray(wai1_bd, cd),         # (256, 640)
        jnp.asarray(w256, cd),            # (3456, 256)
        jnp.asarray(w128, cd),            # (896, 128)
        jnp.asarray(s_scat, f32),         # (10, 128)
        jnp.asarray(aux, f32),            # (1, NAUX)
    ]
    return {"inputs": inputs, "aux_off": aux_off, "bi4": float(A(bi4).reshape(-1)[0])}


# ---- fused decoder ------------------------------------------------------------
def make_decoder(params, compute_dtype=MATMUL_DTYPE):
    packed = _pack_params(params, compute_dtype)
    inputs = packed["inputs"]
    aux_off = packed["aux_off"]
    bi4 = packed["bi4"]
    n_heads = len(HEADS)

    def kernel(z_ref, w1_ref, wai1_ref, w256_ref, w128_ref, s_ref, aux_ref,
               n_out_ref, a_out_ref):
        Bt = z_ref.shape[0]

        def row(name):
            off, n = aux_off[name]
            return aux_ref[:, off:off + n]            # lane-aligned (1, n) slice

        z = z_ref[...]

        # fused layer 1 (8 heads + phi_A_ii): one (Bt,16)@(16,1152) matmul
        h1 = _leaky(_mm(z, w1_ref[...]) + row("b1"))                     # (Bt, 1152)

        # layer 2 per head, on aligned 128-lane slices of h1
        b2_off = aux_off["b2"][0]
        h2 = []
        for h in range(n_heads + 1):
            xh = h1[:, 128 * h:128 * (h + 1)]
            w2h = w256_ref[R_W2 + 128 * h:R_W2 + 128 * (h + 1), :]
            b2h = aux_ref[:, b2_off + 256 * h:b2_off + 256 * (h + 1)]
            h2.append(_leaky(_mm(xh, w2h) + b2h))                        # (Bt, 256)

        # heads layer 3: one block-stacked matmul -> lane-dense bead-major slab
        head_feat = jnp.concatenate(
            [x.astype(compute_dtype) for x in h2[:n_heads]], axis=-1)    # (Bt, 2048) bf16
        n_pre = _mm(head_feat, w256_ref[R_W3:R_W3 + 2048, :]) + row("b3")
        # single tanh + per-lane affine replaces the sigmoid/tanh dual branch
        n_act = row("c1") * jnp.tanh(row("c0") * n_pre) + row("c2")      # (Bt, 256)
        n_out_ref[...] = n_act

        # phi_A_i for all 5 beads at once (block-diagonal layer 1, shared layer 2)
        hA = _leaky(_mm(n_act, wai1_ref[...]) + row("bai1"))             # (Bt, 640)
        wai2 = w256_ref[R_WAI2:R_WAI2 + 128, :]
        bai2 = row("bai2")
        P = [_leaky(_mm(hA[:, 128 * k:128 * (k + 1)], wai2) + bai2)
             for k in range(max_N_beads)]                                # 5 x (Bt, 256)

        # phi_A_ii output; shared Q-half of phi_A_iii layer 1 computed once
        Q = h2[n_heads]                                                  # (Bt, 256)
        qterm = _mm(Q, w128_ref[R_WQ:R_WQ + 256, :]) + row("bi1")        # (Bt, 128)

        # all 10 unordered pairs stacked on the batch axis -> one matmul per layer
        # (0.5 pair-average scale already folded into wp host-side)
        pair_stack = jnp.concatenate([P[i] + P[j] for (i, j) in PAIRS], axis=0)  # (10*Bt,256)
        t = _mm(pair_stack, w128_ref[R_WP:R_WP + 256, :])                # (10*Bt, 128)
        # broadcast-add the shared Q-term over the 10 pairs (no materialized q_stack)
        t = _leaky(t.reshape(N_PAIRS, Bt, 128) + qterm[None, :, :])
        t = t.reshape(N_PAIRS * Bt, 128)
        t = _leaky(_mm(t, w256_ref[R_WI2:R_WI2 + 128, :]) + row("bi2"))  # (10*Bt, 256)
        t = _leaky(_mm(t, w128_ref[R_WI3:R_WI3 + 256, :]) + row("bi3"))  # (10*Bt, 128)
        a = _sigmoid(_mm(t, w128_ref[R_WI4:R_WI4 + 128, 0:1]) + bi4)     # (10*Bt, 1)

        # A_hat assembly: eye + sum_p a_p * scatter_row_p  (one broadcast-mul + p-sum)
        s = s_ref[...]                                                   # (10, 128)
        contrib = a.reshape(N_PAIRS, Bt, 1) * s[:, None, :]              # (10, Bt, 128)
        a_out_ref[...] = row("eye") + contrib.sum(axis=0)                # (Bt, 128)

    n_weight_inputs = len(inputs)
    const_specs = [pl.BlockSpec(w.shape, lambda i: (0,) * w.ndim) for w in inputs]

    @jax.jit
    def decoder(z):
        B = z.shape[0]
        # batch tile: multiple of 16 (bf16 sublane packing), capped for v7x VMEM
        tile = min(MAX_TILE_B, _round_up(B, 16))
        Bp = _round_up(B, tile)
        if Bp != B:
            z = jnp.pad(z, ((0, Bp - B), (0, 0)))
        grid = (Bp // tile,)

        n_pad, a_pad = pl.pallas_call(
            kernel,
            grid=grid,
            out_shape=(jax.ShapeDtypeStruct((Bp, N_PAD), jnp.float32),
                       jax.ShapeDtypeStruct((Bp, A_PAD), jnp.float32)),
            in_specs=[pl.BlockSpec((tile, d), lambda i: (i, 0))] + const_specs,
            out_specs=(pl.BlockSpec((tile, N_PAD), lambda i: (i, 0)),
                       pl.BlockSpec((tile, A_PAD), lambda i: (i, 0))),
            compiler_params=pltpu.CompilerParams(
                dimension_semantics=("parallel",),
                vmem_limit_bytes=VMEM_LIMIT_BYTES),
        )(z.astype(jnp.float32), *inputs)

        N_hat = n_pad[:B, :N_FLAT].reshape(B, max_N_beads, N_feature)
        A_hat = a_pad[:B, :A_FLAT].reshape(B, max_N_beads, max_N_beads)
        return N_hat, A_hat

    assert n_weight_inputs == 6
    return decoder


# ---- plain-JAX reference (mirrors the PyTorch module) for self-checking ------
def decoder_reference(z, params, compute_dtype=MATMUL_DTYPE):
    def mm(x, w):
        return jnp.dot(x.astype(compute_dtype), jnp.asarray(w, compute_dtype),
                       preferred_element_type=jnp.float32)

    def mlp(x, layers, acts):
        for (w, b), act in zip(layers, acts):
            x = act(mm(x, w) + b)
        return x

    B = z.shape[0]
    outs = []
    for name, s, is_sig in zip(HEADS, HEAD_SIZES, HEAD_ACT_IS_SIGMOID):
        final = _sigmoid if is_sig else jnp.tanh
        y = mlp(z, params[f"phi_{name}"], [_leaky, _leaky, final])
        outs.append(y.reshape(B, max_N_beads, s))
    N_hat = jnp.concatenate(outs, axis=-1)

    P = [mlp(N_hat[:, i], params["phi_A_i"], [_leaky, _leaky]) for i in range(max_N_beads)]
    Q = mlp(z, params["phi_A_ii"], [_leaky, _leaky])
    A_hat = jnp.broadcast_to(jnp.eye(max_N_beads, dtype=jnp.float32),
                             (B, max_N_beads, max_N_beads))
    for i, j in PAIRS:
        nij = jnp.concatenate([0.5 * (P[i] + P[j]), Q], axis=-1)
        aij = mlp(nij, params["phi_A_iii"], [_leaky, _leaky, _leaky, _sigmoid])[:, 0]
        A_hat = A_hat.at[:, i, j].set(aij)
        A_hat = A_hat.at[:, j, i].set(aij)
    return N_hat, A_hat


# ---- demo --------------------------------------------------------------------
if __name__ == "__main__":
    key = jax.random.PRNGKey(0)
    pkey, zkey = jax.random.split(key)
    params = init_params(pkey)
    decoder = make_decoder(params)

    # B=8  : single tile (padded 8 -> 16)
    # B=200: exercises the batch grid (padded 200 -> 256, grid=(2,))
    for B in (8, 200):
        z = jax.random.normal(jax.random.fold_in(zkey, B), (B, d), dtype=jnp.float32)
        N_hat, A_hat = decoder(z)
        jax.block_until_ready((N_hat, A_hat))

        assert N_hat.shape == (B, max_N_beads, N_feature)
        assert A_hat.shape == (B, max_N_beads, max_N_beads)
        assert bool(jnp.all(jnp.isfinite(N_hat))) and bool(jnp.all(jnp.isfinite(A_hat)))
        # diagonal must be exactly 1, matrix symmetric
        assert bool(jnp.allclose(jnp.diagonal(A_hat, axis1=1, axis2=2), 1.0))
        assert bool(jnp.allclose(A_hat, jnp.swapaxes(A_hat, 1, 2)))

        # self-check the fused/restructured kernel against a plain-JAX reference
        N_ref, A_ref = decoder_reference(z, params)
        err_n = float(jnp.max(jnp.abs(N_hat - N_ref)))
        err_a = float(jnp.max(jnp.abs(A_hat - A_ref)))
        assert err_n < 2e-2 and err_a < 2e-2, (B, err_n, err_a)

    print("KERNEL_OK")
</pallas_src>

<mosaic_0001>
module attributes {stable_mosaic.version = 11 : i64} {
  func.func @kernel(%arg0: i32, %arg1: memref<16x16xf32, #tpu.memory_space<vmem>>, %arg2: memref<16x1152xbf16, #tpu.memory_space<vmem>>, %arg3: memref<256x640xbf16, #tpu.memory_space<vmem>>, %arg4: memref<3456x256xbf16, #tpu.memory_space<vmem>>, %arg5: memref<896x128xbf16, #tpu.memory_space<vmem>>, %arg6: memref<10x128xf32, #tpu.memory_space<vmem>>, %arg7: memref<1x6016xf32, #tpu.memory_space<vmem>>, %arg8: memref<16x256xf32, #tpu.memory_space<vmem>>, %arg9: memref<16x128xf32, #tpu.memory_space<vmem>>) attributes {dimension_semantics = [#tpu.dimension_semantics<parallel>], iteration_bounds = array<i64: 1>, scalar_prefetch = 0 : i64, scratch_operands = 0 : i64, tpu.core_type = #tpu.core_type<tc>, window_params = [{transform_indices = @transform_0, window_bounds = array<i64: 16, 16>}, {pipeline_mode = #tpu.pipeline_mode<synchronous>, transform_indices = @transform_1, window_bounds = array<i64: 16, 1152>}, {pipeline_mode = #tpu.pipeline_mode<synchronous>, transform_indices = @transform_2, window_bounds = array<i64: 256, 640>}, {pipeline_mode = #tpu.pipeline_mode<synchronous>, transform_indices = @transform_3, window_bounds = array<i64: 3456, 256>}, {pipeline_mode = #tpu.pipeline_mode<synchronous>, transform_indices = @transform_4, window_bounds = array<i64: 896, 128>}, {pipeline_mode = #tpu.pipeline_mode<synchronous>, transform_indices = @transform_5, window_bounds = array<i64: 10, 128>}, {pipeline_mode = #tpu.pipeline_mode<synchronous>, transform_indices = @transform_6, window_bounds = array<i64: 1, 6016>}, {transform_indices = @transform_7, window_bounds = array<i64: 16, 256>}, {transform_indices = @transform_8, window_bounds = array<i64: 16, 128>}]} {
    %c0 = arith.constant 0 : index
    %c0_0 = arith.constant 0 : index
    %0 = vector.load %arg1[%c0, %c0_0] : memref<16x16xf32, #tpu.memory_space<vmem>>, vector<16x16xf32>
    %c0_1 = arith.constant 0 : index
    %c0_2 = arith.constant 0 : index
    %1 = vector.load %arg2[%c0_1, %c0_2] : memref<16x1152xbf16, #tpu.memory_space<vmem>>, vector<16x1152xbf16>
    %2 = arith.truncf %0 : vector<16x16xf32> to vector<16x16xbf16>
    %cst = arith.constant dense<0.000000e+00> : vector<16x1152xf32>
    %3 = tpu.matmul %2, %1, %cst {dimension_numbers = #tpu.dot_dimension_numbers<[1], [0], [0], [1], [0, 0, 1, 1], [], []>} : vector<16x16xbf16>, vector<16x1152xbf16>, vector<16x1152xf32> -> vector<16x1152xf32>
    %c0_3 = arith.constant 0 : index
    %c0_4 = arith.constant 0 : index
    %4 = vector.load %arg7[%c0_3, %c0_4] : memref<1x6016xf32, #tpu.memory_space<vmem>>, vector<1x1152xf32>
    %5 = vector.broadcast %4 : vector<1x1152xf32> to vector<16x1152xf32>
    %6 = arith.addf %3, %5 : vector<16x1152xf32>
    %cst_5 = arith.constant 0.000000e+00 : f32
    %7 = vector.broadcast %cst_5 : f32 to vector<16x1152xf32>
    %8 = arith.cmpf ogt, %6, %7 : vector<16x1152xf32>
    %cst_6 = arith.constant 0.00999999977 : f32
    %9 = vector.broadcast %cst_6 : f32 to vector<16x1152xf32>
    %10 = arith.mulf %9, %6 : vector<16x1152xf32>
    %11 = arith.select %8, %6, %10 : vector<16x1152xi1>, vector<16x1152xf32>
    %12 = vector.extract_strided_slice %11 {offsets = [0, 0], sizes = [16, 128], strides = [1, 1]} : vector<16x1152xf32> to vector<16x128xf32>
    %c0_7 = arith.constant 0 : index
    %c0_8 = arith.constant 0 : index
    %13 = vector.load %arg4[%c0_7, %c0_8] : memref<3456x256xbf16, #tpu.memory_space<vmem>>, vector<128x256xbf16>
    %c0_9 = arith.constant 0 : index
    %c1152 = arith.constant 1152 : index
    %14 = vector.load %arg7[%c0_9, %c1152] : memref<1x6016xf32, #tpu.memory_space<vmem>>, vector<1x256xf32>
    %15 = arith.truncf %12 : vector<16x128xf32> to vector<16x128xbf16>
    %cst_10 = arith.constant dense<0.000000e+00> : vector<16x256xf32>
    %16 = tpu.matmul %15, %13, %cst_10 {dimension_numbers = #tpu.dot_dimension_numbers<[1], [0], [0], [1], [0, 0, 1, 1], [], []>} : vector<16x128xbf16>, vector<128x256xbf16>, vector<16x256xf32> -> vector<16x256xf32>
    %17 = vector.broadcast %14 : vector<1x256xf32> to vector<16x256xf32>
    %18 = arith.addf %16, %17 : vector<16x256xf32>
    %cst_11 = arith.constant 0.000000e+00 : f32
    %19 = vector.broadcast %cst_11 : f32 to vector<16x256xf32>
    %20 = arith.cmpf ogt, %18, %19 : vector<16x256xf32>
    %cst_12 = arith.constant 0.00999999977 : f32
    %21 = vector.broadcast %cst_12 : f32 to vector<16x256xf32>
    %22 = arith.mulf %21, %18 : vector<16x256xf32>
    %23 = arith.select %20, %18, %22 : vector<16x256xi1>, vector<16x256xf32>
    %24 = vector.extract_strided_slice %11 {offsets = [0, 128], sizes = [16, 128], strides = [1, 1]} : vector<16x1152xf32> to vector<16x128xf32>
    %c128 = arith.constant 128 : index
    %c0_13 = arith.constant 0 : index
    %25 = vector.load %arg4[%c128, %c0_13] : memref<3456x256xbf16, #tpu.memory_space<vmem>>, vector<128x256xbf16>
    %c0_14 = arith.constant 0 : index
    %c1408 = arith.constant 1408 : index
    %26 = vector.load %arg7[%c0_14, %c1408] : memref<1x6016xf32, #tpu.memory_space<vmem>>, vector<1x256xf32>
    %27 = arith.truncf %24 : vector<16x128xf32> to vector<16x128xbf16>
    %cst_15 = arith.constant dense<0.000000e+00> : vector<16x256xf32>
    %28 = tpu.matmul %27, %25, %cst_15 {dimension_numbers = #tpu.dot_dimension_numbers<[1], [0], [0], [1], [0, 0, 1, 1], [], []>} : vector<16x128xbf16>, vector<128x256xbf16>, vector<16x256xf32> -> vector<16x256xf32>
    %29 = vector.broadcast %26 : vector<1x256xf32> to vector<16x256xf32>
    %30 = arith.addf %28, %29 : vector<16x256xf32>
    %cst_16 = arith.constant 0.000000e+00 : f32
    %31 = vector.broadcast %cst_16 : f32 to vector<16x256xf32>
    %32 = arith.cmpf ogt, %30, %31 : vector<16x256xf32>
    %cst_17 = arith.constant 0.00999999977 : f32
    %33 = vector.broadcast %cst_17 : f32 to vector<16x256xf32>
    %34 = arith.mulf %33, %30 : vector<16x256xf32>
    %35 = arith.select %32, %30, %34 : vector<16x256xi1>, vector<16x256xf32>
    %36 = vector.extract_strided_slice %11 {offsets = [0, 256], sizes = [16, 128], strides = [1, 1]} : vector<16x1152xf32> to vector<16x128xf32>
    %c256 = arith.constant 256 : index
    %c0_18 = arith.constant 0 : index
    %37 = vector.load %arg4[%c256, %c0_18] : memref<3456x256xbf16, #tpu.memory_space<vmem>>, vector<128x256xbf16>
    %c0_19 = arith.constant 0 : index
    %c1664 = arith.constant 1664 : index
    %38 = vector.load %arg7[%c0_19, %c1664] : memref<1x6016xf32, #tpu.memory_space<vmem>>, vector<1x256xf32>
    %39 = arith.truncf %36 : vector<16x128xf32> to vector<16x128xbf16>
    %cst_20 = arith.constant dense<0.000000e+00> : vector<16x256xf32>
    %40 = tpu.matmul %39, %37, %cst_20 {dimension_numbers = #tpu.dot_dimension_numbers<[1], [0], [0], [1], [0, 0, 1, 1], [], []>} : vector<16x128xbf16>, vector<128x256xbf16>, vector<16x256xf32> -> vector<16x256xf32>
    %41 = vector.broadcast %38 : vector<1x256xf32> to vector<16x256xf32>
    %42 = arith.addf %40, %41 : vector<16x256xf32>
    %cst_21 = arith.constant 0.000000e+00 : f32
    %43 = vector.broadcast %cst_21 : f32 to vector<16x256xf32>
    %44 = arith.cmpf ogt, %42, %43 : vector<16x256xf32>
    %cst_22 = arith.constant 0.00999999977 : f32
    %45 = vector.broadcast %cst_22 : f32 to vector<16x256xf32>
    %46 = arith.mulf %45, %42 : vector<16x256xf32>
    %47 = arith.select %44, %42, %46 : vector<16x256xi1>, vector<16x256xf32>
    %48 = vector.extract_strided_slice %11 {offsets = [0, 384], sizes = [16, 128], strides = [1, 1]} : vector<16x1152xf32> to vector<16x128xf32>
    %c384 = arith.constant 384 : index
    %c0_23 = arith.constant 0 : index
    %49 = vector.load %arg4[%c384, %c0_23] : memref<3456x256xbf16, #tpu.memory_space<vmem>>, vector<128x256xbf16>
    %c0_24 = arith.constant 0 : index
    %c1920 = arith.constant 1920 : index
    %50 = vector.load %arg7[%c0_24, %c1920] : memref<1x6016xf32, #tpu.memory_space<vmem>>, vector<1x256xf32>
    %51 = arith.truncf %48 : vector<16x128xf32> to vector<16x128xbf16>
    %cst_25 = arith.constant dense<0.000000e+00> : vector<16x256xf32>
    %52 = tpu.matmul %51, %49, %cst_25 {dimension_numbers = #tpu.dot_dimension_numbers<[1], [0], [0], [1], [0, 0, 1, 1], [], []>} : vector<16x128xbf16>, vector<128x256xbf16>, vector<16x256xf32> -> vector<16x256xf32>
    %53 = vector.broadcast %50 : vector<1x256xf32> to vector<16x256xf32>
    %54 = arith.addf %52, %53 : vector<16x256xf32>
    %cst_26 = arith.constant 0.000000e+00 : f32
    %55 = vector.broadcast %cst_26 : f32 to vector<16x256xf32>
    %56 = arith.cmpf ogt, %54, %55 : vector<16x256xf32>
    %cst_27 = arith.constant 0.00999999977 : f32
    %57 = vector.broadcast %cst_27 : f32 to vector<16x256xf32>
    %58 = arith.mulf %57, %54 : vector<16x256xf32>
    %59 = arith.select %56, %54, %58 : vector<16x256xi1>, vector<16x256xf32>
    %60 = vector.extract_strided_slice %11 {offsets = [0, 512], sizes = [16, 128], strides = [1, 1]} : vector<16x1152xf32> to vector<16x128xf32>
    %c512 = arith.constant 512 : index
    %c0_28 = arith.constant 0 : index
    %61 = vector.load %arg4[%c512, %c0_28] : memref<3456x256xbf16, #tpu.memory_space<vmem>>, vector<128x256xbf16>
    %c0_29 = arith.constant 0 : index
    %c2176 = arith.constant 2176 : index
    %62 = vector.load %arg7[%c0_29, %c2176] : memref<1x6016xf32, #tpu.memory_space<vmem>>, vector<1x256xf32>
    %63 = arith.truncf %60 : vector<16x128xf32> to vector<16x128xbf16>
    %cst_30 = arith.constant dense<0.000000e+00> : vector<16x256xf32>
    %64 = tpu.matmul %63, %61, %cst_30 {dimension_numbers = #tpu.dot_dimension_numbers<[1], [0], [0], [1], [0, 0, 1, 1], [], []>} : vector<16x128xbf16>, vector<128x256xbf16>, vector<16x256xf32> -> vector<16x256xf32>
    %65 = vector.broadcast %62 : vector<1x256xf32> to vector<16x256xf32>
    %66 = arith.addf %64, %65 : vector<16x256xf32>
    %cst_31 = arith.constant 0.000000e+00 : f32
    %67 = vector.broadcast %cst_31 : f32 to vector<16x256xf32>
    %68 = arith.cmpf ogt, %66, %67 : vector<16x256xf32>
    %cst_32 = arith.constant 0.00999999977 : f32
    %69 = vector.broadcast %cst_32 : f32 to vector<16x256xf32>
    %70 = arith.mulf %69, %66 : vector<16x256xf32>
    %71 = arith.select %68, %66, %70 : vector<16x256xi1>, vector<16x256xf32>
    %72 = vector.extract_strided_slice %11 {offsets = [0, 640], sizes = [16, 128], strides = [1, 1]} : vector<16x1152xf32> to vector<16x128xf32>
    %c640 = arith.constant 640 : index
    %c0_33 = arith.constant 0 : index
    %73 = vector.load %arg4[%c640, %c0_33] : memref<3456x256xbf16, #tpu.memory_space<vmem>>, vector<128x256xbf16>
    %c0_34 = arith.constant 0 : index
    %c2432 = arith.constant 2432 : index
    %74 = vector.load %arg7[%c0_34, %c2432] : memref<1x6016xf32, #tpu.memory_space<vmem>>, vector<1x256xf32>
    %75 = arith.truncf %72 : vector<16x128xf32> to vector<16x128xbf16>
    %cst_35 = arith.constant dense<0.000000e+00> : vector<16x256xf32>
    %76 = tpu.matmul %75, %73, %cst_35 {dimension_numbers = #tpu.dot_dimension_numbers<[1], [0], [0], [1], [0, 0, 1, 1], [], []>} : vector<16x128xbf16>, vector<128x256xbf16>, vector<16x256xf32> -> vector<16x256xf32>
    %77 = vector.broadcast %74 : vector<1x256xf32> to vector<16x256xf32>
    %78 = arith.addf %76, %77 : vector<16x256xf32>
    %cst_36 = arith.constant 0.000000e+00 : f32
    %79 = vector.broadcast %cst_36 : f32 to vector<16x256xf32>
    %80 = arith.cmpf ogt, %78, %79 : vector<16x256xf32>
    %cst_37 = arith.constant 0.00999999977 : f32
    %81 = vector.broadcast %cst_37 : f32 to vector<16x256xf32>
    %82 = arith.mulf %81, %78 : vector<16x256xf32>
    %83 = arith.select %80, %78, %82 : vector<16x256xi1>, vector<16x256xf32>
    %84 = vector.extract_strided_slice %11 {offsets = [0, 768], sizes = [16, 128], strides = [1, 1]} : vector<16x1152xf32> to vector<16x128xf32>
    %c768 = arith.constant 768 : index
    %c0_38 = arith.constant 0 : index
    %85 = vector.load %arg4[%c768, %c0_38] : memref<3456x256xbf16, #tpu.memory_space<vmem>>, vector<128x256xbf16>
    %c0_39 = arith.constant 0 : index
    %c2688 = arith.constant 2688 : index
    %86 = vector.load %arg7[%c0_39, %c2688] : memref<1x6016xf32, #tpu.memory_space<vmem>>, vector<1x256xf32>
    %87 = arith.truncf %84 : vector<16x128xf32> to vector<16x128xbf16>
    %cst_40 = arith.constant dense<0.000000e+00> : vector<16x256xf32>
    %88 = tpu.matmul %87, %85, %cst_40 {dimension_numbers = #tpu.dot_dimension_numbers<[1], [0], [0], [1], [0, 0, 1, 1], [], []>} : vector<16x128xbf16>, vector<128x256xbf16>, vector<16x256xf32> -> vector<16x256xf32>
    %89 = vector.broadcast %86 : vector<1x256xf32> to vector<16x256xf32>
    %90 = arith.addf %88, %89 : vector<16x256xf32>
    %cst_41 = arith.constant 0.000000e+00 : f32
    %91 = vector.broadcast %cst_41 : f32 to vector<16x256xf32>
    %92 = arith.cmpf ogt, %90, %91 : vector<16x256xf32>
    %cst_42 = arith.constant 0.00999999977 : f32
    %93 = vector.broadcast %cst_42 : f32 to vector<16x256xf32>
    %94 = arith.mulf %93, %90 : vector<16x256xf32>
    %95 = arith.select %92, %90, %94 : vector<16x256xi1>, vector<16x256xf32>
    %96 = vector.extract_strided_slice %11 {offsets = [0, 896], sizes = [16, 128], strides = [1, 1]} : vector<16x1152xf32> to vector<16x128xf32>
    %c896 = arith.constant 896 : index
    %c0_43 = arith.constant 0 : index
    %97 = vector.load %arg4[%c896, %c0_43] : memref<3456x256xbf16, #tpu.memory_space<vmem>>, vector<128x256xbf16>
    %c0_44 = arith.constant 0 : index
    %c2944 = arith.constant 2944 : index
    %98 = vector.load %arg7[%c0_44, %c2944] : memref<1x6016xf32, #tpu.memory_space<vmem>>, vector<1x256xf32>
    %99 = arith.truncf %96 : vector<16x128xf32> to vector<16x128xbf16>
    %cst_45 = arith.constant dense<0.000000e+00> : vector<16x256xf32>
    %100 = tpu.matmul %99, %97, %cst_45 {dimension_numbers = #tpu.dot_dimension_numbers<[1], [0], [0], [1], [0, 0, 1, 1], [], []>} : vector<16x128xbf16>, vector<128x256xbf16>, vector<16x256xf32> -> vector<16x256xf32>
    %101 = vector.broadcast %98 : vector<1x256xf32> to vector<16x256xf32>
    %102 = arith.addf %100, %101 : vector<16x256xf32>
    %cst_46 = arith.constant 0.000000e+00 : f32
    %103 = vector.broadcast %cst_46 : f32 to vector<16x256xf32>
    %104 = arith.cmpf ogt, %102, %103 : vector<16x256xf32>
    %cst_47 = arith.constant 0.00999999977 : f32
    %105 = vector.broadcast %cst_47 : f32 to vector<16x256xf32>
    %106 = arith.mulf %105, %102 : vector<16x256xf32>
    %107 = arith.select %104, %102, %106 : vector<16x256xi1>, vector<16x256xf32>
    %108 = vector.extract_strided_slice %11 {offsets = [0, 1024], sizes = [16, 128], strides = [1, 1]} : vector<16x1152xf32> to vector<16x128xf32>
    %c1024 = arith.constant 1024 : index
    %c0_48 = arith.constant 0 : index
    %109 = vector.load %arg4[%c1024, %c0_48] : memref<3456x256xbf16, #tpu.memory_space<vmem>>, vector<128x256xbf16>
    %c0_49 = arith.constant 0 : index
    %c3200 = arith.constant 3200 : index
    %110 = vector.load %arg7[%c0_49, %c3200] : memref<1x6016xf32, #tpu.memory_space<vmem>>, vector<1x256xf32>
    %111 = arith.truncf %108 : vector<16x128xf32> to vector<16x128xbf16>
    %cst_50 = arith.constant dense<0.000000e+00> : vector<16x256xf32>
    %112 = tpu.matmul %111, %109, %cst_50 {dimension_numbers = #tpu.dot_dimension_numbers<[1], [0], [0], [1], [0, 0, 1, 1], [], []>} : vector<16x128xbf16>, vector<128x256xbf16>, vector<16x256xf32> -> vector<16x256xf32>
    %113 = vector.broadcast %110 : vector<1x256xf32> to vector<16x256xf32>
    %114 = arith.addf %112, %113 : vector<16x256xf32>
    %cst_51 = arith.constant 0.000000e+00 : f32
    %115 = vector.broadcast %cst_51 : f32 to vector<16x256xf32>
    %116 = arith.cmpf ogt, %114, %115 : vector<16x256xf32>
    %cst_52 = arith.constant 0.00999999977 : f32
    %117 = vector.broadcast %cst_52 : f32 to vector<16x256xf32>
    %118 = arith.mulf %117, %114 : vector<16x256xf32>
    %119 = arith.select %116, %114, %118 : vector<16x256xi1>, vector<16x256xf32>
    %120 = arith.truncf %23 : vector<16x256xf32> to vector<16x256xbf16>
    %121 = arith.truncf %35 : vector<16x256xf32> to vector<16x256xbf16>
    %122 = arith.truncf %47 : vector<16x256xf32> to vector<16x256xbf16>
    %123 = arith.truncf %59 : vector<16x256xf32> to vector<16x256xbf16>
    %124 = arith.truncf %71 : vector<16x256xf32> to vector<16x256xbf16>
    %125 = arith.truncf %83 : vector<16x256xf32> to vector<16x256xbf16>
    %126 = arith.truncf %95 : vector<16x256xf32> to vector<16x256xbf16>
    %127 = arith.truncf %107 : vector<16x256xf32> to vector<16x256xbf16>
    %128 = tpu.concatenate %120, %121, %122, %123, %124, %125, %126, %127 in 1 : vector<16x256xbf16>, vector<16x256xbf16>, vector<16x256xbf16>, vector<16x256xbf16>, vector<16x256xbf16>, vector<16x256xbf16>, vector<16x256xbf16>, vector<16x256xbf16> -> vector<16x2048xbf16>
    %c1408_53 = arith.constant 1408 : index
    %c0_54 = arith.constant 0 : index
    %129 = vector.load %arg4[%c1408_53, %c0_54] : memref<3456x256xbf16, #tpu.memory_space<vmem>>, vector<2048x256xbf16>
    %cst_55 = arith.constant dense<0.000000e+00> : vector<16x256xf32>
    %130 = tpu.matmul %128, %129, %cst_55 {dimension_numbers = #tpu.dot_dimension_numbers<[1], [0], [0], [1], [0, 0, 1, 1], [], []>} : vector<16x2048xbf16>, vector<2048x256xbf16>, vector<16x256xf32> -> vector<16x256xf32>
    %c0_56 = arith.constant 0 : index
    %c3456 = arith.constant 3456 : index
    %131 = vector.load %arg7[%c0_56, %c3456] : memref<1x6016xf32, #tpu.memory_space<vmem>>, vector<1x256xf32>
    %132 = vector.broadcast %131 : vector<1x256xf32> to vector<16x256xf32>
    %133 = arith.addf %130, %132 : vector<16x256xf32>
    %c0_57 = arith.constant 0 : index
    %c3968 = arith.constant 3968 : index
    %134 = vector.load %arg7[%c0_57, %c3968] : memref<1x6016xf32, #tpu.memory_space<vmem>>, vector<1x256xf32>
    %c0_58 = arith.constant 0 : index
    %c3712 = arith.constant 3712 : index
    %135 = vector.load %arg7[%c0_58, %c3712] : memref<1x6016xf32, #tpu.memory_space<vmem>>, vector<1x256xf32>
    %136 = vector.broadcast %135 : vector<1x256xf32> to vector<16x256xf32>
    %137 = arith.mulf %136, %133 : vector<16x256xf32>
    %138 = math.tanh %137 : vector<16x256xf32>
    %139 = vector.broadcast %134 : vector<1x256xf32> to vector<16x256xf32>
    %140 = arith.mulf %139, %138 : vector<16x256xf32>
    %c0_59 = arith.constant 0 : index
    %c4224 = arith.constant 4224 : index
    %141 = vector.load %arg7[%c0_59, %c4224] : memref<1x6016xf32, #tpu.memory_space<vmem>>, vector<1x256xf32>
    %142 = vector.broadcast %141 : vector<1x256xf32> to vector<16x256xf32>
    %143 = arith.addf %140, %142 : vector<16x256xf32>
    %c0_60 = arith.constant 0 : index
    %c0_61 = arith.constant 0 : index
    %144 = vector.load %arg8[%c0_60, %c0_61] : memref<16x256xf32, #tpu.memory_space<vmem>>, vector<16x256xf32>
    tpu.vector_store %arg8[%c0_60, %c0_61], %143 {strides = array<i32>} : memref<16x256xf32, #tpu.memory_space<vmem>>, vector<16x256xf32>,
    %c0_62 = arith.constant 0 : index
    %c0_63 = arith.constant 0 : index
    %145 = vector.load %arg3[%c0_62, %c0_63] : memref<256x640xbf16, #tpu.memory_space<vmem>>, vector<256x640xbf16>
    %146 = arith.truncf %143 : vector<16x256xf32> to vector<16x256xbf16>
    %cst_64 = arith.constant dense<0.000000e+00> : vector<16x640xf32>
    %147 = tpu.matmul %146, %145, %cst_64 {dimension_numbers = #tpu.dot_dimension_numbers<[1], [0], [0], [1], [0, 0, 1, 1], [], []>} : vector<16x256xbf16>, vector<256x640xbf16>, vector<16x640xf32> -> vector<16x640xf32>
    %c0_65 = arith.constant 0 : index
    %c4480 = arith.constant 4480 : index
    %148 = vector.load %arg7[%c0_65, %c4480] : memref<1x6016xf32, #tpu.memory_space<vmem>>, vector<1x640xf32>
    %149 = vector.broadcast %148 : vector<1x640xf32> to vector<16x640xf32>
    %150 = arith.addf %147, %149 : vector<16x640xf32>
    %cst_66 = arith.constant 0.000000e+00 : f32
    %151 = vector.broadcast %cst_66 : f32 to vector<16x640xf32>
    %152 = arith.cmpf ogt, %150, %151 : vector<16x640xf32>
    %cst_67 = arith.constant 0.00999999977 : f32
    %153 = vector.broadcast %cst_67 : f32 to vector<16x640xf32>
    %154 = arith.mulf %153, %150 : vector<16x640xf32>
    %155 = arith.select %152, %150, %154 : vector<16x640xi1>, vector<16x640xf32>
    %c1152_68 = arith.constant 1152 : index
    %c0_69 = arith.constant 0 : index
    %156 = vector.load %arg4[%c1152_68, %c0_69] : memref<3456x256xbf16, #tpu.memory_space<vmem>>, vector<128x256xbf16>
    %c0_70 = arith.constant 0 : index
    %c5120 = arith.constant 5120 : index
    %157 = vector.load %arg7[%c0_70, %c5120] : memref<1x6016xf32, #tpu.memory_space<vmem>>, vector<1x256xf32>
    %158 = vector.extract_strided_slice %155 {offsets = [0, 0], sizes = [16, 128], strides = [1, 1]} : vector<16x640xf32> to vector<16x128xf32>
    %159 = arith.truncf %158 : vector<16x128xf32> to vector<16x128xbf16>
    %cst_71 = arith.constant dense<0.000000e+00> : vector<16x256xf32>
    %160 = tpu.matmul %159, %156, %cst_71 {dimension_numbers = #tpu.dot_dimension_numbers<[1], [0], [0], [1], [0, 0, 1, 1], [], []>} : vector<16x128xbf16>, vector<128x256xbf16>, vector<16x256xf32> -> vector<16x256xf32>
    %161 = vector.broadcast %157 : vector<1x256xf32> to vector<16x256xf32>
    %162 = arith.addf %160, %161 : vector<16x256xf32>
    %cst_72 = arith.constant 0.000000e+00 : f32
    %163 = vector.broadcast %cst_72 : f32 to vector<16x256xf32>
    %164 = arith.cmpf ogt, %162, %163 : vector<16x256xf32>
    %cst_73 = arith.constant 0.00999999977 : f32
    %165 = vector.broadcast %cst_73 : f32 to vector<16x256xf32>
    %166 = arith.mulf %165, %162 : vector<16x256xf32>
    %167 = arith.select %164, %162, %166 : vector<16x256xi1>, vector<16x256xf32>
    %168 = vector.extract_strided_slice %155 {offsets = [0, 128], sizes = [16, 128], strides = [1, 1]} : vector<16x640xf32> to vector<16x128xf32>
    %169 = arith.truncf %168 : vector<16x128xf32> to vector<16x128xbf16>
    %cst_74 = arith.constant dense<0.000000e+00> : vector<16x256xf32>
    %170 = tpu.matmul %169, %156, %cst_74 {dimension_numbers = #tpu.dot_dimension_numbers<[1], [0], [0], [1], [0, 0, 1, 1], [], []>} : vector<16x128xbf16>, vector<128x256xbf16>, vector<16x256xf32> -> vector<16x256xf32>
    %171 = vector.broadcast %157 : vector<1x256xf32> to vector<16x256xf32>
    %172 = arith.addf %170, %171 : vector<16x256xf32>
    %cst_75 = arith.constant 0.000000e+00 : f32
    %173 = vector.broadcast %cst_75 : f32 to vector<16x256xf32>
    %174 = arith.cmpf ogt, %172, %173 : vector<16x256xf32>
    %cst_76 = arith.constant 0.00999999977 : f32
    %175 = vector.broadcast %cst_76 : f32 to vector<16x256xf32>
    %176 = arith.mulf %175, %172 : vector<16x256xf32>
    %177 = arith.select %174, %172, %176 : vector<16x256xi1>, vector<16x256xf32>
    %178 = vector.extract_strided_slice %155 {offsets = [0, 256], sizes = [16, 128], strides = [1, 1]} : vector<16x640xf32> to vector<16x128xf32>
    %179 = arith.truncf %178 : vector<16x128xf32> to vector<16x128xbf16>
    %cst_77 = arith.constant dense<0.000000e+00> : vector<16x256xf32>
    %180 = tpu.matmul %179, %156, %cst_77 {dimension_numbers = #tpu.dot_dimension_numbers<[1], [0], [0], [1], [0, 0, 1, 1], [], []>} : vector<16x128xbf16>, vector<128x256xbf16>, vector<16x256xf32> -> vector<16x256xf32>
    %181 = vector.broadcast %157 : vector<1x256xf32> to vector<16x256xf32>
    %182 = arith.addf %180, %181 : vector<16x256xf32>
    %cst_78 = arith.constant 0.000000e+00 : f32
    %183 = vector.broadcast %cst_78 : f32 to vector<16x256xf32>
    %184 = arith.cmpf ogt, %182, %183 : vector<16x256xf32>
    %cst_79 = arith.constant 0.00999999977 : f32
    %185 = vector.broadcast %cst_79 : f32 to vector<16x256xf32>
    %186 = arith.mulf %185, %182 : vector<16x256xf32>
    %187 = arith.select %184, %182, %186 : vector<16x256xi1>, vector<16x256xf32>
    %188 = vector.extract_strided_slice %155 {offsets = [0, 384], sizes = [16, 128], strides = [1, 1]} : vector<16x640xf32> to vector<16x128xf32>
    %189 = arith.truncf %188 : vector<16x128xf32> to vector<16x128xbf16>
    %cst_80 = arith.constant dense<0.000000e+00> : vector<16x256xf32>
    %190 = tpu.matmul %189, %156, %cst_80 {dimension_numbers = #tpu.dot_dimension_numbers<[1], [0], [0], [1], [0, 0, 1, 1], [], []>} : vector<16x128xbf16>, vector<128x256xbf16>, vector<16x256xf32> -> vector<16x256xf32>
    %191 = vector.broadcast %157 : vector<1x256xf32> to vector<16x256xf32>
    %192 = arith.addf %190, %191 : vector<16x256xf32>
    %cst_81 = arith.constant 0.000000e+00 : f32
    %193 = vector.broadcast %cst_81 : f32 to vector<16x256xf32>
    %194 = arith.cmpf ogt, %192, %193 : vector<16x256xf32>
    %cst_82 = arith.constant 0.00999999977 : f32
    %195 = vector.broadcast %cst_82 : f32 to vector<16x256xf32>
    %196 = arith.mulf %195, %192 : vector<16x256xf32>
    %197 = arith.select %194, %192, %196 : vector<16x256xi1>, vector<16x256xf32>
    %198 = vector.extract_strided_slice %155 {offsets = [0, 512], sizes = [16, 128], strides = [1, 1]} : vector<16x640xf32> to vector<16x128xf32>
    %199 = arith.truncf %198 : vector<16x128xf32> to vector<16x128xbf16>
    %cst_83 = arith.constant dense<0.000000e+00> : vector<16x256xf32>
    %200 = tpu.matmul %199, %156, %cst_83 {dimension_numbers = #tpu.dot_dimension_numbers<[1], [0], [0], [1], [0, 0, 1, 1], [], []>} : vector<16x128xbf16>, vector<128x256xbf16>, vector<16x256xf32> -> vector<16x256xf32>
    %201 = vector.broadcast %157 : vector<1x256xf32> to vector<16x256xf32>
    %202 = arith.addf %200, %201 : vector<16x256xf32>
    %cst_84 = arith.constant 0.000000e+00 : f32
    %203 = vector.broadcast %cst_84 : f32 to vector<16x256xf32>
    %204 = arith.cmpf ogt, %202, %203 : vector<16x256xf32>
    %cst_85 = arith.constant 0.00999999977 : f32
    %205 = vector.broadcast %cst_85 : f32 to vector<16x256xf32>
    %206 = arith.mulf %205, %202 : vector<16x256xf32>
    %207 = arith.select %204, %202, %206 : vector<16x256xi1>, vector<16x256xf32>
    %c256_86 = arith.constant 256 : index
    %c0_87 = arith.constant 0 : index
    %208 = vector.load %arg5[%c256_86, %c0_87] : memref<896x128xbf16, #tpu.memory_space<vmem>>, vector<256x128xbf16>
    %209 = arith.truncf %119 : vector<16x256xf32> to vector<16x256xbf16>
    %cst_88 = arith.constant dense<0.000000e+00> : vector<16x128xf32>
    %210 = tpu.matmul %209, %208, %cst_88 {dimension_numbers = #tpu.dot_dimension_numbers<[1], [0], [0], [1], [0, 0, 1, 1], [], []>} : vector<16x256xbf16>, vector<256x128xbf16>, vector<16x128xf32> -> vector<16x128xf32>
    %c0_89 = arith.constant 0 : index
    %c5376 = arith.constant 5376 : index
    %211 = vector.load %arg7[%c0_89, %c5376] : memref<1x6016xf32, #tpu.memory_space<vmem>>, vector<1x128xf32>
    %212 = vector.broadcast %211 : vector<1x128xf32> to vector<16x128xf32>
    %213 = arith.addf %210, %212 : vector<16x128xf32>
    %214 = arith.addf %167, %177 : vector<16x256xf32>
    %215 = arith.addf %167, %187 : vector<16x256xf32>
    %216 = arith.addf %167, %197 : vector<16x256xf32>
    %217 = arith.addf %167, %207 : vector<16x256xf32>
    %218 = arith.addf %177, %187 : vector<16x256xf32>
    %219 = arith.addf %177, %197 : vector<16x256xf32>
    %220 = arith.addf %177, %207 : vector<16x256xf32>
    %221 = arith.addf %187, %197 : vector<16x256xf32>
    %222 = arith.addf %187, %207 : vector<16x256xf32>
    %223 = arith.addf %197, %207 : vector<16x256xf32>
    %224 = tpu.concatenate %214, %215, %216, %217, %218, %219, %220, %221, %222, %223 in 0 : vector<16x256xf32>, vector<16x256xf32>, vector<16x256xf32>, vector<16x256xf32>, vector<16x256xf32>, vector<16x256xf32>, vector<16x256xf32>, vector<16x256xf32>, vector<16x256xf32>, vector<16x256xf32> -> vector<160x256xf32>
    %c0_90 = arith.constant 0 : index
    %c0_91 = arith.constant 0 : index
    %225 = vector.load %arg5[%c0_90, %c0_91] : memref<896x128xbf16, #tpu.memory_space<vmem>>, vector<256x128xbf16>
    %226 = arith.truncf %224 : vector<160x256xf32> to vector<160x256xbf16>
    %cst_92 = arith.constant dense<0.000000e+00> : vector<160x128xf32>
    %227 = tpu.matmul %226, %225, %cst_92 {dimension_numbers = #tpu.dot_dimension_numbers<[1], [0], [0], [1], [0, 0, 1, 1], [], []>} : vector<160x256xbf16>, vector<256x128xbf16>, vector<160x128xf32> -> vector<160x128xf32>
    %228 = vector.shape_cast %227 : vector<160x128xf32> to vector<10x16x128xf32>
    %229 = vector.shape_cast %213 : vector<16x128xf32> to vector<1x16x128xf32>
    %230 = vector.broadcast %229 : vector<1x16x128xf32> to vector<10x16x128xf32>
    %231 = arith.addf %228, %230 : vector<10x16x128xf32>
    %cst_93 = arith.constant 0.000000e+00 : f32
    %232 = vector.broadcast %cst_93 : f32 to vector<10x16x128xf32>
    %233 = arith.cmpf ogt, %231, %232 : vector<10x16x128xf32>
    %cst_94 = arith.constant 0.00999999977 : f32
    %234 = vector.broadcast %cst_94 : f32 to vector<10x16x128xf32>
    %235 = arith.mulf %234, %231 : vector<10x16x128xf32>
    %236 = arith.select %233, %231, %235 : vector<10x16x128xi1>, vector<10x16x128xf32>
    %237 = vector.shape_cast %236 : vector<10x16x128xf32> to vector<160x128xf32>
    %c1280 = arith.constant 1280 : index
    %c0_95 = arith.constant 0 : index
    %238 = vector.load %arg4[%c1280, %c0_95] : memref<3456x256xbf16, #tpu.memory_space<vmem>>, vector<128x256xbf16>
    %239 = arith.truncf %237 : vector<160x128xf32> to vector<160x128xbf16>
    %cst_96 = arith.constant dense<0.000000e+00> : vector<160x256xf32>
    %240 = tpu.matmul %239, %238, %cst_96 {dimension_numbers = #tpu.dot_dimension_numbers<[1], [0], [0], [1], [0, 0, 1, 1], [], []>} : vector<160x128xbf16>, vector<128x256xbf16>, vector<160x256xf32> -> vector<160x256xf32>
    %c0_97 = arith.constant 0 : index
    %c5504 = arith.constant 5504 : index
    %241 = vector.load %arg7[%c0_97, %c5504] : memref<1x6016xf32, #tpu.memory_space<vmem>>, vector<1x256xf32>
    %242 = vector.broadcast %241 : vector<1x256xf32> to vector<160x256xf32>
    %243 = arith.addf %240, %242 : vector<160x256xf32>
    %cst_98 = arith.constant 0.000000e+00 : f32
    %244 = vector.broadcast %cst_98 : f32 to vector<160x256xf32>
    %245 = arith.cmpf ogt, %243, %244 : vector<160x256xf32>
    %cst_99 = arith.constant 0.00999999977 : f32
    %246 = vector.broadcast %cst_99 : f32 to vector<160x256xf32>
    %247 = arith.mulf %246, %243 : vector<160x256xf32>
    %248 = arith.select %245, %243, %247 : vector<160x256xi1>, vector<160x256xf32>
    %c512_100 = arith.constant 512 : index
    %c0_101 = arith.constant 0 : index
    %249 = vector.load %arg5[%c512_100, %c0_101] : memref<896x128xbf16, #tpu.memory_space<vmem>>, vector<256x128xbf16>
    %250 = arith.truncf %248 : vector<160x256xf32> to vector<160x256xbf16>
    %cst_102 = arith.constant dense<0.000000e+00> : vector<160x128xf32>
    %251 = tpu.matmul %250, %249, %cst_102 {dimension_numbers = #tpu.dot_dimension_numbers<[1], [0], [0], [1], [0, 0, 1, 1], [], []>} : vector<160x256xbf16>, vector<256x128xbf16>, vector<160x128xf32> -> vector<160x128xf32>
    %c0_103 = arith.constant 0 : index
    %c5760 = arith.constant 5760 : index
    %252 = vector.load %arg7[%c0_103, %c5760] : memref<1x6016xf32, #tpu.memory_space<vmem>>, vector<1x128xf32>
    %253 = vector.broadcast %252 : vector<1x128xf32> to vector<160x128xf32>
    %254 = arith.addf %251, %253 : vector<160x128xf32>
    %cst_104 = arith.constant 0.000000e+00 : f32
    %255 = vector.broadcast %cst_104 : f32 to vector<160x128xf32>
    %256 = arith.cmpf ogt, %254, %255 : vector<160x128xf32>
    %cst_105 = arith.constant 0.00999999977 : f32
    %257 = vector.broadcast %cst_105 : f32 to vector<160x128xf32>
    %258 = arith.mulf %257, %254 : vector<160x128xf32>
    %259 = arith.select %256, %254, %258 : vector<160x128xi1>, vector<160x128xf32>
    %c768_106 = arith.constant 768 : index
    %c0_107 = arith.constant 0 : index
    %260 = vector.load %arg5[%c768_106, %c0_107] : memref<896x128xbf16, #tpu.memory_space<vmem>>, vector<128x1xbf16>
    %261 = arith.truncf %259 : vector<160x128xf32> to vector<160x128xbf16>
    %cst_108 = arith.constant dense<0.000000e+00> : vector<160x1xf32>
    %262 = tpu.matmul %261, %260, %cst_108 {dimension_numbers = #tpu.dot_dimension_numbers<[1], [0], [0], [1], [0, 0, 1, 1], [], []>} : vector<160x128xbf16>, vector<128x1xbf16>, vector<160x1xf32> -> vector<160x1xf32>
    %cst_109 = arith.constant -0.0798735246 : f32
    %263 = vector.broadcast %cst_109 : f32 to vector<160x1xf32>
    %264 = arith.addf %262, %263 : vector<160x1xf32>
    %cst_110 = arith.constant 5.000000e-01 : f32
    %265 = vector.broadcast %cst_110 : f32 to vector<160x1xf32>
    %266 = arith.mulf %265, %264 : vector<160x1xf32>
    %267 = math.tanh %266 : vector<160x1xf32>
    %cst_111 = arith.constant 1.000000e+00 : f32
    %268 = vector.broadcast %cst_111 : f32 to vector<160x1xf32>
    %269 = arith.addf %267, %268 : vector<160x1xf32>
    %cst_112 = arith.constant 5.000000e-01 : f32
    %270 = vector.broadcast %cst_112 : f32 to vector<160x1xf32>
    %271 = arith.mulf %270, %269 : vector<160x1xf32>
    %c0_113 = arith.constant 0 : index
    %c0_114 = arith.constant 0 : index
    %272 = vector.load %arg6[%c0_113, %c0_114] : memref<10x128xf32, #tpu.memory_space<vmem>>, vector<10x128xf32>
    %273 = vector.shape_cast %271 : vector<160x1xf32> to vector<10x16x1xf32>
    %274 = vector.shape_cast %272 : vector<10x128xf32> to vector<10x1x128xf32>
    %275 = vector.broadcast %273 : vector<10x16x1xf32> to vector<10x16x128xf32>
    %276 = vector.broadcast %274 : vector<10x1x128xf32> to vector<10x16x128xf32>
    %277 = arith.mulf %275, %276 : vector<10x16x128xf32>
    %c0_115 = arith.constant 0 : index
    %c5888 = arith.constant 5888 : index
    %278 = vector.load %arg7[%c0_115, %c5888] : memref<1x6016xf32, #tpu.memory_space<vmem>>, vector<1x128xf32>
    %cst_116 = arith.constant dense<0.000000e+00> : vector<16x128xf32>
    %279 = vector.multi_reduction <add>, %277, %cst_116 [0] : vector<10x16x128xf32> to vector<16x128xf32>
    %280 = vector.broadcast %278 : vector<1x128xf32> to vector<16x128xf32>
    %281 = arith.addf %280, %279 : vector<16x128xf32>
    %c0_117 = arith.constant 0 : index
    %c0_118 = arith.constant 0 : index
    %282 = vector.load %arg9[%c0_117, %c0_118] : memref<16x128xf32, #tpu.memory_space<vmem>>, vector<16x128xf32>
    tpu.vector_store %arg9[%c0_117, %c0_118], %281 {strides = array<i32>} : memref<16x128xf32, #tpu.memory_space<vmem>>, vector<16x128xf32>,
    return
  }
  func.func @transform_0(%arg0: i32) -> (i32, i32) {
    %c0_i32 = arith.constant 0 : i32
    %c0_i32_0 = arith.constant 0 : i32
    return %arg0, %c0_i32 : i32, i32
  }
  func.func @transform_1(%arg0: i32) -> (i32, i32) {
    %c0_i32 = arith.constant 0 : i32
    %c0_i32_0 = arith.constant 0 : i32
    %c0_i32_1 = arith.constant 0 : i32
    return %c0_i32, %c0_i32_0 : i32, i32
  }
  func.func @transform_2(%arg0: i32) -> (i32, i32) {
    %c0_i32 = arith.constant 0 : i32
    %c0_i32_0 = arith.constant 0 : i32
    %c0_i32_1 = arith.constant 0 : i32
    return %c0_i32, %c0_i32_0 : i32, i32
  }
  func.func @transform_3(%arg0: i32) -> (i32, i32) {
    %c0_i32 = arith.constant 0 : i32
    %c0_i32_0 = arith.constant 0 : i32
    %c0_i32_1 = arith.constant 0 : i32
    return %c0_i32, %c0_i32_0 : i32, i32
  }
  func.func @transform_4(%arg0: i32) -> (i32, i32) {
    %c0_i32 = arith.constant 0 : i32
    %c0_i32_0 = arith.constant 0 : i32
    %c0_i32_1 = arith.constant 0 : i32
    return %c0_i32, %c0_i32_0 : i32, i32
  }
  func.func @transform_5(%arg0: i32) -> (i32, i32) {
    %c0_i32 = arith.constant 0 : i32
    %c0_i32_0 = arith.constant 0 : i32
    %c0_i32_1 = arith.constant 0 : i32
    return %c0_i32, %c0_i32_0 : i32, i32
  }
  func.func @transform_6(%arg0: i32) -> (i32, i32) {
    %c0_i32 = arith.constant 0 : i32
    %c0_i32_0 = arith.constant 0 : i32
    %c0_i32_1 = arith.constant 0 : i32
    return %c0_i32, %c0_i32_0 : i32, i32
  }
  func.func @transform_7(%arg0: i32) -> (i32, i32) {
    %c0_i32 = arith.constant 0 : i32
    %c0_i32_0 = arith.constant 0 : i32
    return %arg0, %c0_i32 : i32, i32
  }
  func.func @transform_8(%arg0: i32) -> (i32, i32) {
    %c0_i32 = arith.constant 0 : i32
    %c0_i32_0 = arith.constant 0 : i32
    return %arg0, %c0_i32 : i32, i32
  }
}

</mosaic_0001>

<bundles_post_ra>
// kernel: decoder.1
= control target key start
LH: loop header
LB: loop body
LE: loop exit
PB: predicated region body
PF: predicated region fallthrough
CT: control target
= control target key end

     0   :  { %v8502_v1 = vmov 0   ;;  %vm137_vm0 = vcmask 130048   ;;  %v8503_v12 = vmov 0.0   ;;  %vm8504_vm1 = vmmov 0   ;;  %s11080_s1 = inlined_call_operand.vmem [shape: bf16[16,1152], index: 1, kind: input, shape index: {}]   ;;  %s11081_s0 = inlined_call_operand.vmem [shape: f32[16,16], index: 0, kind: input, shape index: {}]   ;;  %s11082_s3 = inlined_call_operand.vmem [shape: bf16[3456,256], index: 3, kind: input, shape index: {}]   ;;  %s11083_s6 = inlined_call_operand.vmem [shape: f32[1,6016], index: 6, kind: input, shape index: {}]   ;;  %s11084_s2 = inlined_call_operand.vmem [shape: bf16[256,640], index: 2, kind: input, shape index: {}]   ;;  %s11085_s7 = inlined_call_operand.vmem [shape: f32[16,256], index: 7, kind: output, shape index: {0}]   ;;  %s11086_s4 = inlined_call_operand.vmem [shape: bf16[896,128], index: 4, kind: input, shape index: {}]   ;;  %s11087_s5 = inlined_call_operand.vmem [shape: f32[10,128], index: 5, kind: input, shape index: {}]   ;;  %s11088_s8 = inlined_call_operand.vmem [shape: f32[16,128], index: 8, kind: output, shape index: {1}]  }
   0x1   :  { %v7624_v0 = vld [vmem:[%s11080_s1 + $0x4] ss:$36 sps:$4 sm:$0xff]   ;;  %173 = vmatprep.mubr.bf16.mxu1 %v8502_v1  ;;  %259 = vmatprep.mubr.bf16.mxu0 %v8502_v1  ;;  %v7629_v7 = vld [vmem:[%s11080_s1 + $0xc] ss:$36 sps:$4 sm:$0xff]   ;;  %v7630_v8 = vld [vmem:[%s11080_s1 + $0x14] ss:$36 sps:$4 sm:$0xff]   ;;  %v46_v48 = vlaneseq }
   0x2   :  { %v7626_v2 = vld [vmem:[%s11080_s1] ss:$36 sps:$4 sm:$0xff]   ;;  %v30_v4 = vld [vmem:[%s11081_s0 + $0x8] sm:$0xff]  ;;  %7622 = vset.pattern.permute.xlu1 %v8502_v1  ;;  %7623 = vset.pattern.permute.xlu0 %v8502_v1  ;;  %v7632_v9 = vld [vmem:[%s11080_s1 + $0x10] ss:$36 sps:$4 sm:$0xff]  }
   0x3   :  { %v29_v3 = vld [vmem:[%s11081_s0] sm:$0xff]  ;;  %141 = vmatprep.subr.bf16.mxu1 %v7624_v0  ;;  %v7627_v6 = vld [vmem:[%s11080_s1 + $0x8] ss:$36 sps:$4 sm:$0xff]   ;;  %227 = vmatprep.subr.bf16.mxu0 %v7630_v8  ;;  %v7633_v14 = vld [vmem:[%s11080_s1 + $0x18] ss:$36 sps:$4 sm:$0xff]   ;;  %v8699_v49 = vshrl.u32 %v46_v48, 7 }
   0x4   :  { %v41_v5 = vpack.c.bf16 %v30_v4, %v29_v3  ;;  %142 = vmatpush1.bf16.msra.mxu1 %v7626_v2  ;;  %v7635_v10 = vld [vmem:[%s11080_s1 + $0x1c] ss:$36 sps:$4 sm:$0xff]   ;;  %228 = vmatpush1.bf16.msra.mxu0 %v7632_v9  ;;  %v7642_v13 = vld [vmem:[%s11082_s3 + $0x84] ss:$8 sps:$4 sm:$0xff]   ;;  %v7646_v20 = vld [vmem:[%s11082_s3 + $0x90] ss:$8 sps:$4 sm:$0xff]  }
   0x5   :  { %184 = vmatprep.subr.bf16.mxu1 %v7629_v7  ;;  %v7636_v11 = vld [vmem:[%s11080_s1 + $0x20] ss:$36 sps:$4 sm:$0xff]   ;;  %7544 = vmatprep.subr.bf16.mxu0 %v8503_v12  ;;  %v7648_v17 = vld [vmem:[%s11082_s3 + $0x94] ss:$8 sps:$4 sm:$0xff]   ;;  %v7643_v21 = vld [vmem:[%s11082_s3 + $0x10] ss:$8 sps:$4 sm:$0xff]  }
   0x6   :  { %v7639_v15 = vld [vmem:[%s11082_s3 + $0x4] ss:$8 sps:$4 sm:$0xff]   ;;  %v7640_v16 = vld [vmem:[%s11082_s3 + $0x80] ss:$8 sps:$4 sm:$0xff]   ;;  %v7645_v19 = vld [vmem:[%s11082_s3 + $0x14] ss:$8 sps:$4 sm:$0xff]  }
   0x7   :  { %6751 = vmatmul.mubr.msk.bf16.vlgmr.msra.gmra.mrb[0].mxu1 %vm137_vm0, %v41_v5  ;;  %6753 = vmatmul.mubr.msk.bf16.vlgmr.msra.gmra.mrb[0].mxu0 %vm137_vm0, %v41_v5  ;;  %v7637_v18 = vld [vmem:[%s11082_s3] ss:$8 sps:$4 sm:$0xff]   ;;  %v7654_v22 = vld [vmem:[%s11082_s3 + $0xa4] ss:$8 sps:$4 sm:$0xff]   ;;  %v7660_v25 = vld [vmem:[%s11082_s3 + $0xb4] ss:$8 sps:$4 sm:$0xff]  }
   0x8   :  { %185 = vmatpush1.bf16.msra.mxu1 %v7627_v6  ;;  %216 = vmatprep.mubr.bf16.mxu1 %v8502_v1  ;;  %v7651_v23 = vld [vmem:[%s11082_s3 + $0x24] ss:$8 sps:$4 sm:$0xff]   ;;  %v7652_v24 = vld [vmem:[%s11082_s3 + $0xa0] ss:$8 sps:$4 sm:$0xff]   ;;  %v7657_v27 = vld [vmem:[%s11082_s3 + $0x34] ss:$8 sps:$4 sm:$0xff]  }
   0x9   :  { %270 = vmatprep.subr.bf16.mxu1 %v7635_v10  ;;  %7545 = vmatpush3.bf16.msra.mxu0 %v7636_v11  ;;  %v7649_v26 = vld [vmem:[%s11082_s3 + $0x20] ss:$8 sps:$4 sm:$0xff]   ;;  %v7658_v28 = vld [vmem:[%s11082_s3 + $0xb0] ss:$8 sps:$4 sm:$0xff]   ;;  %v7666_v29 = vld [vmem:[%s11082_s3 + $0xc4] ss:$8 sps:$4 sm:$0xff]  }
   0xa   :  { %7546 = vmatprep.mubr.msk.bf16.mxu0 %vm8504_vm1, %v8503_v12  ;;  %681 = vmatprep.subr.bf16.mxu0 %v7642_v13  ;;  %v7655_v30 = vld [vmem:[%s11082_s3 + $0x30] ss:$8 sps:$4 sm:$0xff]   ;;  %v7663_v31 = vld [vmem:[%s11082_s3 + $0x44] ss:$8 sps:$4 sm:$0xff]   ;;  %v7664_v32 = vld [vmem:[%s11082_s3 + $0xc0] ss:$8 sps:$4 sm:$0xff]  }
   0xb   :  { %v7672_v33 = vld [vmem:[%s11082_s3 + $0xd4] ss:$8 sps:$4 sm:$0xff]   ;;  %v7661_v34 = vld [vmem:[%s11082_s3 + $0x40] ss:$8 sps:$4 sm:$0xff]   ;;  %v7670_v36 = vld [vmem:[%s11082_s3 + $0xd0] ss:$8 sps:$4 sm:$0xff]  }
   0xc   :  { %v7669_v35 = vld [vmem:[%s11082_s3 + $0x54] ss:$8 sps:$4 sm:$0xff]   ;;  %v7667_v37 = vld [vmem:[%s11082_s3 + $0x50] ss:$8 sps:$4 sm:$0xff]   ;;  %v7675_v38 = vld [vmem:[%s11082_s3 + $0x64] ss:$8 sps:$4 sm:$0xff]  }
   0xd   :  { %v7673_v39 = vld [vmem:[%s11082_s3 + $0x60] ss:$8 sps:$4 sm:$0xff]   ;;  %v7678_v40 = vld [vmem:[%s11082_s3 + $0xe4] ss:$8 sps:$4 sm:$0xff]   ;;  %v7681_v42 = vld [vmem:[%s11082_s3 + $0x74] ss:$8 sps:$4 sm:$0xff]  }
   0xe   :  { %v7676_v41 = vld [vmem:[%s11082_s3 + $0xe0] ss:$8 sps:$4 sm:$0xff]   ;;  %v7679_v43 = vld [vmem:[%s11082_s3 + $0x70] ss:$8 sps:$4 sm:$0xff]   ;;  %v7684_v44 = vld [vmem:[%s11082_s3 + $0xf4] ss:$8 sps:$4 sm:$0xff]  }
   0xf   :  { %6752 = vmatmul.mubr.msk.bf16.vlgmr.msra.gmra.mrb[4].mxu1 %vm137_vm0, %v41_v5  ;;  %7547 = vmatmul.mubr.msk.bf16.vlgmr.msra.gmra.mrb[4].mxu0 %vm137_vm0, %v41_v5  ;;  %v7682_v45 = vld [vmem:[%s11082_s3 + $0xf0] ss:$8 sps:$4 sm:$0xff]   ;;  %v7687_v46 = vld [vmem:[%s11082_s3 + $0x104] ss:$8 sps:$4 sm:$0xff]   ;;  %v8702_v50 = vsub.s32 0, %v8699_v49  ;;  %v8708_v52 = vsub.s32 1, %v8699_v49 }
  0x10   :  { %271 = vmatpush1.bf16.msra.mxu1 %v7633_v14  ;;  %302 = vmatprep.mubr.bf16.mxu1 %v8502_v1  ;;  %v7690_v47 = vld [vmem:[%s11082_s3 + $0x184] ss:$8 sps:$4 sm:$0xff]   ;;  %v64_v55 = vsub.s32 4, %v8699_v49  ;;  %v56_v56 = vsub.s32 2, %v8699_v49  ;;  %v68_v57 = vsub.s32 5, %v8699_v49  ;;  %v60_v61 = vsub.s32 3, %v8699_v49 }
  0x11   :  { %517 = vmatprep.subr.bf16.mxu1 %v7639_v15  ;;  %682 = vmatpush1.bf16.msra.mxu0 %v7640_v16  ;;  %v42_v51 = vld [vmem:[%s11083_s6] sm:$0xff]  ;;  %v72_v2 = vsub.s32 6, %v8699_v49  ;;  %v76_v13 = vsub.s32 7, %v8699_v49 }
  0x12   :  { %713 = vmatprep.mubr.bf16.mxu0 %v8502_v1  ;;  %683 = vmatprep.subr.bf16.mxu0 %v7648_v17  ;;  %v49_v53 = vrot.slane %v42_v51, %v8702_v50  ;;  %v53_v54 = vrot.slane %v42_v51, %v8708_v52  ;;  %v65_v0 = vrot.slane %v42_v51, %v64_v55  ;;  %v7685_v15 = vld [vmem:[%s11082_s3 + $0x100] ss:$8 sps:$4 sm:$0xff]   ;;  %v7702_v48 = vld [vmem:[%s11082_s3 + $0x1a4] ss:$8 sps:$4 sm:$0xff]  }
  0x13   :  { %v57_v6 = vrot.slane %v42_v51, %v56_v56  ;;  %v69_v7 = vrot.slane %v42_v51, %v68_v57  ;;  %v61_v11 = vrot.slane %v42_v51, %v60_v61 }
  0x15   :  { %684 = vmatpush1.bf16.msra.mxu0 %v7646_v20 }
  0x16   :  { %685 = vmatprep.subr.bf16.mxu0 %v7654_v22  ;;  %v7688_v22 = vld [vmem:[%s11082_s3 + $0x180] ss:$8 sps:$4 sm:$0xff]  }
  0x17   :  { %6754 = vmatmul.mubr.msk.bf16.vlgmr.msra.gmra.mrb[8].mxu1 %vm137_vm0, %v41_v5 }
  0x18   :  { %518 = vmatpush1.bf16.msra.mxu1 %v7637_v18  ;;  %549 = vmatprep.mubr.bf16.mxu1 %v8502_v1  ;;  %v8727_v18 = vrot.slane %v42_v51, %v72_v2 }
  0x19   :  { %519 = vmatprep.subr.bf16.mxu1 %v7645_v19  ;;  %686 = vmatpush1.bf16.msra.mxu0 %v7652_v24 }
  0x1a   :  { %687 = vmatprep.subr.bf16.mxu0 %v7660_v25 }
  0x1c   :  { %520 = vmatpush1.bf16.msra.mxu1 %v7643_v21 }
  0x1d   :  { %521 = vmatprep.subr.bf16.mxu1 %v7651_v23  ;;  %688 = vmatpush1.bf16.msra.mxu0 %v7658_v28  ;;  %v7693_v23 = vld [vmem:[%s11082_s3 + $0x114] ss:$8 sps:$4 sm:$0xff]  }
  0x1e   :  { %689 = vmatprep.subr.bf16.mxu0 %v7666_v29 }
  0x20   :  { %522 = vmatpush1.bf16.msra.mxu1 %v7649_v26 }
  0x21   :  { %523 = vmatprep.subr.bf16.mxu1 %v7657_v27  ;;  %690 = vmatpush1.bf16.msra.mxu0 %v7664_v32  ;;  %v7691_v32 = vld [vmem:[%s11082_s3 + $0x110] ss:$8 sps:$4 sm:$0xff]  }
  0x22   :  { %691 = vmatprep.subr.bf16.mxu0 %v7672_v33  ;;  %v7696_v33 = vld [vmem:[%s11082_s3 + $0x194] ss:$8 sps:$4 sm:$0xff]  }
  0x24   :  { %524 = vmatpush1.bf16.msra.mxu1 %v7655_v30 }
  0x25   :  { %525 = vmatprep.subr.bf16.mxu1 %v7663_v31  ;;  %692 = vmatpush1.bf16.msra.mxu0 %v7670_v36  ;;  %v8741_v36 = vrot.slane %v42_v51, %v76_v13 }
  0x26   :  { %693 = vmatprep.subr.bf16.mxu0 %v7678_v40 }
  0x28   :  { %526 = vmatpush1.bf16.msra.mxu1 %v7661_v34 }
  0x29   :  { %527 = vmatprep.subr.bf16.mxu1 %v7669_v35  ;;  %694 = vmatpush1.bf16.msra.mxu0 %v7676_v41 }
  0x2a   :  { %695 = vmatprep.subr.bf16.mxu0 %v7684_v44 }
  0x2c   :  { %528 = vmatpush1.bf16.msra.mxu1 %v7667_v37  ;;  %v7694_v37 = vld [vmem:[%s11082_s3 + $0x190] ss:$8 sps:$4 sm:$0xff]  }
  0x2d   :  { %529 = vmatprep.subr.bf16.mxu1 %v7675_v38  ;;  %696 = vmatpush1.bf16.msra.mxu0 %v7682_v45 }
  0x2e   :  { %1009 = vmatprep.subr.bf16.mxu0 %v7690_v47 }
  0x30   :  { %530 = vmatpush1.bf16.msra.mxu1 %v7673_v39 }
  0x31   :  { %531 = vmatprep.subr.bf16.mxu1 %v7681_v42 }
  0x34   :  { %532 = vmatpush1.bf16.msra.mxu1 %v7679_v43  ;;  %v7699_v43 = vld [vmem:[%s11082_s3 + $0x124] ss:$8 sps:$4 sm:$0xff]  }
  0x35   :  { %845 = vmatprep.subr.bf16.mxu1 %v7687_v46 }
  0xda   :  { %v175_v58 = vpop.f32.mrb[0].mxu1  ;;  %v261_v12 = vpop.f32.mrb[0].mxu0 }
  0xdb   :  { %v176_v59 = vadd.f32 %v175_v58, %v49_v53  ;;  %v177_v60 = vpop.f32.mrb[1].mxu1  ;;  %v262_v16 = vadd.f32 %v261_v12, %v65_v0  ;;  %v263_v17 = vpop.f32.mrb[1].mxu0 }
  0xdc   :  { %v178_v62 = vadd.f32 %v177_v60, %v53_v54  ;;  %v179_v63 = vpop.f32.mrb[2].mxu1  ;;  %v264_v24 = vadd.f32 %v263_v17, %v69_v7  ;;  %v265_v25 = vpop.f32.mrb[2].mxu0 }
  0xdd   :  { %v372_v3 = vmul.f32 0.01, %v176_v59  ;;  %v180_v4 = vadd.f32 %v179_v63, %v49_v53  ;;  %v181_v5 = vpop.f32.mrb[3].mxu1  ;;  %vm354_vm2 = vcmp.gt.f32.partialorder %v176_v59, 0.0  ;;  %vm358_vm6 = vcmp.gt.f32.partialorder %v262_v16, 0.0  ;;  %v267_v30 = vpop.f32.mrb[3].mxu0 }
  0xde   :  { %vm355_vm3 = vcmp.gt.f32.partialorder %v178_v62, 0.0  ;;  %v373_v8 = vmul.f32 0.01, %v178_v62  ;;  %v182_v9 = vadd.f32 %v181_v5, %v53_v54  ;;  %v376_v29 = vmul.f32 0.01, %v262_v16 }
  0xdf   :  { %vm363_vm4 = vcmp.gt.f32.partialorder %v180_v4, 0.0  ;;  %v381_v10 = vmul.f32 0.01, %v180_v4  ;;  %v390_v19 = vsel %vm354_vm2, %v176_v59, %v372_v3  ;;  %vm359_vm7 = vcmp.gt.f32.partialorder %v264_v24, 0.0  ;;  %v7705_v5 = vld [vmem:[%s11082_s3 + $0x134] ss:$8 sps:$4 sm:$0xff]  }
  0xe0   :  { %vm364_vm5 = vcmp.gt.f32.partialorder %v182_v9, 0.0  ;;  %v382_v14 = vmul.f32 0.01, %v182_v9  ;;  %v391_v20 = vsel %vm355_vm3, %v178_v62, %v373_v8  ;;  %v377_v40 = vmul.f32 0.01, %v264_v24 }
  0xe1   :  { %v399_v21 = vsel %vm363_vm4, %v180_v4, %v381_v10  ;;  %v266_v41 = vadd.f32 %v265_v25, %v65_v0  ;;  %v268_v42 = vadd.f32 %v267_v30, %v69_v7  ;;  %v8750_v47 = vsel %vm358_vm6, %v262_v16, %v376_v29  ;;  %v7697_v62 = vld [vmem:[%s11082_s3 + $0x120] ss:$8 sps:$4 sm:$0xff]   ;;  %v7708_v10 = vld [vmem:[%s11082_s3 + $0x1b4] ss:$8 sps:$4 sm:$0xff]  }
  0xe2   :  { %v425_v26 = vpack.c.bf16 %v399_v21, %v390_v19  ;;  %v400_v27 = vsel %vm364_vm5, %v182_v9, %v382_v14  ;;  %v218_v28 = vpop.f32.mrb[4].mxu1  ;;  %v8767_v0 = vsel %vm359_vm7, %v264_v24, %v377_v40  ;;  %v7700_v4 = vld [vmem:[%s11082_s3 + $0x1a0] ss:$8 sps:$4 sm:$0xff]   ;;  %v7711_v24 = vld [vmem:[%s11082_s3 + $0x144] ss:$8 sps:$4 sm:$0xff]  }
  0xe3   :  { %v589_v31 = vpack.c.bf16 %v400_v27, %v391_v20  ;;  %v219_v34 = vadd.f32 %v218_v28, %v57_v6  ;;  %v220_v35 = vpop.f32.mrb[5].mxu1  ;;  %vm367_vm10 = vcmp.gt.f32.partialorder %v266_v41, 0.0  ;;  %v385_v58 = vmul.f32 0.01, %v266_v41  ;;  %v7706_v20 = vld [vmem:[%s11082_s3 + $0x1b0] ss:$8 sps:$4 sm:$0xff]  }
  0xe4   :  { %550 = vmatmul.mubr.bf16.vlgmr.msra.gmra.mrb[12].mxu1 %v425_v26  ;;  %v221_v38 = vadd.f32 %v220_v35, %v61_v11  ;;  %v222_v39 = vpop.f32.mrb[6].mxu1  ;;  %vm368_vm13 = vcmp.gt.f32.partialorder %v268_v42, 0.0  ;;  %v386_v3 = vmul.f32 0.01, %v268_v42  ;;  %v7714_v27 = vld [vmem:[%s11082_s3 + $0x1c4] ss:$8 sps:$4 sm:$0xff]  }
  0xe5   :  { %714 = vmatmul.mubr.bf16.vlgmr.msra.gmra.mrb[8].mxu0 %v589_v31  ;;  %846 = vmatpush1.bf16.msra.mxu1 %v7685_v15  ;;  %vm356_vm8 = vcmp.gt.f32.partialorder %v219_v34, 0.0  ;;  %v374_v44 = vmul.f32 0.01, %v219_v34  ;;  %v223_v45 = vadd.f32 %v222_v39, %v57_v6  ;;  %v224_v46 = vpop.f32.mrb[7].mxu1  ;;  %v8770_v2 = vsel %vm367_vm10, %v266_v41, %v385_v58  ;;  %v7703_v15 = vld [vmem:[%s11082_s3 + $0x130] ss:$8 sps:$4 sm:$0xff]  }
  0xe6   :  { %1010 = vmatpush1.bf16.msra.mxu0 %v7688_v22  ;;  %847 = vmatprep.subr.bf16.mxu1 %v7693_v23  ;;  %vm357_vm9 = vcmp.gt.f32.partialorder %v221_v38, 0.0  ;;  %v375_v51 = vmul.f32 0.01, %v221_v38  ;;  %v225_v53 = vadd.f32 %v224_v46, %v61_v11  ;;  %v1081_v8 = vpack.c.bf16 %v8770_v2, %v8750_v47  ;;  %v7709_v31 = vld [vmem:[%s11082_s3 + $0x140] ss:$8 sps:$4 sm:$0xff]  }
  0xe7   :  { %1011 = vmatprep.subr.bf16.mxu0 %v7696_v33  ;;  %v8755_v54 = vsel %vm356_vm8, %v219_v34, %v374_v44  ;;  %vm365_vm11 = vcmp.gt.f32.partialorder %v223_v45, 0.0  ;;  %v383_v57 = vmul.f32 0.01, %v223_v45  ;;  %877 = vmatprep.mubr.bf16.mxu1 %v8502_v1  ;;  %v8790_v12 = vsel %vm368_vm13, %v268_v42, %v386_v3  ;;  %v7712_v33 = vld [vmem:[%s11082_s3 + $0x1c0] ss:$8 sps:$4 sm:$0xff]  }
  0xe8   :  { %v8758_v59 = vsel %vm357_vm9, %v221_v38, %v375_v51  ;;  %vm366_vm12 = vcmp.gt.f32.partialorder %v225_v53, 0.0  ;;  %v384_v60 = vmul.f32 0.01, %v225_v53  ;;  %1041 = vmatprep.mubr.bf16.mxu0 %v8502_v1  ;;  %v1245_v16 = vpack.c.bf16 %v8790_v12, %v8767_v0  ;;  %v7717_v34 = vld [vmem:[%s11082_s3 + $0x154] ss:$8 sps:$4 sm:$0xff]  }
  0xe9   :  { %848 = vmatpush1.bf16.msra.mxu1 %v7691_v32  ;;  %v8764_v63 = vsel %vm365_vm11, %v223_v45, %v383_v57  ;;  %v7715_v39 = vld [vmem:[%s11082_s3 + $0x150] ss:$8 sps:$4 sm:$0xff]   ;;  %v7723_v41 = vld [vmem:[%s11082_s3 + $0x164] ss:$8 sps:$4 sm:$0xff]   ;;  %v6741_v42 = vld [vmem:[%s11083_s6 + $0x8] ss:$0 sm:$0xff] }
  0xea   :  { %1012 = vmatpush1.bf16.msra.mxu0 %v7694_v37  ;;  %849 = vmatprep.subr.bf16.mxu1 %v7699_v43  ;;  %v753_v6 = vpack.c.bf16 %v8764_v63, %v8755_v54  ;;  %v8780_v7 = vsel %vm366_vm12, %v225_v53, %v384_v60  ;;  %v304_v9 = vpop.f32.mrb[8].mxu1  ;;  %v7720_v37 = vld [vmem:[%s11082_s3 + $0x1d4] ss:$8 sps:$4 sm:$0xff]   ;;  %v7718_v40 = vld [vmem:[%s11082_s3 + $0x1d0] ss:$8 sps:$4 sm:$0xff]   ;;  %v347_v43 = vpop.f32.mrb[4].mxu0 }
  0xeb   :  { %1013 = vmatprep.subr.bf16.mxu0 %v7702_v48  ;;  %v917_v11 = vpack.c.bf16 %v8780_v7, %v8758_v59  ;;  %v305_v13 = vadd.f32 %v304_v9, %v8727_v18  ;;  %v306_v14 = vpop.f32.mrb[9].mxu1  ;;  %v7726_v44 = vld [vmem:[%s11082_s3 + $0x1e4] ss:$8 sps:$4 sm:$0xff]   ;;  %v348_v45 = vadd.f32 %v6741_v42, %v347_v43  ;;  %v7548_v46 = vpop.f32.mrb[5].mxu0  ;;  %v7721_v51 = vld [vmem:[%s11082_s3 + $0x160] ss:$8 sps:$4 sm:$0xff]  }
  0xec   :  { %v307_v17 = vadd.f32 %v306_v14, %v8741_v36  ;;  %v308_v19 = vpop.f32.mrb[10].mxu1  ;;  %v350_v48 = vpop.f32.mrb[6].mxu0  ;;  %v7724_v60 = vld [vmem:[%s11082_s3 + $0x1e0] ss:$8 sps:$4 sm:$0xff]   ;;  %v7732_v3 = vld [vmem:[%s11082_s3 + $0x1f4] ss:$8 sps:$4 sm:$0xff]  }
  0xed   :  { %850 = vmatpush1.bf16.msra.mxu1 %v7697_v62  ;;  %vm360_vm14 = vcmp.gt.f32.partialorder %v305_v13, 0.0  ;;  %v378_v21 = vmul.f32 0.01, %v305_v13  ;;  %v309_v22 = vadd.f32 %v308_v19, %v8727_v18  ;;  %v310_v23 = vpop.f32.mrb[11].mxu1  ;;  %vm362_vm2 = vcmp.gt.f32.partialorder %v348_v45, 0.0  ;;  %v7549_v58 = vpop.f32.mrb[7].mxu0 }
  0xee   :  { %1014 = vmatpush1.bf16.msra.mxu0 %v7700_v4  ;;  %851 = vmatprep.subr.bf16.mxu1 %v7705_v5  ;;  %vm361_vm15 = vcmp.gt.f32.partialorder %v307_v17, 0.0  ;;  %v379_v25 = vmul.f32 0.01, %v307_v17  ;;  %v311_v26 = vadd.f32 %v310_v23, %v8741_v36  ;;  %v380_v53 = vmul.f32 0.01, %v348_v45 }
  0xef   :  { %1015 = vmatprep.subr.bf16.mxu0 %v7708_v10  ;;  %v8810_v28 = vsel %vm360_vm14, %v305_v13, %v378_v21  ;;  %vm369_vm0 = vcmp.gt.f32.partialorder %v309_v22, 0.0  ;;  %v387_v18 = vmul.f32 0.01, %v309_v22  ;;  %v351_v57 = vadd.f32 %v6741_v42, %v350_v48  ;;  %v7729_v62 = vld [vmem:[%s11082_s3 + $0x174] ss:$8 sps:$4 sm:$0xff]  }
  0xf0   :  { %v8812_v29 = vsel %vm361_vm15, %v307_v17, %v379_v25  ;;  %vm370_vm1 = vcmp.gt.f32.partialorder %v311_v26, 0.0  ;;  %v388_v30 = vmul.f32 0.01, %v311_v26  ;;  %v8861_v4 = vsel %vm362_vm2, %v348_v45, %v380_v53  ;;  %v7727_v9 = vld [vmem:[%s11082_s3 + $0x170] ss:$8 sps:$4 sm:$0xff]  }
  0xf1   :  { %852 = vmatpush1.bf16.msra.mxu1 %v7703_v15  ;;  %v8817_v32 = vsel %vm369_vm0, %v309_v22, %v387_v18  ;;  %vm371_vm3 = vcmp.gt.f32.partialorder %v351_v57, 0.0  ;;  %v389_v5 = vmul.f32 0.01, %v351_v57  ;;  %v7730_v13 = vld [vmem:[%s11082_s3 + $0x1f0] ss:$8 sps:$4 sm:$0xff]  }
  0xf2   :  { %1016 = vmatpush1.bf16.msra.mxu0 %v7706_v20  ;;  %853 = vmatprep.subr.bf16.mxu1 %v7711_v24  ;;  %v1409_v35 = vpack.c.bf16 %v8817_v32, %v8810_v28  ;;  %v8827_v36 = vsel %vm370_vm1, %v311_v26, %v388_v30  ;;  %v7735_v14 = vld [vmem:[%s11082_s3 + $0x204] ss:$8 sps:$4 sm:$0xff]   ;;  %v7733_v19 = vld [vmem:[%s11082_s3 + $0x200] ss:$8 sps:$4 sm:$0xff]   ;;  %v7741_v21 = vld [vmem:[%s11082_s3 + $0x214] ss:$8 sps:$4 sm:$0xff]  }
  0xf3   :  { %1017 = vmatprep.subr.bf16.mxu0 %v7714_v27  ;;  %v1573_v38 = vpack.c.bf16 %v8827_v36, %v8812_v29  ;;  %v8866_v10 = vsel %vm371_vm3, %v351_v57, %v389_v5  ;;  %v7738_v17 = vld [vmem:[%s11082_s3 + $0x284] ss:$8 sps:$4 sm:$0xff]   ;;  %v7736_v20 = vld [vmem:[%s11082_s3 + $0x280] ss:$8 sps:$4 sm:$0xff]   ;;  %v7744_v22 = vld [vmem:[%s11082_s3 + $0x294] ss:$8 sps:$4 sm:$0xff]  }
  0xf4   :  { %v1737_v15 = vpack.c.bf16 %v8866_v10, %v8861_v4  ;;  %v7739_v23 = vld [vmem:[%s11082_s3 + $0x210] ss:$8 sps:$4 sm:$0xff]   ;;  %v7747_v54 = vld [vmem:[%s11082_s3 + $0x224] ss:$8 sps:$4 sm:$0xff]   ;;  %v7745_v63 = vld [vmem:[%s11082_s3 + $0x220] ss:$8 sps:$4 sm:$0xff]  }
  0xf5   :  { %854 = vmatpush1.bf16.msra.mxu1 %v7709_v31  ;;  %v7742_v24 = vld [vmem:[%s11082_s3 + $0x290] ss:$8 sps:$4 sm:$0xff]   ;;  %v7750_v59 = vld [vmem:[%s11082_s3 + $0x2a4] ss:$8 sps:$4 sm:$0xff]   ;;  %v7753_v7 = vld [vmem:[%s11082_s3 + $0x234] ss:$8 sps:$4 sm:$0xff]  }
  0xf6   :  { %1018 = vmatpush1.bf16.msra.mxu0 %v7712_v33  ;;  %855 = vmatprep.subr.bf16.mxu1 %v7717_v34  ;;  %v7751_v25 = vld [vmem:[%s11082_s3 + $0x230] ss:$8 sps:$4 sm:$0xff]   ;;  %v7759_v27 = vld [vmem:[%s11082_s3 + $0x244] ss:$8 sps:$4 sm:$0xff]   ;;  %v7757_v30 = vld [vmem:[%s11082_s3 + $0x240] ss:$8 sps:$4 sm:$0xff]  }
  0xf7   :  { %1019 = vmatprep.subr.bf16.mxu0 %v7720_v37  ;;  %v7754_v26 = vld [vmem:[%s11082_s3 + $0x2b0] ss:$8 sps:$4 sm:$0xff]   ;;  %v7762_v18 = vld [vmem:[%s11082_s3 + $0x2c4] ss:$8 sps:$4 sm:$0xff]   ;;  %v7760_v31 = vld [vmem:[%s11082_s3 + $0x2c0] ss:$8 sps:$4 sm:$0xff]  }
  0xf8   :  { %v7765_v33 = vld [vmem:[%s11082_s3 + $0x254] ss:$8 sps:$4 sm:$0xff]   ;;  %v7763_v37 = vld [vmem:[%s11082_s3 + $0x250] ss:$8 sps:$4 sm:$0xff]   ;;  %v7769_v42 = vld [vmem:[%s11082_s3 + $0x260] ss:$8 sps:$4 sm:$0xff]  }
  0xf9   :  { %856 = vmatpush1.bf16.msra.mxu1 %v7715_v39  ;;  %v7768_v34 = vld [vmem:[%s11082_s3 + $0x2d4] ss:$8 sps:$4 sm:$0xff]   ;;  %v7766_v39 = vld [vmem:[%s11082_s3 + $0x2d0] ss:$8 sps:$4 sm:$0xff]   ;;  %v7772_v43 = vld [vmem:[%s11082_s3 + $0x2e0] ss:$8 sps:$4 sm:$0xff]  }
  0xfa   :  { %1020 = vmatpush1.bf16.msra.mxu0 %v7718_v40  ;;  %857 = vmatprep.subr.bf16.mxu1 %v7723_v41  ;;  %v7771_v40 = vld [vmem:[%s11082_s3 + $0x264] ss:$8 sps:$4 sm:$0xff]   ;;  %v7780_v45 = vld [vmem:[%s11082_s3 + $0x2f4] ss:$8 sps:$4 sm:$0xff]   ;;  %v7775_v46 = vld [vmem:[%s11082_s3 + $0x270] ss:$8 sps:$4 sm:$0xff]  }
  0xfb   :  { %1021 = vmatprep.subr.bf16.mxu0 %v7726_v44  ;;  %v7774_v41 = vld [vmem:[%s11082_s3 + $0x2e4] ss:$8 sps:$4 sm:$0xff]   ;;  %v7777_v44 = vld [vmem:[%s11082_s3 + $0x274] ss:$8 sps:$4 sm:$0xff]   ;;  %v7778_v48 = vld [vmem:[%s11082_s3 + $0x2f0] ss:$8 sps:$4 sm:$0xff]  }
  0xfc   :  { %v7786_v53 = vld [vmem:[%s11082_s3 + $0x384] ss:$8 sps:$4 sm:$0xff]   ;;  %v7781_v57 = vld [vmem:[%s11082_s3 + $0x300] ss:$8 sps:$4 sm:$0xff]   ;;  %v7790_v5 = vld [vmem:[%s11082_s3 + $0x390] ss:$8 sps:$4 sm:$0xff]  }
  0xfd   :  { %858 = vmatpush1.bf16.msra.mxu1 %v7721_v51  ;;  %v7783_v51 = vld [vmem:[%s11082_s3 + $0x304] ss:$8 sps:$4 sm:$0xff]   ;;  %v7784_v58 = vld [vmem:[%s11082_s3 + $0x380] ss:$8 sps:$4 sm:$0xff]   ;;  %v7801_v12 = vld [vmem:[%s11082_s3 + $0x334] ss:$8 sps:$4 sm:$0xff]  }
  0xfe   :  { %1022 = vmatpush1.bf16.msra.mxu0 %v7724_v60  ;;  %859 = vmatprep.subr.bf16.mxu1 %v7729_v62  ;;  %v7789_v60 = vld [vmem:[%s11082_s3 + $0x314] ss:$8 sps:$4 sm:$0xff]   ;;  %v7795_v47 = vld [vmem:[%s11082_s3 + $0x324] ss:$8 sps:$4 sm:$0xff]   ;;  %v7793_v2 = vld [vmem:[%s11082_s3 + $0x320] ss:$8 sps:$4 sm:$0xff]  }
  0xff   :  { %1023 = vmatprep.subr.bf16.mxu0 %v7732_v3  ;;  %v7792_v62 = vld [vmem:[%s11082_s3 + $0x394] ss:$8 sps:$4 sm:$0xff]   ;;  %v7787_v3 = vld [vmem:[%s11082_s3 + $0x310] ss:$8 sps:$4 sm:$0xff]   ;;  %v7798_v0 = vld [vmem:[%s11082_s3 + $0x3a4] ss:$8 sps:$4 sm:$0xff]  }
 0x100   :  { %v7885_v28 = vld [vmem:[%s11082_s3 + $0x424] ss:$8 sps:$4 sm:$0xff]   ;;  %v7883_v32 = vld [vmem:[%s11082_s3 + $0x420] ss:$8 sps:$4 sm:$0xff]   ;;  %v7891_v36 = vld [vmem:[%s11082_s3 + $0x434] ss:$8 sps:$4 sm:$0xff]  }
 0x101   :  { %860 = vmatpush1.bf16.msra.mxu1 %v7727_v9  ;;  %v7799_v9 = vld [vmem:[%s11082_s3 + $0x330] ss:$8 sps:$4 sm:$0xff]   ;;  %v7837_v29 = vld [vmem:[%s11082_s3 + $0x5a4] ss:$8 sps:$4 sm:$0xff]   ;;  %v7864_v4 = vld [vmem:[%s11082_s3 + $0x634] ss:$8 sps:$4 sm:$0xff]  }
 0x102   :  { %1024 = vmatpush1.bf16.msra.mxu0 %v7730_v13  ;;  %1173 = vmatprep.subr.bf16.mxu1 %v7735_v14  ;;  %v7802_v13 = vld [vmem:[%s11082_s3 + $0x3b0] ss:$8 sps:$4 sm:$0xff]   ;;  %v7807_v14 = vld [vmem:[%s11082_s3 + $0x344] ss:$8 sps:$4 sm:$0xff]  }
 0x103   :  { %1337 = vmatprep.subr.bf16.mxu0 %v7738_v17  ;;  %v7810_v17 = vld [vmem:[%s11082_s3 + $0x3c4] ss:$8 sps:$4 sm:$0xff]   ;;  %v7862_v10 = vld [vmem:[%s11082_s3 + $0x630] ss:$8 sps:$4 sm:$0xff]  }
 0x104   :  { %878 = vmatmul.mubr.bf16.vlgmr.msra.gmra.mrb[16].mxu1 %v753_v6  ;;  %v7748_v6 = vld [vmem:[%s11082_s3 + $0x2a0] ss:$8 sps:$4 sm:$0xff]  }
 0x105   :  { %1042 = vmatmul.mubr.bf16.vlgmr.msra.gmra.mrb[12].mxu0 %v917_v11  ;;  %1174 = vmatpush1.bf16.msra.mxu1 %v7733_v19  ;;  %v7756_v11 = vld [vmem:[%s11082_s3 + $0x2b4] ss:$8 sps:$4 sm:$0xff]   ;;  %v7805_v19 = vld [vmem:[%s11082_s3 + $0x340] ss:$8 sps:$4 sm:$0xff]  }
 0x106   :  { %1338 = vmatpush1.bf16.msra.mxu0 %v7736_v20  ;;  %1175 = vmatprep.subr.bf16.mxu1 %v7741_v21  ;;  %v7808_v20 = vld [vmem:[%s11082_s3 + $0x3c0] ss:$8 sps:$4 sm:$0xff]   ;;  %v7813_v21 = vld [vmem:[%s11082_s3 + $0x354] ss:$8 sps:$4 sm:$0xff]  }
 0x107   :  { %1339 = vmatprep.subr.bf16.mxu0 %v7744_v22  ;;  %1205 = vmatprep.mubr.bf16.mxu1 %v8502_v1  ;;  %v7816_v22 = vld [vmem:[%s11082_s3 + $0x3d4] ss:$8 sps:$4 sm:$0xff]  }
 0x108   :  { %1369 = vmatprep.mubr.bf16.mxu0 %v8502_v1 }
 0x109   :  { %1176 = vmatpush1.bf16.msra.mxu1 %v7739_v23  ;;  %v7811_v23 = vld [vmem:[%s11082_s3 + $0x350] ss:$8 sps:$4 sm:$0xff]  }
 0x10a   :  { %1340 = vmatpush1.bf16.msra.mxu0 %v7742_v24  ;;  %1177 = vmatprep.subr.bf16.mxu1 %v7747_v54  ;;  %v7814_v24 = vld [vmem:[%s11082_s3 + $0x3d0] ss:$8 sps:$4 sm:$0xff]   ;;  %v7819_v54 = vld [vmem:[%s11082_s3 + $0x364] ss:$8 sps:$4 sm:$0xff]  }
 0x10b   :  { %1341 = vmatprep.subr.bf16.mxu0 %v7750_v59  ;;  %v7822_v59 = vld [vmem:[%s11082_s3 + $0x3e4] ss:$8 sps:$4 sm:$0xff]  }
 0x10d   :  { %1178 = vmatpush1.bf16.msra.mxu1 %v7745_v63  ;;  %v7817_v63 = vld [vmem:[%s11082_s3 + $0x360] ss:$8 sps:$4 sm:$0xff]  }
 0x10e   :  { %1342 = vmatpush1.bf16.msra.mxu0 %v7748_v6  ;;  %1179 = vmatprep.subr.bf16.mxu1 %v7753_v7  ;;  %v7820_v6 = vld [vmem:[%s11082_s3 + $0x3e0] ss:$8 sps:$4 sm:$0xff]   ;;  %v7825_v7 = vld [vmem:[%s11082_s3 + $0x374] ss:$8 sps:$4 sm:$0xff]  }
 0x10f   :  { %1343 = vmatprep.subr.bf16.mxu0 %v7756_v11  ;;  %v7828_v11 = vld [vmem:[%s11082_s3 + $0x3f4] ss:$8 sps:$4 sm:$0xff]  }
 0x111   :  { %1180 = vmatpush1.bf16.msra.mxu1 %v7751_v25  ;;  %v7823_v25 = vld [vmem:[%s11082_s3 + $0x370] ss:$8 sps:$4 sm:$0xff]  }
 0x112   :  { %1344 = vmatpush1.bf16.msra.mxu0 %v7754_v26  ;;  %1181 = vmatprep.subr.bf16.mxu1 %v7759_v27  ;;  %v7826_v26 = vld [vmem:[%s11082_s3 + $0x3f0] ss:$8 sps:$4 sm:$0xff]   ;;  %v7873_v27 = vld [vmem:[%s11082_s3 + $0x404] ss:$8 sps:$4 sm:$0xff]  }
 0x113   :  { %1345 = vmatprep.subr.bf16.mxu0 %v7762_v18  ;;  %v7831_v18 = vld [vmem:[%s11082_s3 + $0x584] ss:$8 sps:$4 sm:$0xff]  }
 0x115   :  { %1182 = vmatpush1.bf16.msra.mxu1 %v7757_v30  ;;  %v7871_v30 = vld [vmem:[%s11082_s3 + $0x400] ss:$8 sps:$4 sm:$0xff]  }
 0x116   :  { %1346 = vmatpush1.bf16.msra.mxu0 %v7760_v31  ;;  %1183 = vmatprep.subr.bf16.mxu1 %v7765_v33  ;;  %v7829_v31 = vld [vmem:[%s11082_s3 + $0x580] ss:$8 sps:$4 sm:$0xff]   ;;  %v7879_v33 = vld [vmem:[%s11082_s3 + $0x414] ss:$8 sps:$4 sm:$0xff]  }
 0x117   :  { %1347 = vmatprep.subr.bf16.mxu0 %v7768_v34  ;;  %v7834_v34 = vld [vmem:[%s11082_s3 + $0x594] ss:$8 sps:$4 sm:$0xff]  }
 0x119   :  { %1184 = vmatpush1.bf16.msra.mxu1 %v7763_v37  ;;  %v7877_v37 = vld [vmem:[%s11082_s3 + $0x410] ss:$8 sps:$4 sm:$0xff]  }
 0x11a   :  { %1348 = vmatpush1.bf16.msra.mxu0 %v7766_v39  ;;  %1185 = vmatprep.subr.bf16.mxu1 %v7771_v40  ;;  %v7832_v39 = vld [vmem:[%s11082_s3 + $0x590] ss:$8 sps:$4 sm:$0xff]  }
 0x11b   :  { %1349 = vmatprep.subr.bf16.mxu0 %v7774_v41  ;;  %v7889_v40 = vld [vmem:[%s11082_s3 + $0x430] ss:$8 sps:$4 sm:$0xff]  }
 0x11c   :  { %v7838_v41 = vld [vmem:[%s11082_s3 + $0x5b0] ss:$8 sps:$4 sm:$0xff]  }
 0x11d   :  { %1186 = vmatpush1.bf16.msra.mxu1 %v7769_v42  ;;  %v7897_v42 = vld [vmem:[%s11082_s3 + $0x444] ss:$8 sps:$4 sm:$0xff]  }
 0x11e   :  { %1350 = vmatpush1.bf16.msra.mxu0 %v7772_v43  ;;  %1187 = vmatprep.subr.bf16.mxu1 %v7777_v44  ;;  %v7843_v43 = vld [vmem:[%s11082_s3 + $0x5c4] ss:$8 sps:$4 sm:$0xff]   ;;  %v7895_v44 = vld [vmem:[%s11082_s3 + $0x440] ss:$8 sps:$4 sm:$0xff]  }
 0x11f   :  { %1351 = vmatprep.subr.bf16.mxu0 %v7780_v45  ;;  %v7841_v45 = vld [vmem:[%s11082_s3 + $0x5c0] ss:$8 sps:$4 sm:$0xff]  }
 0x121   :  { %1188 = vmatpush1.bf16.msra.mxu1 %v7775_v46  ;;  %v7903_v46 = vld [vmem:[%s11082_s3 + $0x454] ss:$8 sps:$4 sm:$0xff]  }
 0x122   :  { %1352 = vmatpush1.bf16.msra.mxu0 %v7778_v48  ;;  %1501 = vmatprep.subr.bf16.mxu1 %v7783_v51  ;;  %v7846_v48 = vld [vmem:[%s11082_s3 + $0x5d4] ss:$8 sps:$4 sm:$0xff]   ;;  %v7901_v51 = vld [vmem:[%s11082_s3 + $0x450] ss:$8 sps:$4 sm:$0xff]  }
 0x123   :  { %1665 = vmatprep.subr.bf16.mxu0 %v7786_v53  ;;  %v7844_v53 = vld [vmem:[%s11082_s3 + $0x5d0] ss:$8 sps:$4 sm:$0xff]  }
 0x124   :  { %1206 = vmatmul.mubr.bf16.vlgmr.msra.gmra.mrb[20].mxu1 %v1081_v8  ;;  %v7796_v8 = vld [vmem:[%s11082_s3 + $0x3a0] ss:$8 sps:$4 sm:$0xff]  }
 0x125   :  { %1370 = vmatmul.mubr.bf16.vlgmr.msra.gmra.mrb[16].mxu0 %v1245_v16  ;;  %1502 = vmatpush1.bf16.msra.mxu1 %v7781_v57  ;;  %v7804_v16 = vld [vmem:[%s11082_s3 + $0x3b4] ss:$8 sps:$4 sm:$0xff]   ;;  %v7909_v57 = vld [vmem:[%s11082_s3 + $0x464] ss:$8 sps:$4 sm:$0xff]  }
 0x126   :  { %1666 = vmatpush1.bf16.msra.mxu0 %v7784_v58  ;;  %1503 = vmatprep.subr.bf16.mxu1 %v7789_v60  ;;  %v7849_v58 = vld [vmem:[%s11082_s3 + $0x5e4] ss:$8 sps:$4 sm:$0xff]   ;;  %v7907_v60 = vld [vmem:[%s11082_s3 + $0x460] ss:$8 sps:$4 sm:$0xff]  }
 0x127   :  { %1667 = vmatprep.subr.bf16.mxu0 %v7792_v62  ;;  %1533 = vmatprep.mubr.bf16.mxu1 %v8502_v1  ;;  %v7847_v62 = vld [vmem:[%s11082_s3 + $0x5e0] ss:$8 sps:$4 sm:$0xff]  }
 0x128   :  { %1697 = vmatprep.mubr.bf16.mxu0 %v8502_v1 }
 0x129   :  { %1504 = vmatpush1.bf16.msra.mxu1 %v7787_v3  ;;  %v7915_v3 = vld [vmem:[%s11082_s3 + $0x474] ss:$8 sps:$4 sm:$0xff]  }
 0x12a   :  { %1668 = vmatpush1.bf16.msra.mxu0 %v7790_v5  ;;  %1505 = vmatprep.subr.bf16.mxu1 %v7795_v47  ;;  %v7852_v5 = vld [vmem:[%s11082_s3 + $0x5f4] ss:$8 sps:$4 sm:$0xff]   ;;  %v7913_v47 = vld [vmem:[%s11082_s3 + $0x470] ss:$8 sps:$4 sm:$0xff]  }
 0x12b   :  { %1669 = vmatprep.subr.bf16.mxu0 %v7798_v0  ;;  %v7850_v0 = vld [vmem:[%s11082_s3 + $0x5f0] ss:$8 sps:$4 sm:$0xff]  }
 0x12d   :  { %1506 = vmatpush1.bf16.msra.mxu1 %v7793_v2  ;;  %v7855_v2 = vld [vmem:[%s11082_s3 + $0x604] ss:$8 sps:$4 sm:$0xff]  }
 0x12e   :  { %1670 = vmatpush1.bf16.msra.mxu0 %v7796_v8  ;;  %1507 = vmatprep.subr.bf16.mxu1 %v7801_v12  ;;  %v7853_v8 = vld [vmem:[%s11082_s3 + $0x600] ss:$8 sps:$4 sm:$0xff]   ;;  %v7858_v12 = vld [vmem:[%s11082_s3 + $0x614] ss:$8 sps:$4 sm:$0xff]  }
 0x12f   :  { %1671 = vmatprep.subr.bf16.mxu0 %v7804_v16  ;;  %v7856_v16 = vld [vmem:[%s11082_s3 + $0x610] ss:$8 sps:$4 sm:$0xff]  }
 0x131   :  { %1508 = vmatpush1.bf16.msra.mxu1 %v7799_v9  ;;  %v7861_v9 = vld [vmem:[%s11082_s3 + $0x624] ss:$8 sps:$4 sm:$0xff]  }
 0x132   :  { %1672 = vmatpush1.bf16.msra.mxu0 %v7802_v13  ;;  %1509 = vmatprep.subr.bf16.mxu1 %v7807_v14  ;;  %v7859_v13 = vld [vmem:[%s11082_s3 + $0x620] ss:$8 sps:$4 sm:$0xff]  }
 0x133   :  { %1673 = vmatprep.subr.bf16.mxu0 %v7810_v17  ;;  %v7865_v14 = vld [vmem:[%s11082_s3 + $0x640] ss:$8 sps:$4 sm:$0xff]   ;;  %v7870_v17 = vld [vmem:[%s11082_s3 + $0x654] ss:$8 sps:$4 sm:$0xff]  }
 0x135   :  { %1510 = vmatpush1.bf16.msra.mxu1 %v7805_v19  ;;  %v7868_v19 = vld [vmem:[%s11082_s3 + $0x650] ss:$8 sps:$4 sm:$0xff]  }
 0x136   :  { %1674 = vmatpush1.bf16.msra.mxu0 %v7808_v20  ;;  %1511 = vmatprep.subr.bf16.mxu1 %v7813_v21  ;;  %v7876_v20 = vld [vmem:[%s11082_s3 + $0x664] ss:$8 sps:$4 sm:$0xff]   ;;  %v7874_v21 = vld [vmem:[%s11082_s3 + $0x660] ss:$8 sps:$4 sm:$0xff]  }
 0x137   :  { %1675 = vmatprep.subr.bf16.mxu0 %v7816_v22  ;;  %v7882_v22 = vld [vmem:[%s11082_s3 + $0x674] ss:$8 sps:$4 sm:$0xff]  }
 0x139   :  { %1512 = vmatpush1.bf16.msra.mxu1 %v7811_v23  ;;  %v7880_v23 = vld [vmem:[%s11082_s3 + $0x670] ss:$8 sps:$4 sm:$0xff]  }
 0x13a   :  { %1676 = vmatpush1.bf16.msra.mxu0 %v7814_v24  ;;  %1513 = vmatprep.subr.bf16.mxu1 %v7819_v54  ;;  %v7888_v24 = vld [vmem:[%s11082_s3 + $0x684] ss:$8 sps:$4 sm:$0xff]   ;;  %v424_v54 = vld [vmem:[%s11083_s6 + $0x9] sm:$0x3] }
 0x13b   :  { %1677 = vmatprep.subr.bf16.mxu0 %v7822_v59  ;;  %v588_v59 = vld [vmem:[%s11083_s6 + $0xb] sm:$0x3] }
 0x13d   :  { %1514 = vmatpush1.bf16.msra.mxu1 %v7817_v63  ;;  %v430_v63 = vrot.slane %v424_v54, %v8702_v50 }
 0x13e   :  { %1678 = vmatpush1.bf16.msra.mxu0 %v7820_v6  ;;  %1515 = vmatprep.subr.bf16.mxu1 %v7825_v7  ;;  %v434_v6 = vrot.slane %v424_v54, %v8708_v52  ;;  %v594_v7 = vrot.slane %v588_v59, %v8702_v50  ;;  %v7916_v54 = vld [vmem:[%s11082_s3 + $0x6d0] ss:$8 sps:$4 sm:$0xff]  }
 0x13f   :  { %1679 = vmatprep.subr.bf16.mxu0 %v7828_v11  ;;  %v598_v11 = vrot.slane %v588_v59, %v8708_v52 }
 0x141   :  { %1516 = vmatpush1.bf16.msra.mxu1 %v7823_v25 }
 0x142   :  { %1680 = vmatpush1.bf16.msra.mxu0 %v7826_v26  ;;  %1829 = vmatprep.subr.bf16.mxu1 %v7873_v27 }
 0x143   :  { %3448 = vmatprep.subr.bf16.mxu0 %v7831_v18 }
 0x144   :  { %1534 = vmatmul.mubr.bf16.vlgmr.msra.gmra.mrb[24].mxu1 %v1409_v35  ;;  %v7835_v35 = vld [vmem:[%s11082_s3 + $0x5a0] ss:$8 sps:$4 sm:$0xff]  }
 0x145   :  { %1698 = vmatmul.mubr.bf16.vlgmr.msra.gmra.mrb[20].mxu0 %v1573_v38  ;;  %1830 = vmatpush1.bf16.msra.mxu1 %v7871_v30  ;;  %v7840_v38 = vld [vmem:[%s11082_s3 + $0x5b4] ss:$8 sps:$4 sm:$0xff]  }
 0x146   :  { %3449 = vmatpush1.bf16.msra.mxu0 %v7829_v31  ;;  %1831 = vmatprep.subr.bf16.mxu1 %v7879_v33 }
 0x147   :  { %3450 = vmatprep.subr.bf16.mxu0 %v7834_v34  ;;  %1861 = vmatprep.mubr.bf16.mxu1 %v8502_v1 }
 0x149   :  { %1832 = vmatpush1.bf16.msra.mxu1 %v7877_v37 }
 0x14a   :  { %3451 = vmatpush1.bf16.msra.mxu0 %v7832_v39  ;;  %1833 = vmatprep.subr.bf16.mxu1 %v7885_v28 }
 0x14b   :  { %3452 = vmatprep.subr.bf16.mxu0 %v7837_v29 }
 0x14d   :  { %1834 = vmatpush1.bf16.msra.mxu1 %v7883_v32 }
 0x14e   :  { %3453 = vmatpush1.bf16.msra.mxu0 %v7835_v35  ;;  %1835 = vmatprep.subr.bf16.mxu1 %v7891_v36 }
 0x14f   :  { %3454 = vmatprep.subr.bf16.mxu0 %v7840_v38 }
 0x151   :  { %1836 = vmatpush1.bf16.msra.mxu1 %v7889_v40 }
 0x152   :  { %3455 = vmatpush1.bf16.msra.mxu0 %v7838_v41  ;;  %1837 = vmatprep.subr.bf16.mxu1 %v7897_v42 }
 0x153   :  { %3456 = vmatprep.subr.bf16.mxu0 %v7843_v43 }
 0x155   :  { %1838 = vmatpush1.bf16.msra.mxu1 %v7895_v44 }
 0x156   :  { %3457 = vmatpush1.bf16.msra.mxu0 %v7841_v45  ;;  %1839 = vmatprep.subr.bf16.mxu1 %v7903_v46 }
 0x157   :  { %3458 = vmatprep.subr.bf16.mxu0 %v7846_v48 }
 0x159   :  { %1840 = vmatpush1.bf16.msra.mxu1 %v7901_v51 }
 0x15a   :  { %3459 = vmatpush1.bf16.msra.mxu0 %v7844_v53  ;;  %1841 = vmatprep.subr.bf16.mxu1 %v7909_v57 }
 0x15b   :  { %3460 = vmatprep.subr.bf16.mxu0 %v7849_v58 }
 0x15d   :  { %1842 = vmatpush1.bf16.msra.mxu1 %v7907_v60 }
 0x15e   :  { %3461 = vmatpush1.bf16.msra.mxu0 %v7847_v62  ;;  %1843 = vmatprep.subr.bf16.mxu1 %v7915_v3 }
 0x15f   :  { %3462 = vmatprep.subr.bf16.mxu0 %v7852_v5 }
 0x161   :  { %1844 = vmatpush1.bf16.msra.mxu1 %v7913_v47  ;;  %v7886_v47 = vld [vmem:[%s11082_s3 + $0x680] ss:$8 sps:$4 sm:$0xff]  }
 0x162   :  { %3463 = vmatpush1.bf16.msra.mxu0 %v7850_v0 }
 0x163   :  { %3464 = vmatprep.subr.bf16.mxu0 %v7855_v2 }
 0x164   :  { %1862 = vmatmul.mubr.bf16.vlgmr.msra.gmra.mrb[28].mxu1 %v1737_v15  ;;  %v7867_v15 = vld [vmem:[%s11082_s3 + $0x644] ss:$8 sps:$4 sm:$0xff]  }
 0x166   :  { %3465 = vmatpush1.bf16.msra.mxu0 %v7853_v8 }
 0x167   :  { %3466 = vmatprep.subr.bf16.mxu0 %v7858_v12 }
 0x16a   :  { %3467 = vmatpush1.bf16.msra.mxu0 %v7856_v16  ;;  %v7894_v16 = vld [vmem:[%s11082_s3 + $0x694] ss:$8 sps:$4 sm:$0xff]  }
 0x16b   :  { %3468 = vmatprep.subr.bf16.mxu0 %v7861_v9  ;;  %v7892_v9 = vld [vmem:[%s11082_s3 + $0x690] ss:$8 sps:$4 sm:$0xff]  }
 0x16e   :  { %3469 = vmatpush1.bf16.msra.mxu0 %v7859_v13  ;;  %v7900_v13 = vld [vmem:[%s11082_s3 + $0x6a4] ss:$8 sps:$4 sm:$0xff]  }
 0x16f   :  { %3470 = vmatprep.subr.bf16.mxu0 %v7864_v4  ;;  %v7898_v4 = vld [vmem:[%s11082_s3 + $0x6a0] ss:$8 sps:$4 sm:$0xff]  }
 0x172   :  { %3471 = vmatpush1.bf16.msra.mxu0 %v7862_v10  ;;  %v7906_v10 = vld [vmem:[%s11082_s3 + $0x6b4] ss:$8 sps:$4 sm:$0xff]  }
 0x173   :  { %3472 = vmatprep.subr.bf16.mxu0 %v7867_v15  ;;  %v7904_v15 = vld [vmem:[%s11082_s3 + $0x6b0] ss:$8 sps:$4 sm:$0xff]  }
 0x176   :  { %3473 = vmatpush1.bf16.msra.mxu0 %v7865_v14  ;;  %v7912_v14 = vld [vmem:[%s11082_s3 + $0x6c4] ss:$8 sps:$4 sm:$0xff]  }
 0x177   :  { %3474 = vmatprep.subr.bf16.mxu0 %v7870_v17  ;;  %v752_v17 = vld [vmem:[%s11083_s6 + $0xd] sm:$0x3] }
 0x17a   :  { %3475 = vmatpush1.bf16.msra.mxu0 %v7868_v19  ;;  %v7910_v19 = vld [vmem:[%s11082_s3 + $0x6c0] ss:$8 sps:$4 sm:$0xff]  }
 0x17b   :  { %3476 = vmatprep.subr.bf16.mxu0 %v7876_v20  ;;  %v916_v20 = vld [vmem:[%s11083_s6 + $0xf] sm:$0x3] }
 0x17c   :  { %v926_v59 = vrot.slane %v916_v20, %v8708_v52 }
 0x17e   :  { %3477 = vmatpush1.bf16.msra.mxu0 %v7874_v21  ;;  %v7918_v21 = vld [vmem:[%s11082_s3 + $0x6d4] ss:$8 sps:$4 sm:$0xff]  }
 0x17f   :  { %3478 = vmatprep.subr.bf16.mxu0 %v7882_v22  ;;  %v758_v22 = vrot.slane %v752_v17, %v8702_v50 }
 0x182   :  { %3479 = vmatpush1.bf16.msra.mxu0 %v7880_v23  ;;  %v922_v23 = vrot.slane %v916_v20, %v8702_v50  ;;  %v7934_v20 = vld [vmem:[%s11082_s3 + $0x730] ss:$8 sps:$4 sm:$0xff]  }
 0x183   :  { %3491 = vmatprep.subr.bf16.mxu0 %v7888_v24  ;;  %v762_v24 = vrot.slane %v752_v17, %v8708_v52  ;;  %v7931_v17 = vld [vmem:[%s11082_s3 + $0x720] ss:$8 sps:$4 sm:$0xff]  }
 0x1b7   :  { %v551_v25 = vpop.f32.mrb[12].mxu1 }
 0x1b8   :  { %v552_v26 = vadd.f32 %v551_v25, %v430_v63  ;;  %v553_v27 = vpop.f32.mrb[13].mxu1  ;;  %v715_v18 = vpop.f32.mrb[8].mxu0 }
 0x1b9   :  { %v554_v30 = vadd.f32 %v553_v27, %v434_v6  ;;  %v716_v31 = vadd.f32 %v715_v18, %v594_v7  ;;  %v555_v33 = vpop.f32.mrb[14].mxu1  ;;  %v717_v34 = vpop.f32.mrb[9].mxu0  ;;  %v7924_v27 = vld [vmem:[%s11082_s3 + $0x6f4] ss:$8 sps:$4 sm:$0xff]  }
 0x1ba   :  { %vm560_vm4 = vcmp.gt.f32.partialorder %v552_v26, 0.0  ;;  %v564_v37 = vmul.f32 0.01, %v552_v26  ;;  %v556_v39 = vadd.f32 %v555_v33, %v430_v63  ;;  %v718_v28 = vadd.f32 %v717_v34, %v598_v11  ;;  %v557_v29 = vpop.f32.mrb[15].mxu1  ;;  %v719_v32 = vpop.f32.mrb[10].mxu0 }
 0x1bb   :  { %v565_v35 = vmul.f32 0.01, %v554_v30  ;;  %vm561_vm5 = vcmp.gt.f32.partialorder %v554_v30, 0.0  ;;  %vm724_vm6 = vcmp.gt.f32.partialorder %v716_v31, 0.0  ;;  %v721_v38 = vpop.f32.mrb[11].mxu0  ;;  %v558_v42 = vadd.f32 %v557_v29, %v434_v6 }
 0x1bc   :  { %vm562_vm7 = vcmp.gt.f32.partialorder %v556_v39, 0.0  ;;  %v566_v36 = vmul.f32 0.01, %v556_v39  ;;  %v568_v40 = vsel %vm560_vm4, %v552_v26, %v564_v37  ;;  %v728_v41 = vmul.f32 0.01, %v716_v31 }
 0x1bd   :  { %v720_v43 = vadd.f32 %v719_v32, %v594_v7  ;;  %vm725_vm8 = vcmp.gt.f32.partialorder %v718_v28, 0.0  ;;  %v729_v45 = vmul.f32 0.01, %v718_v28  ;;  %v722_v46 = vadd.f32 %v721_v38, %v598_v11  ;;  %v7921_v63 = vld [vmem:[%s11082_s3 + $0x6e4] ss:$8 sps:$4 sm:$0xff]  }
 0x1be   :  { %v570_v44 = vsel %vm562_vm7, %v556_v39, %v566_v36  ;;  %vm563_vm9 = vcmp.gt.f32.partialorder %v558_v42, 0.0  ;;  %v567_v51 = vmul.f32 0.01, %v558_v42  ;;  %v9249_v58 = vsel %vm724_vm6, %v716_v31, %v728_v41  ;;  %v7919_v26 = vld [vmem:[%s11082_s3 + $0x6e0] ss:$8 sps:$4 sm:$0xff]  }
 0x1bf   :  { %v1884_v48 = vpack.c.bf16 %v570_v44, %v568_v40  ;;  %vm726_vm10 = vcmp.gt.f32.partialorder %v720_v43, 0.0  ;;  %v730_v53 = vmul.f32 0.01, %v720_v43  ;;  %vm727_vm11 = vcmp.gt.f32.partialorder %v722_v46, 0.0  ;;  %v7922_v44 = vld [vmem:[%s11082_s3 + $0x6f0] ss:$8 sps:$4 sm:$0xff]  }
 0x1c0   :  { %v731_v57 = vmul.f32 0.01, %v722_v46  ;;  %v569_v60 = vsel %vm561_vm5, %v554_v30, %v565_v35  ;;  %v571_v62 = vsel %vm563_vm9, %v558_v42, %v567_v51  ;;  %v733_v0 = vsel %vm725_vm8, %v718_v28, %v729_v45 }
 0x1c1   :  { %v9252_v3 = vsel %vm726_vm10, %v720_v43, %v730_v53  ;;  %v1885_v5 = vpack.c.bf16 %v571_v62, %v569_v60  ;;  %v7927_v53 = vld [vmem:[%s11082_s3 + $0x704] ss:$8 sps:$4 sm:$0xff]  }
 0x1c2   :  { %v735_v2 = vsel %vm727_vm11, %v722_v46, %v731_v57  ;;  %v1886_v8 = vpack.c.bf16 %v9252_v3, %v9249_v58  ;;  %v7955_v58 = vld [vmem:[%s11082_s3 + $0x7a0] ss:$8 sps:$4 sm:$0xff]   ;;  %v7960_v3 = vld [vmem:[%s11082_s3 + $0x7b4] ss:$8 sps:$4 sm:$0xff]  }
 0x1c3   :  { %v1887_v12 = vpack.c.bf16 %v735_v2, %v733_v0  ;;  %3480 = vmatprep.mubr.bf16.mxu0 %v1885_v5  ;;  %v7925_v2 = vld [vmem:[%s11082_s3 + $0x700] ss:$8 sps:$4 sm:$0xff]  }
 0x1c4   :  { %3481 = vmatmul.mubr.bf16.vlgmr.msra.gmra.mrb[24].mxu0 %v1884_v48 }
 0x1c5   :  { %3492 = vmatpush1.bf16.msra.mxu0 %v7886_v47  ;;  %3523 = vmatprep.mubr.bf16.mxu0 %v1887_v12 }
 0x1c6   :  { %3493 = vmatprep.subr.bf16.mxu0 %v7894_v16 }
 0x1c9   :  { %3494 = vmatpush1.bf16.msra.mxu0 %v7892_v9 }
 0x1ca   :  { %3495 = vmatprep.subr.bf16.mxu0 %v7900_v13  ;;  %v7930_v13 = vld [vmem:[%s11082_s3 + $0x714] ss:$8 sps:$4 sm:$0xff]  }
 0x1cd   :  { %3496 = vmatpush1.bf16.msra.mxu0 %v7898_v4 }
 0x1ce   :  { %3497 = vmatprep.subr.bf16.mxu0 %v7906_v10 }
 0x1d1   :  { %3498 = vmatpush1.bf16.msra.mxu0 %v7904_v15  ;;  %v7928_v15 = vld [vmem:[%s11082_s3 + $0x710] ss:$8 sps:$4 sm:$0xff]  }
 0x1d2   :  { %3499 = vmatprep.subr.bf16.mxu0 %v7912_v14  ;;  %v7933_v14 = vld [vmem:[%s11082_s3 + $0x724] ss:$8 sps:$4 sm:$0xff]  }
 0x1d5   :  { %3500 = vmatpush1.bf16.msra.mxu0 %v7910_v19  ;;  %v7936_v19 = vld [vmem:[%s11082_s3 + $0x734] ss:$8 sps:$4 sm:$0xff]  }
 0x1d6   :  { %3501 = vmatprep.subr.bf16.mxu0 %v7918_v21  ;;  %v7939_v21 = vld [vmem:[%s11082_s3 + $0x744] ss:$8 sps:$4 sm:$0xff]  }
 0x1d7   :  { %v879_v6 = vpop.f32.mrb[16].mxu1 }
 0x1d8   :  { %v880_v7 = vadd.f32 %v879_v6, %v758_v22  ;;  %v1043_v11 = vpop.f32.mrb[12].mxu0  ;;  %v881_v25 = vpop.f32.mrb[17].mxu1 }
 0x1d9   :  { %v1044_v18 = vadd.f32 %v1043_v11, %v922_v23  ;;  %v882_v30 = vadd.f32 %v881_v25, %v762_v24  ;;  %v1045_v31 = vpop.f32.mrb[13].mxu0  ;;  %v883_v33 = vpop.f32.mrb[18].mxu1  ;;  %3502 = vmatpush1.bf16.msra.mxu0 %v7916_v54  ;;  %v7942_v54 = vld [vmem:[%s11082_s3 + $0x754] ss:$8 sps:$4 sm:$0xff]   ;;  %v7945_v25 = vld [vmem:[%s11082_s3 + $0x764] ss:$8 sps:$4 sm:$0xff]  }
 0x1da   :  { %vm888_vm12 = vcmp.gt.f32.partialorder %v880_v7, 0.0  ;;  %v892_v34 = vmul.f32 0.01, %v880_v7  ;;  %v1046_v37 = vadd.f32 %v1045_v31, %v926_v59  ;;  %v884_v39 = vadd.f32 %v883_v33, %v758_v22  ;;  %v1047_v28 = vpop.f32.mrb[14].mxu0  ;;  %v885_v29 = vpop.f32.mrb[19].mxu1  ;;  %3503 = vmatprep.subr.bf16.mxu0 %v7921_v63 }
 0x1db   :  { %vm1052_vm13 = vcmp.gt.f32.partialorder %v1044_v18, 0.0  ;;  %v1056_v32 = vmul.f32 0.01, %v1044_v18  ;;  %vm889_vm14 = vcmp.gt.f32.partialorder %v882_v30, 0.0  ;;  %v893_v35 = vmul.f32 0.01, %v882_v30 }
 0x1dc   :  { %vm1053_vm15 = vcmp.gt.f32.partialorder %v1046_v37, 0.0  ;;  %v1057_v36 = vmul.f32 0.01, %v1046_v37  ;;  %vm890_vm0 = vcmp.gt.f32.partialorder %v884_v39, 0.0  ;;  %v1049_v38 = vpop.f32.mrb[15].mxu0  ;;  %v9309_v40 = vsel %vm888_vm12, %v880_v7, %v892_v34 }
 0x1dd   :  { %v894_v41 = vmul.f32 0.01, %v884_v39  ;;  %v1048_v42 = vadd.f32 %v1047_v28, %v922_v23  ;;  %v886_v43 = vadd.f32 %v885_v29, %v762_v24  ;;  %3504 = vmatpush1.bf16.msra.mxu0 %v7919_v26  ;;  %v9314_v45 = vsel %vm1052_vm13, %v1044_v18, %v1056_v32  ;;  %v1080_v22 = vld [vmem:[%s11083_s6 + $0x11] sm:$0x3]  ;;  %v7937_v23 = vld [vmem:[%s11082_s3 + $0x740] ss:$8 sps:$4 sm:$0xff]  }
 0x1de   :  { %v1050_v46 = vadd.f32 %v1049_v38, %v926_v59  ;;  %v9316_v48 = vsel %vm889_vm14, %v882_v30, %v893_v35  ;;  %v9318_v51 = vsel %vm1053_vm15, %v1046_v37, %v1057_v36  ;;  %3505 = vmatprep.subr.bf16.mxu0 %v7924_v27  ;;  %v1244_v24 = vld [vmem:[%s11083_s6 + $0x13] sm:$0x3]  ;;  %v1086_v59 = vrot.slane %v1080_v22, %v8702_v50  ;;  %v7943_v31 = vld [vmem:[%s11082_s3 + $0x760] ss:$8 sps:$4 sm:$0xff]  }
 0x1df   :  { %v9323_v57 = vsel %vm890_vm0, %v884_v39, %v894_v41  ;;  %vm1054_vm1 = vcmp.gt.f32.partialorder %v1048_v42, 0.0  ;;  %v1058_v60 = vmul.f32 0.01, %v1048_v42  ;;  %vm891_vm2 = vcmp.gt.f32.partialorder %v886_v43, 0.0  ;;  %v7940_v7 = vld [vmem:[%s11082_s3 + $0x750] ss:$8 sps:$4 sm:$0xff]  }
 0x1e0   :  { %v1888_v62 = vpack.c.bf16 %v9323_v57, %v9309_v40  ;;  %v895_v5 = vmul.f32 0.01, %v886_v43  ;;  %vm1055_vm3 = vcmp.gt.f32.partialorder %v1050_v46, 0.0  ;;  %v1059_v47 = vmul.f32 0.01, %v1050_v46 }
 0x1e1   :  { %v9327_v0 = vsel %vm1054_vm1, %v1048_v42, %v1058_v60  ;;  %3506 = vmatpush1.bf16.msra.mxu0 %v7922_v44  ;;  %v1250_v63 = vrot.slane %v1244_v24, %v8702_v50  ;;  %v1090_v6 = vrot.slane %v1080_v22, %v8708_v52  ;;  %v1254_v11 = vrot.slane %v1244_v24, %v8708_v52  ;;  %v7948_v33 = vld [vmem:[%s11082_s3 + $0x774] ss:$8 sps:$4 sm:$0xff]   ;;  %v8003_v40 = vld [vmem:[%s11082_s3 + $0x8a0] ss:$8 sps:$4 sm:$0xff]   ;;  %v8006_v57 = vld [vmem:[%s11082_s3 + $0x8b0] ss:$8 sps:$4 sm:$0xff]  }
 0x1e2   :  { %v1890_v12 = vpack.c.bf16 %v9327_v0, %v9314_v45  ;;  %v9334_v16 = vsel %vm891_vm2, %v886_v43, %v895_v5  ;;  %v9336_v9 = vsel %vm1055_vm3, %v1050_v46, %v1059_v47  ;;  %3507 = vmatprep.subr.bf16.mxu0 %v7927_v53  ;;  %v7946_v47 = vld [vmem:[%s11082_s3 + $0x770] ss:$8 sps:$4 sm:$0xff]   ;;  %v8051_v45 = vld [vmem:[%s11082_s3 + $0x9a0] ss:$8 sps:$4 sm:$0xff]   ;;  %v8056_v0 = vld [vmem:[%s11082_s3 + $0x9b4] ss:$8 sps:$4 sm:$0xff]  }
 0x1e3   :  { %v1889_v4 = vpack.c.bf16 %v9334_v16, %v9316_v48  ;;  %v1891_v10 = vpack.c.bf16 %v9336_v9, %v9318_v51  ;;  %v7963_v48 = vld [vmem:[%s11082_s3 + $0x7c4] ss:$8 sps:$4 sm:$0xff]   ;;  %v1408_v16 = vld [vmem:[%s11083_s6 + $0x15] sm:$0x3]  ;;  %v8009_v9 = vld [vmem:[%s11082_s3 + $0x8c0] ss:$8 sps:$4 sm:$0xff]  }
 0x1e4   :  { %v8008_v51 = vld [vmem:[%s11082_s3 + $0x8b4] ss:$8 sps:$4 sm:$0xff]  }
 0x1e5   :  { %3508 = vmatpush1.bf16.msra.mxu0 %v7925_v2 }
 0x1e6   :  { %3509 = vmatprep.subr.bf16.mxu0 %v7930_v13 }
 0x1e9   :  { %3510 = vmatpush1.bf16.msra.mxu0 %v7928_v15 }
 0x1ea   :  { %3511 = vmatprep.subr.bf16.mxu0 %v7933_v14 }
 0x1ed   :  { %3512 = vmatpush1.bf16.msra.mxu0 %v7931_v17  ;;  %v7951_v17 = vld [vmem:[%s11082_s3 + $0x784] ss:$8 sps:$4 sm:$0xff]  }
 0x1ee   :  { %3513 = vmatprep.subr.bf16.mxu0 %v7936_v19 }
 0x1f1   :  { %3514 = vmatpush1.bf16.msra.mxu0 %v7934_v20 }
 0x1f2   :  { %3515 = vmatprep.subr.bf16.mxu0 %v7939_v21 }
 0x1f5   :  { %3516 = vmatpush1.bf16.msra.mxu0 %v7937_v23 }
 0x1f6   :  { %3517 = vmatprep.subr.bf16.mxu0 %v7942_v54  ;;  %v7949_v54 = vld [vmem:[%s11082_s3 + $0x780] ss:$8 sps:$4 sm:$0xff]  }
 0x1f7   :  { %v1207_v26 = vpop.f32.mrb[20].mxu1 }
 0x1f8   :  { %v1208_v27 = vadd.f32 %v1207_v26, %v1086_v59  ;;  %v1371_v18 = vpop.f32.mrb[16].mxu0  ;;  %v1209_v30 = vpop.f32.mrb[21].mxu1  ;;  %v7952_v26 = vld [vmem:[%s11082_s3 + $0x790] ss:$8 sps:$4 sm:$0xff]  }
 0x1f9   :  { %v1372_v34 = vadd.f32 %v1371_v18, %v1250_v63  ;;  %v1210_v37 = vadd.f32 %v1209_v30, %v1090_v6  ;;  %v1373_v39 = vpop.f32.mrb[17].mxu0  ;;  %v1211_v28 = vpop.f32.mrb[22].mxu1  ;;  %3518 = vmatpush1.bf16.msra.mxu0 %v7940_v7  ;;  %v7954_v7 = vld [vmem:[%s11082_s3 + $0x794] ss:$8 sps:$4 sm:$0xff]  }
 0x1fa   :  { %vm1216_vm4 = vcmp.gt.f32.partialorder %v1208_v27, 0.0  ;;  %v1220_v29 = vmul.f32 0.01, %v1208_v27  ;;  %v1374_v32 = vadd.f32 %v1373_v39, %v1254_v11  ;;  %v1212_v35 = vadd.f32 %v1211_v28, %v1086_v59  ;;  %v1375_v36 = vpop.f32.mrb[18].mxu0  ;;  %v1213_v38 = vpop.f32.mrb[23].mxu1  ;;  %3519 = vmatprep.subr.bf16.mxu0 %v7945_v25 }
 0x1fb   :  { %vm1380_vm5 = vcmp.gt.f32.partialorder %v1372_v34, 0.0  ;;  %v1384_v41 = vmul.f32 0.01, %v1372_v34  ;;  %vm1217_vm6 = vcmp.gt.f32.partialorder %v1210_v37, 0.0  ;;  %v1221_v42 = vmul.f32 0.01, %v1210_v37 }
 0x1fc   :  { %vm1381_vm7 = vcmp.gt.f32.partialorder %v1374_v32, 0.0  ;;  %v1385_v43 = vmul.f32 0.01, %v1374_v32  ;;  %vm1218_vm8 = vcmp.gt.f32.partialorder %v1212_v35, 0.0  ;;  %v1377_v44 = vpop.f32.mrb[19].mxu0  ;;  %v9391_v46 = vsel %vm1216_vm4, %v1208_v27, %v1220_v29 }
 0x1fd   :  { %v1222_v53 = vmul.f32 0.01, %v1212_v35  ;;  %v1376_v60 = vadd.f32 %v1375_v36, %v1250_v63  ;;  %v1214_v5 = vadd.f32 %v1213_v38, %v1090_v6  ;;  %3520 = vmatpush1.bf16.msra.mxu0 %v7943_v31  ;;  %v9396_v2 = vsel %vm1380_vm5, %v1372_v34, %v1384_v41  ;;  %v7957_v27 = vld [vmem:[%s11082_s3 + $0x7a4] ss:$8 sps:$4 sm:$0xff]   ;;  %v1572_v18 = vld [vmem:[%s11083_s6 + $0x17] sm:$0x3] }
 0x1fe   :  { %v1378_v13 = vadd.f32 %v1377_v44, %v1254_v11  ;;  %v9398_v15 = vsel %vm1217_vm6, %v1210_v37, %v1221_v42  ;;  %v9400_v14 = vsel %vm1381_vm7, %v1374_v32, %v1385_v43  ;;  %3521 = vmatprep.subr.bf16.mxu0 %v7948_v33  ;;  %v7966_v30 = vld [vmem:[%s11082_s3 + $0x7d4] ss:$8 sps:$4 sm:$0xff]   ;;  %v1414_v31 = vrot.slane %v1408_v16, %v8702_v50  ;;  %v7964_v37 = vld [vmem:[%s11082_s3 + $0x7d0] ss:$8 sps:$4 sm:$0xff]   ;;  %v7969_v28 = vld [vmem:[%s11082_s3 + $0x7e4] ss:$8 sps:$4 sm:$0xff]  }
 0x1ff   :  { %v9405_v19 = vsel %vm1218_vm8, %v1212_v35, %v1222_v53  ;;  %vm1382_vm9 = vcmp.gt.f32.partialorder %v1376_v60, 0.0  ;;  %v1386_v20 = vmul.f32 0.01, %v1376_v60  ;;  %vm1219_vm10 = vcmp.gt.f32.partialorder %v1214_v5, 0.0  ;;  %v7967_v38 = vld [vmem:[%s11082_s3 + $0x7e0] ss:$8 sps:$4 sm:$0xff]  }
 0x200   :  { %v1892_v21 = vpack.c.bf16 %v9405_v19, %v9391_v46  ;;  %v1223_v22 = vmul.f32 0.01, %v1214_v5  ;;  %vm1383_vm11 = vcmp.gt.f32.partialorder %v1378_v13, 0.0  ;;  %v1387_v23 = vmul.f32 0.01, %v1378_v13 }
 0x201   :  { %v9409_v24 = vsel %vm1382_vm9, %v1376_v60, %v1386_v20  ;;  %3522 = vmatpush1.bf16.msra.mxu0 %v7946_v47  ;;  %v1578_v33 = vrot.slane %v1572_v18, %v8702_v50  ;;  %v1418_v34 = vrot.slane %v1408_v16, %v8708_v52  ;;  %v1582_v39 = vrot.slane %v1572_v18, %v8708_v52  ;;  %v7972_v41 = vld [vmem:[%s11082_s3 + $0x7f4] ss:$8 sps:$4 sm:$0xff]   ;;  %v7975_v18 = vld [vmem:[%s11082_s3 + $0x804] ss:$8 sps:$4 sm:$0xff]   ;;  %v8099_v46 = vld [vmem:[%s11082_s3 + $0xaa0] ss:$8 sps:$4 sm:$0xff]  }
 0x202   :  { %v1894_v59 = vpack.c.bf16 %v9409_v24, %v9396_v2  ;;  %v9416_v63 = vsel %vm1219_vm10, %v1214_v5, %v1223_v22  ;;  %v9418_v6 = vsel %vm1383_vm11, %v1378_v13, %v1387_v23  ;;  %3534 = vmatprep.subr.bf16.mxu0 %v7951_v17  ;;  %v8102_v19 = vld [vmem:[%s11082_s3 + $0xab0] ss:$8 sps:$4 sm:$0xff]   ;;  %v8242_v24 = vld [vmem:[%s11084_s2 + $0x2c] ss:$20 sps:$4 sm:$0xff]  }
 0x203   :  { %v1893_v11 = vpack.c.bf16 %v9416_v63, %v9398_v15  ;;  %v1895_v25 = vpack.c.bf16 %v9418_v6, %v9400_v14  ;;  %v8059_v15 = vld [vmem:[%s11082_s3 + $0x9c4] ss:$8 sps:$4 sm:$0xff]   ;;  %v8057_v63 = vld [vmem:[%s11082_s3 + $0x9c0] ss:$8 sps:$4 sm:$0xff]   ;;  %v8104_v14 = vld [vmem:[%s11082_s3 + $0xab4] ss:$8 sps:$4 sm:$0xff]  }
 0x204   :  { %3524 = vmatmul.mubr.bf16.vlgmr.msra.gmra.mrb[24].mxu0 %v1886_v8  ;;  %v7958_v8 = vld [vmem:[%s11082_s3 + $0x7b0] ss:$8 sps:$4 sm:$0xff]   ;;  %v8105_v6 = vld [vmem:[%s11082_s3 + $0xac0] ss:$8 sps:$4 sm:$0xff]  }
 0x205   :  { %3535 = vmatpush1.bf16.msra.mxu0 %v7949_v54  ;;  %3566 = vmatprep.mubr.bf16.mxu0 %v1889_v4  ;;  %v7961_v4 = vld [vmem:[%s11082_s3 + $0x7c0] ss:$8 sps:$4 sm:$0xff]   ;;  %v8239_v2 = vld [vmem:[%s11084_s2 + $0x4] ss:$20 sps:$4 sm:$0xff]  }
 0x206   :  { %3536 = vmatprep.subr.bf16.mxu0 %v7954_v7  ;;  %4389 = vmatprep.subr.bf16.mxu1 %v8239_v2  ;;  %v8185_v2 = vld [vmem:[%s11082_s3 + $0xc64] ss:$8 sps:$4 sm:$0xff]  }
 0x209   :  { %3537 = vmatpush1.bf16.msra.mxu0 %v7952_v26 }
 0x20a   :  { %3538 = vmatprep.subr.bf16.mxu0 %v7957_v27 }
 0x20d   :  { %3539 = vmatpush1.bf16.msra.mxu0 %v7955_v58 }
 0x20e   :  { %3540 = vmatprep.subr.bf16.mxu0 %v7960_v3  ;;  %v7970_v3 = vld [vmem:[%s11082_s3 + $0x7f0] ss:$8 sps:$4 sm:$0xff]  }
 0x211   :  { %3541 = vmatpush1.bf16.msra.mxu0 %v7958_v8 }
 0x212   :  { %3542 = vmatprep.subr.bf16.mxu0 %v7963_v48 }
 0x215   :  { %3543 = vmatpush1.bf16.msra.mxu0 %v7961_v4 }
 0x216   :  { %3544 = vmatprep.subr.bf16.mxu0 %v7966_v30 }
 0x217   :  { %v1535_v29 = vpop.f32.mrb[24].mxu1 }
 0x218   :  { %v1536_v32 = vadd.f32 %v1535_v29, %v1414_v31  ;;  %v1699_v35 = vpop.f32.mrb[20].mxu0  ;;  %v1537_v36 = vpop.f32.mrb[25].mxu1 }
 0x219   :  { %v1700_v42 = vadd.f32 %v1699_v35, %v1578_v33  ;;  %v1538_v43 = vadd.f32 %v1537_v36, %v1418_v34  ;;  %v1701_v44 = vpop.f32.mrb[21].mxu0  ;;  %v1539_v53 = vpop.f32.mrb[26].mxu1  ;;  %3545 = vmatpush1.bf16.msra.mxu0 %v7964_v37  ;;  %v7978_v36 = vld [vmem:[%s11082_s3 + $0x814] ss:$8 sps:$4 sm:$0xff]  }
 0x21a   :  { %vm1544_vm12 = vcmp.gt.f32.partialorder %v1536_v32, 0.0  ;;  %v1548_v60 = vmul.f32 0.01, %v1536_v32  ;;  %v1702_v5 = vadd.f32 %v1701_v44, %v1582_v39  ;;  %v1540_v47 = vadd.f32 %v1539_v53, %v1414_v31  ;;  %v1703_v13 = vpop.f32.mrb[22].mxu0  ;;  %v1541_v17 = vpop.f32.mrb[27].mxu1  ;;  %3546 = vmatprep.subr.bf16.mxu0 %v7969_v28 }
 0x21b   :  { %vm1708_vm13 = vcmp.gt.f32.partialorder %v1700_v42, 0.0  ;;  %v1712_v20 = vmul.f32 0.01, %v1700_v42  ;;  %vm1545_vm14 = vcmp.gt.f32.partialorder %v1538_v43, 0.0  ;;  %v1549_v22 = vmul.f32 0.01, %v1538_v43 }
 0x21c   :  { %vm1709_vm15 = vcmp.gt.f32.partialorder %v1702_v5, 0.0  ;;  %v1713_v23 = vmul.f32 0.01, %v1702_v5  ;;  %vm1546_vm0 = vcmp.gt.f32.partialorder %v1540_v47, 0.0  ;;  %v1705_v54 = vpop.f32.mrb[23].mxu0  ;;  %v9479_v7 = vsel %vm1544_vm12, %v1536_v32, %v1548_v60 }
 0x21d   :  { %v1550_v26 = vmul.f32 0.01, %v1540_v47  ;;  %v1704_v27 = vadd.f32 %v1703_v13, %v1578_v33  ;;  %v1542_v58 = vadd.f32 %v1541_v17, %v1418_v34  ;;  %3547 = vmatpush1.bf16.msra.mxu0 %v7967_v38  ;;  %v9484_v8 = vsel %vm1708_vm13, %v1700_v42, %v1712_v20  ;;  %v7973_v28 = vld [vmem:[%s11082_s3 + $0x800] ss:$8 sps:$4 sm:$0xff]   ;;  %v7976_v42 = vld [vmem:[%s11082_s3 + $0x810] ss:$8 sps:$4 sm:$0xff]  }
 0x21e   :  { %v1706_v48 = vadd.f32 %v1705_v54, %v1582_v39  ;;  %v9486_v16 = vsel %vm1545_vm14, %v1538_v43, %v1549_v22  ;;  %v9488_v4 = vsel %vm1709_vm15, %v1702_v5, %v1713_v23  ;;  %3548 = vmatprep.subr.bf16.mxu0 %v7972_v41  ;;  %v7981_v43 = vld [vmem:[%s11082_s3 + $0x824] ss:$8 sps:$4 sm:$0xff]   ;;  %v7979_v44 = vld [vmem:[%s11082_s3 + $0x820] ss:$8 sps:$4 sm:$0xff]   ;;  %v7984_v53 = vld [vmem:[%s11082_s3 + $0x834] ss:$8 sps:$4 sm:$0xff]  }
 0x21f   :  { %v9493_v30 = vsel %vm1546_vm0, %v1540_v47, %v1550_v26  ;;  %vm1710_vm1 = vcmp.gt.f32.partialorder %v1704_v27, 0.0  ;;  %v1714_v31 = vmul.f32 0.01, %v1704_v27  ;;  %vm1547_vm2 = vcmp.gt.f32.partialorder %v1542_v58, 0.0  ;;  %v7982_v60 = vld [vmem:[%s11082_s3 + $0x830] ss:$8 sps:$4 sm:$0xff]  }
 0x220   :  { %v1896_v33 = vpack.c.bf16 %v9493_v30, %v9479_v7  ;;  %v1551_v34 = vmul.f32 0.01, %v1542_v58  ;;  %vm1711_vm3 = vcmp.gt.f32.partialorder %v1706_v48, 0.0  ;;  %v1715_v37 = vmul.f32 0.01, %v1706_v48 }
 0x221   :  { %v9497_v39 = vsel %vm1710_vm1, %v1704_v27, %v1714_v31  ;;  %3549 = vmatpush1.bf16.msra.mxu0 %v7970_v3  ;;  %v7987_v5 = vld [vmem:[%s11082_s3 + $0x844] ss:$8 sps:$4 sm:$0xff]   ;;  %v1736_v47 = vld [vmem:[%s11083_s6 + $0x19] sm:$0x3]  ;;  %v7985_v13 = vld [vmem:[%s11082_s3 + $0x840] ss:$8 sps:$4 sm:$0xff]  }
 0x222   :  { %v1898_v29 = vpack.c.bf16 %v9497_v39, %v9484_v8  ;;  %v9504_v32 = vsel %vm1547_vm2, %v1542_v58, %v1551_v34  ;;  %v9506_v35 = vsel %vm1711_vm3, %v1706_v48, %v1715_v37  ;;  %3550 = vmatprep.subr.bf16.mxu0 %v7975_v18  ;;  %v7990_v17 = vld [vmem:[%s11082_s3 + $0x854] ss:$8 sps:$4 sm:$0xff]   ;;  %v1742_v20 = vrot.slane %v1736_v47, %v8702_v50  ;;  %v7988_v23 = vld [vmem:[%s11082_s3 + $0x850] ss:$8 sps:$4 sm:$0xff]   ;;  %v7993_v54 = vld [vmem:[%s11082_s3 + $0x864] ss:$8 sps:$4 sm:$0xff]  }
 0x223   :  { %v1897_v38 = vpack.c.bf16 %v9504_v32, %v9486_v16  ;;  %v1899_v41 = vpack.c.bf16 %v9506_v35, %v9488_v4  ;;  %v1746_v22 = vrot.slane %v1736_v47, %v8708_v52  ;;  %v7991_v18 = vld [vmem:[%s11082_s3 + $0x860] ss:$8 sps:$4 sm:$0xff]   ;;  %v8152_v16 = vld [vmem:[%s11082_s3 + $0xbb4] ss:$8 sps:$4 sm:$0xff]   ;;  %v8198_v30 = vld [vmem:[%s11082_s3 + $0xcb0] ss:$8 sps:$4 sm:$0xff]  }
 0x224   :  { %v8240_v32 = vld [vmem:[%s11084_s2 + $0x28] ss:$20 sps:$4 sm:$0xff]   ;;  %v8275_v8 = vld [vmem:[%s11084_s2 + $0x1e4] ss:$20 sps:$4 sm:$0xff]   ;;  %v8273_v39 = vld [vmem:[%s11084_s2 + $0x1e0] ss:$20 sps:$4 sm:$0xff]  }
 0x225   :  { %3551 = vmatpush1.bf16.msra.mxu0 %v7973_v28  ;;  %v7996_v28 = vld [vmem:[%s11082_s3 + $0x874] ss:$8 sps:$4 sm:$0xff]   ;;  %v8195_v7 = vld [vmem:[%s11082_s3 + $0xca0] ss:$8 sps:$4 sm:$0xff]  }
 0x226   :  { %3552 = vmatprep.subr.bf16.mxu0 %v7978_v36  ;;  %v8200_v4 = vld [vmem:[%s11082_s3 + $0xcb4] ss:$8 sps:$4 sm:$0xff]   ;;  %v8201_v35 = vld [vmem:[%s11082_s3 + $0xcc0] ss:$8 sps:$4 sm:$0xff]  }
 0x229   :  { %3553 = vmatpush1.bf16.msra.mxu0 %v7976_v42 }
 0x22a   :  { %3554 = vmatprep.subr.bf16.mxu0 %v7981_v43 }
 0x22d   :  { %3555 = vmatpush1.bf16.msra.mxu0 %v7979_v44 }
 0x22e   :  { %3556 = vmatprep.subr.bf16.mxu0 %v7984_v53 }
 0x231   :  { %3557 = vmatpush1.bf16.msra.mxu0 %v7982_v60 }
 0x232   :  { %3558 = vmatprep.subr.bf16.mxu0 %v7987_v5  ;;  %v7994_v5 = vld [vmem:[%s11082_s3 + $0x870] ss:$8 sps:$4 sm:$0xff]  }
 0x235   :  { %3559 = vmatpush1.bf16.msra.mxu0 %v7985_v13  ;;  %v7999_v13 = vld [vmem:[%s11082_s3 + $0x884] ss:$8 sps:$4 sm:$0xff]  }
 0x236   :  { %3560 = vmatprep.subr.bf16.mxu0 %v7990_v17 }
 0x237   :  { %v1863_v26 = vpop.f32.mrb[28].mxu1 }
 0x238   :  { %v1864_v27 = vadd.f32 %v1863_v26, %v1742_v20  ;;  %v1865_v58 = vpop.f32.mrb[29].mxu1  ;;  %v8000_v26 = vld [vmem:[%s11082_s3 + $0x890] ss:$8 sps:$4 sm:$0xff]  }
 0x239   :  { %v1866_v3 = vadd.f32 %v1865_v58, %v1746_v22  ;;  %v1867_v48 = vpop.f32.mrb[30].mxu1  ;;  %3561 = vmatpush1.bf16.msra.mxu0 %v7988_v23  ;;  %v7997_v23 = vld [vmem:[%s11082_s3 + $0x880] ss:$8 sps:$4 sm:$0xff]   ;;  %v8012_v58 = vld [vmem:[%s11082_s3 + $0x8d0] ss:$8 sps:$4 sm:$0xff]  }
 0x23a   :  { %vm1872_vm4 = vcmp.gt.f32.partialorder %v1864_v27, 0.0  ;;  %v1876_v31 = vmul.f32 0.01, %v1864_v27  ;;  %v1868_v34 = vadd.f32 %v1867_v48, %v1742_v20  ;;  %v1869_v37 = vpop.f32.mrb[31].mxu1  ;;  %3562 = vmatprep.subr.bf16.mxu0 %v7993_v54  ;;  %v8002_v54 = vld [vmem:[%s11082_s3 + $0x894] ss:$8 sps:$4 sm:$0xff]  }
 0x23b   :  { %vm1873_vm5 = vcmp.gt.f32.partialorder %v1866_v3, 0.0  ;;  %v1877_v36 = vmul.f32 0.01, %v1866_v3  ;;  %v1870_v42 = vadd.f32 %v1869_v37, %v1746_v22  ;;  %v8015_v48 = vld [vmem:[%s11082_s3 + $0x8e0] ss:$8 sps:$4 sm:$0xff]  }
 0x23c   :  { %v9556_v43 = vsel %vm1872_vm4, %v1864_v27, %v1876_v31  ;;  %vm1874_vm6 = vcmp.gt.f32.partialorder %v1868_v34, 0.0  ;;  %v1878_v44 = vmul.f32 0.01, %v1868_v34  ;;  %v8005_v27 = vld [vmem:[%s11082_s3 + $0x8a4] ss:$8 sps:$4 sm:$0xff]  }
 0x23d   :  { %vm1875_vm7 = vcmp.gt.f32.partialorder %v1870_v42, 0.0  ;;  %v1879_v53 = vmul.f32 0.01, %v1870_v42  ;;  %v9558_v60 = vsel %vm1873_vm5, %v1866_v3, %v1877_v36  ;;  %3563 = vmatpush1.bf16.msra.mxu0 %v7991_v18  ;;  %v8017_v3 = vld [vmem:[%s11082_s3 + $0x8e4] ss:$8 sps:$4 sm:$0xff]  }
 0x23e   :  { %v9563_v47 = vsel %vm1874_vm6, %v1868_v34, %v1878_v44  ;;  %3564 = vmatprep.subr.bf16.mxu0 %v7996_v28  ;;  %v8020_v18 = vld [vmem:[%s11082_s3 + $0x8f4] ss:$8 sps:$4 sm:$0xff]   ;;  %v8018_v31 = vld [vmem:[%s11082_s3 + $0x8f0] ss:$8 sps:$4 sm:$0xff]   ;;  %v8023_v34 = vld [vmem:[%s11082_s3 + $0x904] ss:$8 sps:$4 sm:$0xff]  }
 0x23f   :  { %v4966_v17 = vpack.c.bf16 %v9563_v47, %v9556_v43  ;;  %v9570_v20 = vsel %vm1875_vm7, %v1870_v42, %v1879_v53  ;;  %v8021_v37 = vld [vmem:[%s11082_s3 + $0x900] ss:$8 sps:$4 sm:$0xff]   ;;  %v8026_v28 = vld [vmem:[%s11082_s3 + $0x914] ss:$8 sps:$4 sm:$0xff]   ;;  %v8024_v36 = vld [vmem:[%s11082_s3 + $0x910] ss:$8 sps:$4 sm:$0xff]  }
 0x240   :  { %v4967_v22 = vpack.c.bf16 %v9570_v20, %v9558_v60  ;;  %v8029_v42 = vld [vmem:[%s11082_s3 + $0x924] ss:$8 sps:$4 sm:$0xff]   ;;  %v8027_v44 = vld [vmem:[%s11082_s3 + $0x920] ss:$8 sps:$4 sm:$0xff]   ;;  %v8032_v53 = vld [vmem:[%s11082_s3 + $0x934] ss:$8 sps:$4 sm:$0xff]  }
 0x241   :  { %3565 = vmatpush1.bf16.msra.mxu0 %v7994_v5  ;;  %v8030_v5 = vld [vmem:[%s11082_s3 + $0x930] ss:$8 sps:$4 sm:$0xff]  }
 0x242   :  { %3577 = vmatprep.subr.bf16.mxu0 %v7999_v13  ;;  %v8035_v13 = vld [vmem:[%s11082_s3 + $0x944] ss:$8 sps:$4 sm:$0xff]   ;;  %v8379_v60 = vld [vmem:[%s11086_s4 + $0xd8] sm:$0xff]  }
 0x243   :  { %v8380_v20 = vld [vmem:[%s11086_s4 + $0x98] sm:$0xff]  }
 0x244   :  { %3567 = vmatmul.mubr.bf16.vlgmr.msra.gmra.mrb[24].mxu0 %v1888_v62  ;;  %v8011_v62 = vld [vmem:[%s11082_s3 + $0x8c4] ss:$8 sps:$4 sm:$0xff]   ;;  %v8395_v43 = vld [vmem:[%s11086_s4 + $0x58] sm:$0xff]  }
 0x245   :  { %3578 = vmatpush1.bf16.msra.mxu0 %v7997_v23  ;;  %3609 = vmatprep.mubr.bf16.mxu0 %v1891_v10  ;;  %v8014_v10 = vld [vmem:[%s11082_s3 + $0x8d4] ss:$8 sps:$4 sm:$0xff]   ;;  %v8033_v23 = vld [vmem:[%s11082_s3 + $0x940] ss:$8 sps:$4 sm:$0xff]  }
 0x246   :  { %3579 = vmatprep.subr.bf16.mxu0 %v8002_v54  ;;  %v8038_v54 = vld [vmem:[%s11082_s3 + $0x954] ss:$8 sps:$4 sm:$0xff]  }
 0x247   :  { %v8396_v47 = vld [vmem:[%s11086_s4 + $0x18] sm:$0xff]  }
 0x249   :  { %3580 = vmatpush1.bf16.msra.mxu0 %v8000_v26  ;;  %v8036_v26 = vld [vmem:[%s11082_s3 + $0x950] ss:$8 sps:$4 sm:$0xff]  }
 0x24a   :  { %3581 = vmatprep.subr.bf16.mxu0 %v8005_v27  ;;  %v8041_v27 = vld [vmem:[%s11082_s3 + $0x964] ss:$8 sps:$4 sm:$0xff]  }
 0x24d   :  { %3582 = vmatpush1.bf16.msra.mxu0 %v8003_v40  ;;  %v8039_v40 = vld [vmem:[%s11082_s3 + $0x960] ss:$8 sps:$4 sm:$0xff]  }
 0x24e   :  { %3583 = vmatprep.subr.bf16.mxu0 %v8008_v51  ;;  %v8044_v51 = vld [vmem:[%s11082_s3 + $0x974] ss:$8 sps:$4 sm:$0xff]  }
 0x251   :  { %3584 = vmatpush1.bf16.msra.mxu0 %v8006_v57  ;;  %v8042_v57 = vld [vmem:[%s11082_s3 + $0x970] ss:$8 sps:$4 sm:$0xff]  }
 0x252   :  { %3585 = vmatprep.subr.bf16.mxu0 %v8011_v62  ;;  %v8047_v62 = vld [vmem:[%s11082_s3 + $0x984] ss:$8 sps:$4 sm:$0xff]  }
 0x255   :  { %3586 = vmatpush1.bf16.msra.mxu0 %v8009_v9  ;;  %v8045_v9 = vld [vmem:[%s11082_s3 + $0x980] ss:$8 sps:$4 sm:$0xff]  }
 0x256   :  { %3587 = vmatprep.subr.bf16.mxu0 %v8014_v10  ;;  %v8050_v10 = vld [vmem:[%s11082_s3 + $0x994] ss:$8 sps:$4 sm:$0xff]  }
 0x259   :  { %3588 = vmatpush1.bf16.msra.mxu0 %v8012_v58  ;;  %v8048_v58 = vld [vmem:[%s11082_s3 + $0x990] ss:$8 sps:$4 sm:$0xff]  }
 0x25a   :  { %3589 = vmatprep.subr.bf16.mxu0 %v8017_v3  ;;  %v8053_v3 = vld [vmem:[%s11082_s3 + $0x9a4] ss:$8 sps:$4 sm:$0xff]  }
 0x25d   :  { %3590 = vmatpush1.bf16.msra.mxu0 %v8015_v48  ;;  %v8060_v48 = vld [vmem:[%s11082_s3 + $0x9d0] ss:$8 sps:$4 sm:$0xff]  }
 0x25e   :  { %3591 = vmatprep.subr.bf16.mxu0 %v8020_v18  ;;  %v8065_v18 = vld [vmem:[%s11082_s3 + $0x9e4] ss:$8 sps:$4 sm:$0xff]  }
 0x261   :  { %3592 = vmatpush1.bf16.msra.mxu0 %v8018_v31  ;;  %v8063_v31 = vld [vmem:[%s11082_s3 + $0x9e0] ss:$8 sps:$4 sm:$0xff]  }
 0x262   :  { %3593 = vmatprep.subr.bf16.mxu0 %v8023_v34  ;;  %v8068_v34 = vld [vmem:[%s11082_s3 + $0x9f4] ss:$8 sps:$4 sm:$0xff]  }
 0x265   :  { %3594 = vmatpush1.bf16.msra.mxu0 %v8021_v37  ;;  %v8066_v37 = vld [vmem:[%s11082_s3 + $0x9f0] ss:$8 sps:$4 sm:$0xff]  }
 0x266   :  { %3595 = vmatprep.subr.bf16.mxu0 %v8026_v28  ;;  %v8071_v28 = vld [vmem:[%s11082_s3 + $0xa04] ss:$8 sps:$4 sm:$0xff]  }
 0x269   :  { %3596 = vmatpush1.bf16.msra.mxu0 %v8024_v36  ;;  %v8069_v36 = vld [vmem:[%s11082_s3 + $0xa00] ss:$8 sps:$4 sm:$0xff]  }
 0x26a   :  { %3597 = vmatprep.subr.bf16.mxu0 %v8029_v42  ;;  %v8074_v42 = vld [vmem:[%s11082_s3 + $0xa14] ss:$8 sps:$4 sm:$0xff]  }
 0x26d   :  { %3598 = vmatpush1.bf16.msra.mxu0 %v8027_v44  ;;  %v8072_v44 = vld [vmem:[%s11082_s3 + $0xa10] ss:$8 sps:$4 sm:$0xff]  }
 0x26e   :  { %3599 = vmatprep.subr.bf16.mxu0 %v8032_v53  ;;  %v8077_v53 = vld [vmem:[%s11082_s3 + $0xa24] ss:$8 sps:$4 sm:$0xff]  }
 0x271   :  { %3600 = vmatpush1.bf16.msra.mxu0 %v8030_v5  ;;  %v8075_v5 = vld [vmem:[%s11082_s3 + $0xa20] ss:$8 sps:$4 sm:$0xff]  }
 0x272   :  { %3601 = vmatprep.subr.bf16.mxu0 %v8035_v13  ;;  %v8080_v13 = vld [vmem:[%s11082_s3 + $0xa34] ss:$8 sps:$4 sm:$0xff]  }
 0x275   :  { %3602 = vmatpush1.bf16.msra.mxu0 %v8033_v23  ;;  %v8078_v23 = vld [vmem:[%s11082_s3 + $0xa30] ss:$8 sps:$4 sm:$0xff]  }
 0x276   :  { %3603 = vmatprep.subr.bf16.mxu0 %v8038_v54  ;;  %v8083_v54 = vld [vmem:[%s11082_s3 + $0xa44] ss:$8 sps:$4 sm:$0xff]  }
 0x279   :  { %3604 = vmatpush1.bf16.msra.mxu0 %v8036_v26  ;;  %v8081_v26 = vld [vmem:[%s11082_s3 + $0xa40] ss:$8 sps:$4 sm:$0xff]  }
 0x27a   :  { %3605 = vmatprep.subr.bf16.mxu0 %v8041_v27  ;;  %v8086_v27 = vld [vmem:[%s11082_s3 + $0xa54] ss:$8 sps:$4 sm:$0xff]  }
 0x27d   :  { %3606 = vmatpush1.bf16.msra.mxu0 %v8039_v40  ;;  %v8084_v40 = vld [vmem:[%s11082_s3 + $0xa50] ss:$8 sps:$4 sm:$0xff]  }
 0x27e   :  { %3607 = vmatprep.subr.bf16.mxu0 %v8044_v51  ;;  %v8089_v51 = vld [vmem:[%s11082_s3 + $0xa64] ss:$8 sps:$4 sm:$0xff]  }
 0x281   :  { %3608 = vmatpush1.bf16.msra.mxu0 %v8042_v57  ;;  %v8087_v57 = vld [vmem:[%s11082_s3 + $0xa60] ss:$8 sps:$4 sm:$0xff]  }
 0x282   :  { %3620 = vmatprep.subr.bf16.mxu0 %v8047_v62  ;;  %v8092_v62 = vld [vmem:[%s11082_s3 + $0xa74] ss:$8 sps:$4 sm:$0xff]  }
 0x284   :  { %3610 = vmatmul.mubr.bf16.vlgmr.msra.gmra.mrb[24].mxu0 %v1890_v12  ;;  %v8054_v12 = vld [vmem:[%s11082_s3 + $0x9b0] ss:$8 sps:$4 sm:$0xff]  }
 0x285   :  { %3621 = vmatpush1.bf16.msra.mxu0 %v8045_v9  ;;  %3652 = vmatprep.mubr.bf16.mxu0 %v1893_v11  ;;  %v8062_v11 = vld [vmem:[%s11082_s3 + $0x9d4] ss:$8 sps:$4 sm:$0xff]   ;;  %v8090_v9 = vld [vmem:[%s11082_s3 + $0xa70] ss:$8 sps:$4 sm:$0xff]  }
 0x286   :  { %3622 = vmatprep.subr.bf16.mxu0 %v8050_v10  ;;  %v8095_v10 = vld [vmem:[%s11082_s3 + $0xa84] ss:$8 sps:$4 sm:$0xff]  }
 0x289   :  { %3623 = vmatpush1.bf16.msra.mxu0 %v8048_v58  ;;  %v8093_v58 = vld [vmem:[%s11082_s3 + $0xa80] ss:$8 sps:$4 sm:$0xff]  }
 0x28a   :  { %3624 = vmatprep.subr.bf16.mxu0 %v8053_v3  ;;  %v8098_v3 = vld [vmem:[%s11082_s3 + $0xa94] ss:$8 sps:$4 sm:$0xff]  }
 0x28d   :  { %3625 = vmatpush1.bf16.msra.mxu0 %v8051_v45  ;;  %v8096_v45 = vld [vmem:[%s11082_s3 + $0xa90] ss:$8 sps:$4 sm:$0xff]  }
 0x28e   :  { %3626 = vmatprep.subr.bf16.mxu0 %v8056_v0  ;;  %v8101_v0 = vld [vmem:[%s11082_s3 + $0xaa4] ss:$8 sps:$4 sm:$0xff]  }
 0x291   :  { %3627 = vmatpush1.bf16.msra.mxu0 %v8054_v12  ;;  %v8108_v12 = vld [vmem:[%s11082_s3 + $0xad0] ss:$8 sps:$4 sm:$0xff]  }
 0x292   :  { %3628 = vmatprep.subr.bf16.mxu0 %v8059_v15  ;;  %v8113_v15 = vld [vmem:[%s11082_s3 + $0xae4] ss:$8 sps:$4 sm:$0xff]  }
 0x295   :  { %3629 = vmatpush1.bf16.msra.mxu0 %v8057_v63  ;;  %v8111_v63 = vld [vmem:[%s11082_s3 + $0xae0] ss:$8 sps:$4 sm:$0xff]  }
 0x296   :  { %3630 = vmatprep.subr.bf16.mxu0 %v8062_v11  ;;  %v8116_v11 = vld [vmem:[%s11082_s3 + $0xaf4] ss:$8 sps:$4 sm:$0xff]  }
 0x299   :  { %3631 = vmatpush1.bf16.msra.mxu0 %v8060_v48  ;;  %v8114_v48 = vld [vmem:[%s11082_s3 + $0xaf0] ss:$8 sps:$4 sm:$0xff]  }
 0x29a   :  { %3632 = vmatprep.subr.bf16.mxu0 %v8065_v18  ;;  %v8119_v18 = vld [vmem:[%s11082_s3 + $0xb04] ss:$8 sps:$4 sm:$0xff]  }
 0x29d   :  { %3633 = vmatpush1.bf16.msra.mxu0 %v8063_v31  ;;  %v8117_v31 = vld [vmem:[%s11082_s3 + $0xb00] ss:$8 sps:$4 sm:$0xff]  }
 0x29e   :  { %3634 = vmatprep.subr.bf16.mxu0 %v8068_v34  ;;  %v8122_v34 = vld [vmem:[%s11082_s3 + $0xb14] ss:$8 sps:$4 sm:$0xff]  }
 0x2a1   :  { %3635 = vmatpush1.bf16.msra.mxu0 %v8066_v37  ;;  %v8120_v37 = vld [vmem:[%s11082_s3 + $0xb10] ss:$8 sps:$4 sm:$0xff]  }
 0x2a2   :  { %3636 = vmatprep.subr.bf16.mxu0 %v8071_v28  ;;  %v8125_v28 = vld [vmem:[%s11082_s3 + $0xb24] ss:$8 sps:$4 sm:$0xff]  }
 0x2a5   :  { %3637 = vmatpush1.bf16.msra.mxu0 %v8069_v36  ;;  %v8123_v36 = vld [vmem:[%s11082_s3 + $0xb20] ss:$8 sps:$4 sm:$0xff]  }
 0x2a6   :  { %3638 = vmatprep.subr.bf16.mxu0 %v8074_v42  ;;  %v8128_v42 = vld [vmem:[%s11082_s3 + $0xb34] ss:$8 sps:$4 sm:$0xff]  }
 0x2a9   :  { %3639 = vmatpush1.bf16.msra.mxu0 %v8072_v44  ;;  %v8126_v44 = vld [vmem:[%s11082_s3 + $0xb30] ss:$8 sps:$4 sm:$0xff]  }
 0x2aa   :  { %3640 = vmatprep.subr.bf16.mxu0 %v8077_v53  ;;  %v8131_v53 = vld [vmem:[%s11082_s3 + $0xb44] ss:$8 sps:$4 sm:$0xff]  }
 0x2ad   :  { %3641 = vmatpush1.bf16.msra.mxu0 %v8075_v5  ;;  %v8129_v5 = vld [vmem:[%s11082_s3 + $0xb40] ss:$8 sps:$4 sm:$0xff]  }
 0x2ae   :  { %3642 = vmatprep.subr.bf16.mxu0 %v8080_v13  ;;  %v8134_v13 = vld [vmem:[%s11082_s3 + $0xb54] ss:$8 sps:$4 sm:$0xff]  }
 0x2b1   :  { %3643 = vmatpush1.bf16.msra.mxu0 %v8078_v23  ;;  %v8132_v23 = vld [vmem:[%s11082_s3 + $0xb50] ss:$8 sps:$4 sm:$0xff]  }
 0x2b2   :  { %3644 = vmatprep.subr.bf16.mxu0 %v8083_v54  ;;  %v8137_v54 = vld [vmem:[%s11082_s3 + $0xb64] ss:$8 sps:$4 sm:$0xff]  }
 0x2b5   :  { %3645 = vmatpush1.bf16.msra.mxu0 %v8081_v26  ;;  %v8135_v26 = vld [vmem:[%s11082_s3 + $0xb60] ss:$8 sps:$4 sm:$0xff]  }
 0x2b6   :  { %3646 = vmatprep.subr.bf16.mxu0 %v8086_v27  ;;  %v8140_v27 = vld [vmem:[%s11082_s3 + $0xb74] ss:$8 sps:$4 sm:$0xff]  }
 0x2b9   :  { %3647 = vmatpush1.bf16.msra.mxu0 %v8084_v40  ;;  %v8138_v40 = vld [vmem:[%s11082_s3 + $0xb70] ss:$8 sps:$4 sm:$0xff]  }
 0x2ba   :  { %3648 = vmatprep.subr.bf16.mxu0 %v8089_v51  ;;  %v8143_v51 = vld [vmem:[%s11082_s3 + $0xb84] ss:$8 sps:$4 sm:$0xff]  }
 0x2bd   :  { %3649 = vmatpush1.bf16.msra.mxu0 %v8087_v57  ;;  %v8141_v57 = vld [vmem:[%s11082_s3 + $0xb80] ss:$8 sps:$4 sm:$0xff]  }
 0x2be   :  { %3650 = vmatprep.subr.bf16.mxu0 %v8092_v62  ;;  %v8146_v62 = vld [vmem:[%s11082_s3 + $0xb94] ss:$8 sps:$4 sm:$0xff]  }
 0x2c1   :  { %3651 = vmatpush1.bf16.msra.mxu0 %v8090_v9  ;;  %v8144_v9 = vld [vmem:[%s11082_s3 + $0xb90] ss:$8 sps:$4 sm:$0xff]  }
 0x2c2   :  { %3663 = vmatprep.subr.bf16.mxu0 %v8095_v10  ;;  %v8149_v10 = vld [vmem:[%s11082_s3 + $0xba4] ss:$8 sps:$4 sm:$0xff]  }
 0x2c4   :  { %3653 = vmatmul.mubr.bf16.vlgmr.msra.gmra.mrb[24].mxu0 %v1892_v21  ;;  %v8107_v21 = vld [vmem:[%s11082_s3 + $0xac4] ss:$8 sps:$4 sm:$0xff]  }
 0x2c5   :  { %3664 = vmatpush1.bf16.msra.mxu0 %v8093_v58  ;;  %3695 = vmatprep.mubr.bf16.mxu0 %v1895_v25  ;;  %v8110_v25 = vld [vmem:[%s11082_s3 + $0xad4] ss:$8 sps:$4 sm:$0xff]  }
 0x2c6   :  { %3665 = vmatprep.subr.bf16.mxu0 %v8098_v3  ;;  %v8237_v58 = vld [vmem:[%s11084_s2] ss:$20 sps:$4 sm:$0xff]   ;;  %v8150_v3 = vld [vmem:[%s11082_s3 + $0xbb0] ss:$8 sps:$4 sm:$0xff]  }
 0x2c7   :  { %4390 = vmatpush1.bf16.msra.mxu1 %v8237_v58  ;;  %v8180_v58 = vld [vmem:[%s11082_s3 + $0xc50] ss:$8 sps:$4 sm:$0xff]  }
 0x2c8   :  { %4391 = vmatprep.subr.bf16.mxu1 %v8242_v24  ;;  %v8183_v24 = vld [vmem:[%s11082_s3 + $0xc60] ss:$8 sps:$4 sm:$0xff]  }
 0x2c9   :  { %3666 = vmatpush1.bf16.msra.mxu0 %v8096_v45  ;;  %v8155_v45 = vld [vmem:[%s11082_s3 + $0xbc4] ss:$8 sps:$4 sm:$0xff]  }
 0x2ca   :  { %3667 = vmatprep.subr.bf16.mxu0 %v8101_v0  ;;  %v8243_v0 = vld [vmem:[%s11084_s2 + $0x50] ss:$20 sps:$4 sm:$0xff]  }
 0x2cb   :  { %4392 = vmatpush1.bf16.msra.mxu1 %v8240_v32  ;;  %v8191_v32 = vld [vmem:[%s11082_s3 + $0xc84] ss:$8 sps:$4 sm:$0xff]  }
 0x2cd   :  { %3668 = vmatpush1.bf16.msra.mxu0 %v8099_v46  ;;  %v8248_v46 = vld [vmem:[%s11084_s2 + $0x7c] ss:$20 sps:$4 sm:$0xff]  }
 0x2ce   :  { %3669 = vmatprep.subr.bf16.mxu0 %v8104_v14  ;;  %v8153_v14 = vld [vmem:[%s11082_s3 + $0xbc0] ss:$8 sps:$4 sm:$0xff]  }
 0x2d1   :  { %3670 = vmatpush1.bf16.msra.mxu0 %v8102_v19  ;;  %v8158_v19 = vld [vmem:[%s11082_s3 + $0xbd4] ss:$8 sps:$4 sm:$0xff]  }
 0x2d2   :  { %3671 = vmatprep.subr.bf16.mxu0 %v8107_v21  ;;  %v8246_v21 = vld [vmem:[%s11084_s2 + $0x78] ss:$20 sps:$4 sm:$0xff]  }
 0x2d5   :  { %3672 = vmatpush1.bf16.msra.mxu0 %v8105_v6  ;;  %v8251_v6 = vld [vmem:[%s11084_s2 + $0xa4] ss:$20 sps:$4 sm:$0xff]  }
 0x2d6   :  { %3673 = vmatprep.subr.bf16.mxu0 %v8110_v25  ;;  %v8156_v25 = vld [vmem:[%s11082_s3 + $0xbd0] ss:$8 sps:$4 sm:$0xff]  }
 0x2d9   :  { %3674 = vmatpush1.bf16.msra.mxu0 %v8108_v12  ;;  %v8249_v12 = vld [vmem:[%s11084_s2 + $0xa0] ss:$20 sps:$4 sm:$0xff]  }
 0x2da   :  { %3675 = vmatprep.subr.bf16.mxu0 %v8113_v15  ;;  %v8161_v15 = vld [vmem:[%s11082_s3 + $0xbe4] ss:$8 sps:$4 sm:$0xff]  }
 0x2dd   :  { %3676 = vmatpush1.bf16.msra.mxu0 %v8111_v63  ;;  %v8254_v63 = vld [vmem:[%s11084_s2 + $0xcc] ss:$20 sps:$4 sm:$0xff]  }
 0x2de   :  { %3677 = vmatprep.subr.bf16.mxu0 %v8116_v11  ;;  %v8159_v11 = vld [vmem:[%s11082_s3 + $0xbe0] ss:$8 sps:$4 sm:$0xff]  }
 0x2e1   :  { %3678 = vmatpush1.bf16.msra.mxu0 %v8114_v48  ;;  %v8252_v48 = vld [vmem:[%s11084_s2 + $0xc8] ss:$20 sps:$4 sm:$0xff]  }
 0x2e2   :  { %3679 = vmatprep.subr.bf16.mxu0 %v8119_v18  ;;  %v8164_v18 = vld [vmem:[%s11082_s3 + $0xbf4] ss:$8 sps:$4 sm:$0xff]  }
 0x2e5   :  { %3680 = vmatpush1.bf16.msra.mxu0 %v8117_v31  ;;  %v8257_v31 = vld [vmem:[%s11084_s2 + $0xf4] ss:$20 sps:$4 sm:$0xff]  }
 0x2e6   :  { %3681 = vmatprep.subr.bf16.mxu0 %v8122_v34  ;;  %v8162_v34 = vld [vmem:[%s11082_s3 + $0xbf0] ss:$8 sps:$4 sm:$0xff]  }
 0x2e9   :  { %3682 = vmatpush1.bf16.msra.mxu0 %v8120_v37  ;;  %v8255_v37 = vld [vmem:[%s11084_s2 + $0xf0] ss:$20 sps:$4 sm:$0xff]  }
 0x2ea   :  { %3683 = vmatprep.subr.bf16.mxu0 %v8125_v28  ;;  %v8167_v28 = vld [vmem:[%s11082_s3 + $0xc04] ss:$8 sps:$4 sm:$0xff]  }
 0x2ed   :  { %3684 = vmatpush1.bf16.msra.mxu0 %v8123_v36  ;;  %v8260_v36 = vld [vmem:[%s11084_s2 + $0x11c] ss:$20 sps:$4 sm:$0xff]  }
 0x2ee   :  { %3685 = vmatprep.subr.bf16.mxu0 %v8128_v42  ;;  %v8165_v42 = vld [vmem:[%s11082_s3 + $0xc00] ss:$8 sps:$4 sm:$0xff]  }
 0x2f1   :  { %3686 = vmatpush1.bf16.msra.mxu0 %v8126_v44  ;;  %v8258_v44 = vld [vmem:[%s11084_s2 + $0x118] ss:$20 sps:$4 sm:$0xff]  }
 0x2f2   :  { %3687 = vmatprep.subr.bf16.mxu0 %v8131_v53  ;;  %v8170_v53 = vld [vmem:[%s11082_s3 + $0xc14] ss:$8 sps:$4 sm:$0xff]  }
 0x2f5   :  { %3688 = vmatpush1.bf16.msra.mxu0 %v8129_v5  ;;  %v8263_v5 = vld [vmem:[%s11084_s2 + $0x144] ss:$20 sps:$4 sm:$0xff]  }
 0x2f6   :  { %3689 = vmatprep.subr.bf16.mxu0 %v8134_v13  ;;  %v8168_v13 = vld [vmem:[%s11082_s3 + $0xc10] ss:$8 sps:$4 sm:$0xff]  }
 0x2f9   :  { %3690 = vmatpush1.bf16.msra.mxu0 %v8132_v23  ;;  %v8261_v23 = vld [vmem:[%s11084_s2 + $0x140] ss:$20 sps:$4 sm:$0xff]  }
 0x2fa   :  { %3691 = vmatprep.subr.bf16.mxu0 %v8137_v54  ;;  %v8173_v54 = vld [vmem:[%s11082_s3 + $0xc24] ss:$8 sps:$4 sm:$0xff]  }
 0x2fd   :  { %3692 = vmatpush1.bf16.msra.mxu0 %v8135_v26  ;;  %v8266_v26 = vld [vmem:[%s11084_s2 + $0x16c] ss:$20 sps:$4 sm:$0xff]  }
 0x2fe   :  { %3693 = vmatprep.subr.bf16.mxu0 %v8140_v27  ;;  %v8171_v27 = vld [vmem:[%s11082_s3 + $0xc20] ss:$8 sps:$4 sm:$0xff]  }
 0x301   :  { %3694 = vmatpush1.bf16.msra.mxu0 %v8138_v40  ;;  %v8264_v40 = vld [vmem:[%s11084_s2 + $0x168] ss:$20 sps:$4 sm:$0xff]  }
 0x302   :  { %3706 = vmatprep.subr.bf16.mxu0 %v8143_v51  ;;  %v8176_v51 = vld [vmem:[%s11082_s3 + $0xc34] ss:$8 sps:$4 sm:$0xff]  }
 0x304   :  { %3696 = vmatmul.mubr.bf16.vlgmr.msra.gmra.mrb[24].mxu0 %v1894_v59  ;;  %v8147_v59 = vld [vmem:[%s11082_s3 + $0xba0] ss:$8 sps:$4 sm:$0xff]  }
 0x305   :  { %3707 = vmatpush1.bf16.msra.mxu0 %v8141_v57  ;;  %3738 = vmatprep.mubr.bf16.mxu0 %v1897_v38  ;;  %v8245_v38 = vld [vmem:[%s11084_s2 + $0x54] ss:$20 sps:$4 sm:$0xff]   ;;  %v8174_v57 = vld [vmem:[%s11082_s3 + $0xc30] ss:$8 sps:$4 sm:$0xff]  }
 0x306   :  { %3708 = vmatprep.subr.bf16.mxu0 %v8146_v62  ;;  %4393 = vmatprep.subr.bf16.mxu1 %v8245_v38  ;;  %v8179_v62 = vld [vmem:[%s11082_s3 + $0xc44] ss:$8 sps:$4 sm:$0xff]   ;;  %v8189_v38 = vld [vmem:[%s11082_s3 + $0xc80] ss:$8 sps:$4 sm:$0xff]  }
 0x307   :  { %4394 = vmatpush1.bf16.msra.mxu1 %v8243_v0  ;;  %v8197_v0 = vld [vmem:[%s11082_s3 + $0xca4] ss:$8 sps:$4 sm:$0xff]  }
 0x308   :  { %4395 = vmatprep.subr.bf16.mxu1 %v8248_v46  ;;  %v8204_v46 = vld [vmem:[%s11082_s3 + $0xcd0] ss:$8 sps:$4 sm:$0xff]  }
 0x309   :  { %3709 = vmatpush1.bf16.msra.mxu0 %v8144_v9  ;;  %v8177_v9 = vld [vmem:[%s11082_s3 + $0xc40] ss:$8 sps:$4 sm:$0xff]  }
 0x30a   :  { %3710 = vmatprep.subr.bf16.mxu0 %v8149_v10  ;;  %v8182_v10 = vld [vmem:[%s11082_s3 + $0xc54] ss:$8 sps:$4 sm:$0xff]  }
 0x30b   :  { %4396 = vmatpush1.bf16.msra.mxu1 %v8246_v21  ;;  %v8212_v21 = vld [vmem:[%s11082_s3 + $0xcf4] ss:$8 sps:$4 sm:$0xff]  }
 0x30c   :  { %4397 = vmatprep.subr.bf16.mxu1 %v8251_v6  ;;  %v8210_v6 = vld [vmem:[%s11082_s3 + $0xcf0] ss:$8 sps:$4 sm:$0xff]  }
 0x30d   :  { %3711 = vmatpush1.bf16.msra.mxu0 %v8147_v59  ;;  %v8188_v59 = vld [vmem:[%s11082_s3 + $0xc74] ss:$8 sps:$4 sm:$0xff]  }
 0x30e   :  { %3712 = vmatprep.subr.bf16.mxu0 %v8152_v16  ;;  %v8186_v16 = vld [vmem:[%s11082_s3 + $0xc70] ss:$8 sps:$4 sm:$0xff]  }
 0x30f   :  { %4398 = vmatpush1.bf16.msra.mxu1 %v8249_v12  ;;  %v8213_v12 = vld [vmem:[%s11082_s3 + $0xd00] ss:$8 sps:$4 sm:$0xff]  }
 0x310   :  { %4399 = vmatprep.subr.bf16.mxu1 %v8254_v63  ;;  %v8216_v63 = vld [vmem:[%s11082_s3 + $0xd10] ss:$8 sps:$4 sm:$0xff]  }
 0x311   :  { %3713 = vmatpush1.bf16.msra.mxu0 %v8150_v3  ;;  %v8194_v3 = vld [vmem:[%s11082_s3 + $0xc94] ss:$8 sps:$4 sm:$0xff]  }
 0x312   :  { %3714 = vmatprep.subr.bf16.mxu0 %v8155_v45  ;;  %v8192_v45 = vld [vmem:[%s11082_s3 + $0xc90] ss:$8 sps:$4 sm:$0xff]  }
 0x313   :  { %4400 = vmatpush1.bf16.msra.mxu1 %v8252_v48  ;;  %v8219_v48 = vld [vmem:[%s11082_s3 + $0xd20] ss:$8 sps:$4 sm:$0xff]  }
 0x314   :  { %4401 = vmatprep.subr.bf16.mxu1 %v8257_v31  ;;  %v8222_v31 = vld [vmem:[%s11082_s3 + $0xd30] ss:$8 sps:$4 sm:$0xff]  }
 0x315   :  { %3715 = vmatpush1.bf16.msra.mxu0 %v8153_v14  ;;  %v8209_v14 = vld [vmem:[%s11082_s3 + $0xce4] ss:$8 sps:$4 sm:$0xff]  }
 0x316   :  { %3716 = vmatprep.subr.bf16.mxu0 %v8158_v19  ;;  %v8207_v19 = vld [vmem:[%s11082_s3 + $0xce0] ss:$8 sps:$4 sm:$0xff]  }
 0x317   :  { %4402 = vmatpush1.bf16.msra.mxu1 %v8255_v37  ;;  %v8225_v37 = vld [vmem:[%s11082_s3 + $0xd40] ss:$8 sps:$4 sm:$0xff]  }
 0x318   :  { %4403 = vmatprep.subr.bf16.mxu1 %v8260_v36  ;;  %v8228_v36 = vld [vmem:[%s11082_s3 + $0xd50] ss:$8 sps:$4 sm:$0xff]  }
 0x319   :  { %3717 = vmatpush1.bf16.msra.mxu0 %v8156_v25  ;;  %v8215_v25 = vld [vmem:[%s11082_s3 + $0xd04] ss:$8 sps:$4 sm:$0xff]  }
 0x31a   :  { %3718 = vmatprep.subr.bf16.mxu0 %v8161_v15  ;;  %v8218_v15 = vld [vmem:[%s11082_s3 + $0xd14] ss:$8 sps:$4 sm:$0xff]  }
 0x31b   :  { %4404 = vmatpush1.bf16.msra.mxu1 %v8258_v44  ;;  %v8231_v44 = vld [vmem:[%s11082_s3 + $0xd60] ss:$8 sps:$4 sm:$0xff]  }
 0x31c   :  { %4405 = vmatprep.subr.bf16.mxu1 %v8263_v5  ;;  %v8234_v5 = vld [vmem:[%s11082_s3 + $0xd70] ss:$8 sps:$4 sm:$0xff]  }
 0x31d   :  { %3719 = vmatpush1.bf16.msra.mxu0 %v8159_v11  ;;  %v8221_v11 = vld [vmem:[%s11082_s3 + $0xd24] ss:$8 sps:$4 sm:$0xff]  }
 0x31e   :  { %3720 = vmatprep.subr.bf16.mxu0 %v8164_v18  ;;  %v8224_v18 = vld [vmem:[%s11082_s3 + $0xd34] ss:$8 sps:$4 sm:$0xff]  }
 0x31f   :  { %4406 = vmatpush1.bf16.msra.mxu1 %v8261_v23  ;;  %v8267_v23 = vld [vmem:[%s11084_s2 + $0x190] ss:$20 sps:$4 sm:$0xff]  }
 0x320   :  { %4407 = vmatprep.subr.bf16.mxu1 %v8266_v26  ;;  %v8270_v26 = vld [vmem:[%s11084_s2 + $0x1b8] ss:$20 sps:$4 sm:$0xff]  }
 0x321   :  { %3721 = vmatpush1.bf16.msra.mxu0 %v8162_v34  ;;  %v8227_v34 = vld [vmem:[%s11082_s3 + $0xd44] ss:$8 sps:$4 sm:$0xff]  }
 0x322   :  { %3722 = vmatprep.subr.bf16.mxu0 %v8167_v28  ;;  %v8230_v28 = vld [vmem:[%s11082_s3 + $0xd54] ss:$8 sps:$4 sm:$0xff]  }
 0x323   :  { %4408 = vmatpush1.bf16.msra.mxu1 %v8264_v40  ;;  %v8281_v40 = vld [vmem:[%s11084_s2 + $0x234] ss:$20 sps:$4 sm:$0xff]  }
 0x325   :  { %3723 = vmatpush1.bf16.msra.mxu0 %v8165_v42  ;;  %v8233_v42 = vld [vmem:[%s11082_s3 + $0xd64] ss:$8 sps:$4 sm:$0xff]  }
 0x326   :  { %3724 = vmatprep.subr.bf16.mxu0 %v8170_v53  ;;  %v8236_v53 = vld [vmem:[%s11082_s3 + $0xd74] ss:$8 sps:$4 sm:$0xff]  }
 0x329   :  { %3725 = vmatpush1.bf16.msra.mxu0 %v8168_v13  ;;  %v8269_v13 = vld [vmem:[%s11084_s2 + $0x194] ss:$20 sps:$4 sm:$0xff]  }
 0x32a   :  { %3726 = vmatprep.subr.bf16.mxu0 %v8173_v54  ;;  %4409 = vmatprep.subr.bf16.mxu1 %v8269_v13  ;;  %v8272_v54 = vld [vmem:[%s11084_s2 + $0x1bc] ss:$20 sps:$4 sm:$0xff]  }
 0x32b   :  { %4410 = vmatpush1.bf16.msra.mxu1 %v8267_v23  ;;  %v8285_v13 = vld [vmem:[%s11084_s2 + $0x8] ss:$20 sps:$4 sm:$0xff]  }
 0x32c   :  { %4411 = vmatprep.subr.bf16.mxu1 %v8272_v54  ;;  %v8290_v23 = vld [vmem:[%s11084_s2 + $0x34] ss:$20 sps:$4 sm:$0xff]   ;;  %v8288_v54 = vld [vmem:[%s11084_s2 + $0x30] ss:$20 sps:$4 sm:$0xff]  }
 0x32d   :  { %3727 = vmatpush1.bf16.msra.mxu0 %v8171_v27  ;;  %v8276_v27 = vld [vmem:[%s11084_s2 + $0x208] ss:$20 sps:$4 sm:$0xff]  }
 0x32e   :  { %3728 = vmatprep.subr.bf16.mxu0 %v8176_v51  ;;  %v8279_v51 = vld [vmem:[%s11084_s2 + $0x230] ss:$20 sps:$4 sm:$0xff]  }
 0x32f   :  { %4412 = vmatpush1.bf16.msra.mxu1 %v8270_v26  ;;  %v8293_v26 = vld [vmem:[%s11084_s2 + $0x5c] ss:$20 sps:$4 sm:$0xff]  }
 0x330   :  { %4413 = vmatprep.subr.bf16.mxu1 %v8275_v8  ;;  %v8291_v8 = vld [vmem:[%s11084_s2 + $0x58] ss:$20 sps:$4 sm:$0xff]  }
 0x331   :  { %3729 = vmatpush1.bf16.msra.mxu0 %v8174_v57  ;;  %v8284_v57 = vld [vmem:[%s11084_s2 + $0x25c] ss:$20 sps:$4 sm:$0xff]  }
 0x332   :  { %3730 = vmatprep.subr.bf16.mxu0 %v8179_v62  ;;  %v8282_v62 = vld [vmem:[%s11084_s2 + $0x258] ss:$20 sps:$4 sm:$0xff]  }
 0x333   :  { %4414 = vmatpush1.bf16.msra.mxu1 %v8273_v39  ;;  %v8296_v39 = vld [vmem:[%s11084_s2 + $0x84] ss:$20 sps:$4 sm:$0xff]  }
 0x335   :  { %3731 = vmatpush1.bf16.msra.mxu0 %v8177_v9  ;;  %v8287_v9 = vld [vmem:[%s11084_s2 + $0xc] ss:$20 sps:$4 sm:$0xff]  }
 0x336   :  { %3732 = vmatprep.subr.bf16.mxu0 %v8182_v10  ;;  %v2156_v10 = vld [vmem:[%s11083_s6 + $0x1b] sm:$0x3] }
 0x339   :  { %3733 = vmatpush1.bf16.msra.mxu0 %v8180_v58  ;;  %v3793_v58 = vld [vmem:[%s11083_s6 + $0x1d] sm:$0x3] }
 0x33a   :  { %3734 = vmatprep.subr.bf16.mxu0 %v8185_v2  ;;  %v2161_v2 = vrot.slane %v2156_v10, %v8702_v50 }
 0x33d   :  { %3735 = vmatpush1.bf16.msra.mxu0 %v8183_v24  ;;  %v2165_v24 = vrot.slane %v2156_v10, %v8708_v52  ;;  %v8308_v10 = vld [vmem:[%s11084_s2 + $0x124] ss:$20 sps:$4 sm:$0xff]  }
 0x33e   :  { %3736 = vmatprep.subr.bf16.mxu0 %v8188_v59  ;;  %v3798_v59 = vrot.slane %v3793_v58, %v8702_v50 }
 0x341   :  { %3737 = vmatpush1.bf16.msra.mxu0 %v8186_v16 }
 0x342   :  { %3749 = vmatprep.subr.bf16.mxu0 %v8191_v32  ;;  %v3802_v32 = vrot.slane %v3793_v58, %v8708_v52  ;;  %v8306_v58 = vld [vmem:[%s11084_s2 + $0x120] ss:$20 sps:$4 sm:$0xff]  }
 0x344   :  { %3739 = vmatmul.mubr.bf16.vlgmr.msra.gmra.mrb[24].mxu0 %v1896_v33  ;;  %v8203_v33 = vld [vmem:[%s11082_s3 + $0xcc4] ss:$8 sps:$4 sm:$0xff]  }
 0x345   :  { %3750 = vmatpush1.bf16.msra.mxu0 %v8189_v38  ;;  %3781 = vmatprep.mubr.bf16.mxu0 %v1899_v41  ;;  %v8206_v41 = vld [vmem:[%s11082_s3 + $0xcd4] ss:$8 sps:$4 sm:$0xff]  }
 0x346   :  { %3751 = vmatprep.subr.bf16.mxu0 %v8194_v3 }
 0x349   :  { %3752 = vmatpush1.bf16.msra.mxu0 %v8192_v45 }
 0x34a   :  { %3753 = vmatprep.subr.bf16.mxu0 %v8197_v0 }
 0x34d   :  { %3754 = vmatpush1.bf16.msra.mxu0 %v8195_v7 }
 0x34e   :  { %3755 = vmatprep.subr.bf16.mxu0 %v8200_v4 }
 0x351   :  { %3756 = vmatpush1.bf16.msra.mxu0 %v8198_v30 }
 0x352   :  { %3757 = vmatprep.subr.bf16.mxu0 %v8203_v33 }
 0x355   :  { %3758 = vmatpush1.bf16.msra.mxu0 %v8201_v35 }
 0x356   :  { %3759 = vmatprep.subr.bf16.mxu0 %v8206_v41 }
 0x359   :  { %3760 = vmatpush1.bf16.msra.mxu0 %v8204_v46 }
 0x35a   :  { %3761 = vmatprep.subr.bf16.mxu0 %v8209_v14  ;;  %v3792_v14 = vld [vmem:[%s11083_s6 + $0x1f] sm:$0x3] }
 0x35d   :  { %3762 = vmatpush1.bf16.msra.mxu0 %v8207_v19  ;;  %v3828_v19 = vld [vmem:[%s11083_s6 + $0x21] sm:$0x3] }
 0x35e   :  { %3763 = vmatprep.subr.bf16.mxu0 %v8212_v21  ;;  %v3817_v21 = vrot.slane %v3792_v14, %v8702_v50 }
 0x361   :  { %3764 = vmatpush1.bf16.msra.mxu0 %v8210_v6  ;;  %v3821_v6 = vrot.slane %v3792_v14, %v8708_v52  ;;  %v8333_v14 = vld [vmem:[%s11084_s2 + $0x150] ss:$20 sps:$4 sm:$0xff]  }
 0x362   :  { %3765 = vmatprep.subr.bf16.mxu0 %v8215_v25  ;;  %v3833_v25 = vrot.slane %v3828_v19, %v8702_v50 }
 0x365   :  { %3766 = vmatpush1.bf16.msra.mxu0 %v8213_v12 }
 0x366   :  { %3767 = vmatprep.subr.bf16.mxu0 %v8218_v15  ;;  %v3837_v15 = vrot.slane %v3828_v19, %v8708_v52  ;;  %v8334_v19 = vld [vmem:[%s11084_s2 + $0x10] ss:$20 sps:$4 sm:$0xff]  }
 0x369   :  { %3768 = vmatpush1.bf16.msra.mxu0 %v8216_v63 }
 0x36a   :  { %3769 = vmatprep.subr.bf16.mxu0 %v8221_v11 }
 0x36d   :  { %3770 = vmatpush1.bf16.msra.mxu0 %v8219_v48 }
 0x36e   :  { %3771 = vmatprep.subr.bf16.mxu0 %v8224_v18 }
 0x371   :  { %3772 = vmatpush1.bf16.msra.mxu0 %v8222_v31 }
 0x372   :  { %3773 = vmatprep.subr.bf16.mxu0 %v8227_v34 }
 0x375   :  { %3774 = vmatpush1.bf16.msra.mxu0 %v8225_v37 }
 0x376   :  { %3775 = vmatprep.subr.bf16.mxu0 %v8230_v28 }
 0x379   :  { %3776 = vmatpush1.bf16.msra.mxu0 %v8228_v36 }
 0x37a   :  { %3777 = vmatprep.subr.bf16.mxu0 %v8233_v42 }
 0x37d   :  { %3778 = vmatpush1.bf16.msra.mxu0 %v8231_v44 }
 0x37e   :  { %3779 = vmatprep.subr.bf16.mxu0 %v8236_v53 }
 0x381   :  { %3780 = vmatpush1.bf16.msra.mxu0 %v8234_v5 }
 0x384   :  { %3782 = vmatmul.mubr.bf16.vlgmr.msra.gmra.mrb[24].mxu0 %v1898_v29  ;;  %v8278_v29 = vld [vmem:[%s11084_s2 + $0x20c] ss:$20 sps:$4 sm:$0xff]  }
 0x385   :  { %4415 = vmatprep.subr.bf16.mxu1 %v8278_v29  ;;  %v8294_v29 = vld [vmem:[%s11084_s2 + $0x80] ss:$20 sps:$4 sm:$0xff]  }
 0x386   :  { %4416 = vmatpush1.bf16.msra.mxu1 %v8276_v27  ;;  %v8299_v27 = vld [vmem:[%s11084_s2 + $0xac] ss:$20 sps:$4 sm:$0xff]  }
 0x387   :  { %4417 = vmatprep.subr.bf16.mxu1 %v8281_v40  ;;  %v8297_v40 = vld [vmem:[%s11084_s2 + $0xa8] ss:$20 sps:$4 sm:$0xff]  }
 0x38a   :  { %4418 = vmatpush1.bf16.msra.mxu1 %v8279_v51  ;;  %v8302_v51 = vld [vmem:[%s11084_s2 + $0xd4] ss:$20 sps:$4 sm:$0xff]  }
 0x38b   :  { %4419 = vmatprep.subr.bf16.mxu1 %v8284_v57  ;;  %v8300_v57 = vld [vmem:[%s11084_s2 + $0xd0] ss:$20 sps:$4 sm:$0xff]  }
 0x38e   :  { %4420 = vmatpush1.bf16.msra.mxu1 %v8282_v62  ;;  %v8305_v62 = vld [vmem:[%s11084_s2 + $0xfc] ss:$20 sps:$4 sm:$0xff]  }
 0x38f   :  { %4432 = vmatprep.subr.bf16.mxu1 %v8287_v9  ;;  %v8303_v9 = vld [vmem:[%s11084_s2 + $0xf8] ss:$20 sps:$4 sm:$0xff]  }
 0x457   :  { %v3783_v16 = vpop.f32.mrb[24].mxu0 }
 0x458   :  { %v7586_v38 = vadd.f32 %v3783_v16, %v2161_v2  ;;  %v3785_v3 = vpop.f32.mrb[25].mxu0  ;;  %v8312_v16 = vld [vmem:[%s11084_s2 + $0x170] ss:$20 sps:$4 sm:$0xff]  }
 0x459   :  { %v7587_v45 = vadd.f32 %v3785_v3, %v2165_v24  ;;  %v3787_v0 = vpop.f32.mrb[26].mxu0  ;;  %v8320_v3 = vld [vmem:[%s11084_s2 + $0x1c4] ss:$20 sps:$4 sm:$0xff]  }
 0x45a   :  { %v3805_v7 = vmul.f32 %v7586_v38, %v3798_v59  ;;  %v7588_v4 = vadd.f32 %v3787_v0, %v2161_v2  ;;  %v3789_v30 = vpop.f32.mrb[27].mxu0  ;;  %v8311_v2 = vld [vmem:[%s11084_s2 + $0x14c] ss:$20 sps:$4 sm:$0xff]  }
 0x45b   :  { %v3806_v33 = vmul.f32 %v7587_v45, %v3802_v32  ;;  %v7589_v35 = vadd.f32 %v3789_v30, %v2165_v24  ;;  %v8309_v24 = vld [vmem:[%s11084_s2 + $0x148] ss:$20 sps:$4 sm:$0xff]   ;;  %v8315_v38 = vld [vmem:[%s11084_s2 + $0x198] ss:$20 sps:$4 sm:$0xff]   ;;  %v8318_v45 = vld [vmem:[%s11084_s2 + $0x1c0] ss:$20 sps:$4 sm:$0xff]  }
 0x45c   :  { %8454 = vtanh.f32 %v3805_v7  ;;  %v3807_v41 = vmul.f32 %v7588_v4, %v3798_v59  ;;  %v8314_v59 = vld [vmem:[%s11084_s2 + $0x174] ss:$20 sps:$4 sm:$0xff]   ;;  %v8323_v0 = vld [vmem:[%s11084_s2 + $0x1ec] ss:$20 sps:$4 sm:$0xff]   ;;  %v8324_v30 = vld [vmem:[%s11084_s2 + $0x210] ss:$20 sps:$4 sm:$0xff]  }
 0x45d   :  { %8456 = vtanh.f32 %v3806_v33  ;;  %v3808_v46 = vmul.f32 %v7589_v35, %v3802_v32  ;;  %v8317_v32 = vld [vmem:[%s11084_s2 + $0x19c] ss:$20 sps:$4 sm:$0xff]   ;;  %v8326_v4 = vld [vmem:[%s11084_s2 + $0x214] ss:$20 sps:$4 sm:$0xff]   ;;  %v8327_v35 = vld [vmem:[%s11084_s2 + $0x238] ss:$20 sps:$4 sm:$0xff]  }
 0x45e   :  { %8458 = vtanh.f32 %v3807_v41  ;;  %v8321_v7 = vld [vmem:[%s11084_s2 + $0x1e8] ss:$20 sps:$4 sm:$0xff]   ;;  %v8332_v41 = vld [vmem:[%s11084_s2 + $0x264] ss:$20 sps:$4 sm:$0xff]  }
 0x45f   :  { %8460 = vtanh.f32 %v3808_v46  ;;  %v8329_v33 = vld [vmem:[%s11084_s2 + $0x23c] ss:$20 sps:$4 sm:$0xff]   ;;  %v8330_v46 = vld [vmem:[%s11084_s2 + $0x260] ss:$20 sps:$4 sm:$0xff]  }
 0x466   :  { %v8455_v12 = vpop.eup %8454 }
 0x467   :  { %v8457_v63 = vpop.eup %8456  ;;  %v3824_v11 = vmul.f32 %v8455_v12, %v3817_v21  ;;  %v8338_v12 = vld [vmem:[%s11084_s2 + $0x60] ss:$20 sps:$4 sm:$0xff]  }
 0x468   :  { %v8459_v48 = vpop.eup %8458  ;;  %v3825_v18 = vmul.f32 %v8457_v63, %v3821_v6  ;;  %v8340_v63 = vld [vmem:[%s11084_s2 + $0x88] ss:$20 sps:$4 sm:$0xff]  }
 0x469   :  { %v8461_v31 = vpop.eup %8460  ;;  %v3826_v34 = vmul.f32 %v8459_v48, %v3817_v21  ;;  %v3840_v37 = vadd.f32 %v3833_v25, %v3824_v11  ;;  %v8335_v21 = vld [vmem:[%s11084_s2 + $0x178] ss:$20 sps:$4 sm:$0xff]   ;;  %v8341_v11 = vld [vmem:[%s11084_s2 + $0x1f0] ss:$20 sps:$4 sm:$0xff]  }
 0x46a   :  { %v3827_v28 = vmul.f32 %v8461_v31, %v3821_v6  ;;  %v3841_v36 = vadd.f32 %v3837_v15, %v3825_v18  ;;  %v8336_v6 = vld [vmem:[%s11084_s2 + $0x38] ss:$20 sps:$4 sm:$0xff]   ;;  %v8342_v48 = vld [vmem:[%s11084_s2 + $0xb0] ss:$20 sps:$4 sm:$0xff]  }
 0x46b   :  { %v3842_v42 = vadd.f32 %v3833_v25, %v3826_v34  ;;  %3844 = vst [vmem:[%s11085_s7] sm:$0xff] %v3840_v37  ;;  %v8337_v25 = vld [vmem:[%s11084_s2 + $0x1a0] ss:$20 sps:$4 sm:$0xff]   ;;  %v8343_v18 = vld [vmem:[%s11084_s2 + $0x218] ss:$20 sps:$4 sm:$0xff]  }
 0x46c   :  { %v3843_v44 = vadd.f32 %v3837_v15, %v3827_v28  ;;  %3845 = vst [vmem:[%s11085_s7 + $0x8] sm:$0xff] %v3841_v36  ;;  %v8339_v15 = vld [vmem:[%s11084_s2 + $0x1c8] ss:$20 sps:$4 sm:$0xff]   ;;  %v8344_v31 = vld [vmem:[%s11084_s2 + $0xd8] ss:$20 sps:$4 sm:$0xff]  }
 0x46d   :  { %3846 = vst [vmem:[%s11085_s7 + $0x10] sm:$0xff] %v3842_v42  ;;  %v10212_v53 = vpack.c.bf16 %v3842_v42, %v3840_v37  ;;  %v8345_v34 = vld [vmem:[%s11084_s2 + $0x240] ss:$20 sps:$4 sm:$0xff]   ;;  %v8347_v28 = vld [vmem:[%s11084_s2 + $0x268] ss:$20 sps:$4 sm:$0xff]  }
 0x46e   :  { %3847 = vst [vmem:[%s11085_s7 + $0x18] sm:$0xff] %v3843_v44  ;;  %v10217_v5 = vpack.c.bf16 %v3843_v44, %v3841_v36  ;;  %v8346_v37 = vld [vmem:[%s11084_s2 + $0x100] ss:$20 sps:$4 sm:$0xff]   ;;  %v8348_v36 = vld [vmem:[%s11084_s2 + $0x128] ss:$20 sps:$4 sm:$0xff]  }
 0x46f   :  { %v10368_v42 = vld [vmem:[%s11082_s3 + $0x484] ss:$8 sps:$4 sm:$0xff]   ;;  %v10373_v44 = vld [vmem:[%s11082_s3 + $0x480] ss:$8 sps:$4 sm:$0xff]  }
 0x470   :  { %4421 = vmatprep.mubr.bf16.mxu1 %v10217_v5 }
 0x471   :  { %4422 = vmatmul.mubr.bf16.vlgmr.msra.gmra.mrb[32].mxu1 %v10212_v53 }
 0x472   :  { %4433 = vmatpush1.bf16.msra.mxu1 %v8285_v13  ;;  %4464 = vmatprep.mubr.bf16.mxu1 %v10217_v5  ;;  %v10386_v13 = vld [vmem:[%s11082_s3 + $0x490] ss:$8 sps:$4 sm:$0xff]  }
 0x473   :  { %4434 = vmatprep.subr.bf16.mxu1 %v8290_v23  ;;  %v10393_v23 = vld [vmem:[%s11082_s3 + $0x4a4] ss:$8 sps:$4 sm:$0xff]  }
 0x476   :  { %4435 = vmatpush1.bf16.msra.mxu1 %v8288_v54  ;;  %v10405_v54 = vld [vmem:[%s11082_s3 + $0x4b4] ss:$8 sps:$4 sm:$0xff]  }
 0x477   :  { %4436 = vmatprep.subr.bf16.mxu1 %v8293_v26  ;;  %v10411_v26 = vld [vmem:[%s11082_s3 + $0x4b0] ss:$8 sps:$4 sm:$0xff]  }
 0x47a   :  { %4437 = vmatpush1.bf16.msra.mxu1 %v8291_v8  ;;  %v10417_v8 = vld [vmem:[%s11082_s3 + $0x4c4] ss:$8 sps:$4 sm:$0xff]  }
 0x47b   :  { %4438 = vmatprep.subr.bf16.mxu1 %v8296_v39  ;;  %v10423_v39 = vld [vmem:[%s11082_s3 + $0x4c0] ss:$8 sps:$4 sm:$0xff]  }
 0x47e   :  { %4439 = vmatpush1.bf16.msra.mxu1 %v8294_v29  ;;  %v10429_v29 = vld [vmem:[%s11082_s3 + $0x4d4] ss:$8 sps:$4 sm:$0xff]  }
 0x47f   :  { %4440 = vmatprep.subr.bf16.mxu1 %v8299_v27  ;;  %v10435_v27 = vld [vmem:[%s11082_s3 + $0x4d0] ss:$8 sps:$4 sm:$0xff]  }
 0x482   :  { %4441 = vmatpush1.bf16.msra.mxu1 %v8297_v40  ;;  %v10441_v40 = vld [vmem:[%s11082_s3 + $0x4e4] ss:$8 sps:$4 sm:$0xff]  }
 0x483   :  { %4442 = vmatprep.subr.bf16.mxu1 %v8302_v51  ;;  %v10447_v51 = vld [vmem:[%s11082_s3 + $0x4e0] ss:$8 sps:$4 sm:$0xff]  }
 0x486   :  { %4443 = vmatpush1.bf16.msra.mxu1 %v8300_v57  ;;  %v10453_v57 = vld [vmem:[%s11082_s3 + $0x4f4] ss:$8 sps:$4 sm:$0xff]  }
 0x487   :  { %4444 = vmatprep.subr.bf16.mxu1 %v8305_v62  ;;  %v10459_v62 = vld [vmem:[%s11082_s3 + $0x4f0] ss:$8 sps:$4 sm:$0xff]  }
 0x48a   :  { %4445 = vmatpush1.bf16.msra.mxu1 %v8303_v9  ;;  %v10467_v9 = vld [vmem:[%s11083_s6 + $0x23] sm:$0x1f] }
 0x48b   :  { %4446 = vmatprep.subr.bf16.mxu1 %v8308_v10  ;;  %v3951_v10 = vrot.slane %v10467_v9, %v8702_v50 }
 0x48e   :  { %4447 = vmatpush1.bf16.msra.mxu1 %v8306_v58  ;;  %v3955_v58 = vrot.slane %v10467_v9, %v8708_v52 }
 0x48f   :  { %4448 = vmatprep.subr.bf16.mxu1 %v8311_v2 }
 0x492   :  { %4449 = vmatpush1.bf16.msra.mxu1 %v8309_v24 }
 0x493   :  { %4450 = vmatprep.subr.bf16.mxu1 %v8314_v59 }
 0x496   :  { %4451 = vmatpush1.bf16.msra.mxu1 %v8312_v16 }
 0x497   :  { %4452 = vmatprep.subr.bf16.mxu1 %v8317_v32 }
 0x49a   :  { %4453 = vmatpush1.bf16.msra.mxu1 %v8315_v38 }
 0x49b   :  { %4454 = vmatprep.subr.bf16.mxu1 %v8320_v3 }
 0x49e   :  { %4455 = vmatpush1.bf16.msra.mxu1 %v8318_v45 }
 0x49f   :  { %4456 = vmatprep.subr.bf16.mxu1 %v8323_v0 }
 0x4a2   :  { %4457 = vmatpush1.bf16.msra.mxu1 %v8321_v7 }
 0x4a3   :  { %4458 = vmatprep.subr.bf16.mxu1 %v8326_v4 }
 0x4a6   :  { %4459 = vmatpush1.bf16.msra.mxu1 %v8324_v30 }
 0x4a7   :  { %4460 = vmatprep.subr.bf16.mxu1 %v8329_v33 }
 0x4aa   :  { %4461 = vmatpush1.bf16.msra.mxu1 %v8327_v35 }
 0x4ab   :  { %4462 = vmatprep.subr.bf16.mxu1 %v8332_v41 }
 0x4ae   :  { %4463 = vmatpush1.bf16.msra.mxu1 %v8330_v46 }
 0x4af   :  { %7330 = vmatprep.subr.bf16.mxu1 %v8333_v14 }
 0x4b1   :  { %4465 = vmatmul.mubr.bf16.vlgmr.msra.gmra.mrb[36].mxu1 %v10212_v53 }
 0x4b2   :  { %7331 = vmatpush3.bf16.msra.mxu1 %v8334_v19  ;;  %4507 = vmatprep.mubr.bf16.mxu1 %v10217_v5  ;;  %v10379_v5 = vld [vmem:[%s11082_s3 + $0x494] ss:$8 sps:$4 sm:$0xff]  }
 0x4b3   :  { %7332 = vmatprep.subr.bf16.mxu1 %v8335_v21  ;;  %v3959_v21 = vrot.slane %v10467_v9, %v56_v56 }
 0x4b6   :  { %7333 = vmatpush3.bf16.msra.mxu1 %v8336_v6  ;;  %v3963_v6 = vrot.slane %v10467_v9, %v60_v61 }
 0x4b7   :  { %7334 = vmatprep.subr.bf16.mxu1 %v8337_v25 }
 0x4ba   :  { %7335 = vmatpush3.bf16.msra.mxu1 %v8338_v12 }
 0x4bb   :  { %7336 = vmatprep.subr.bf16.mxu1 %v8339_v15 }
 0x4be   :  { %7337 = vmatpush3.bf16.msra.mxu1 %v8340_v63 }
 0x4bf   :  { %7338 = vmatprep.subr.bf16.mxu1 %v8341_v11 }
 0x4c2   :  { %7339 = vmatpush3.bf16.msra.mxu1 %v8342_v48 }
 0x4c3   :  { %7340 = vmatprep.subr.bf16.mxu1 %v8343_v18 }
 0x4c6   :  { %7341 = vmatpush3.bf16.msra.mxu1 %v8344_v31 }
 0x4c7   :  { %7342 = vmatprep.subr.bf16.mxu1 %v8345_v34 }
 0x4ca   :  { %7343 = vmatpush3.bf16.msra.mxu1 %v8346_v37 }
 0x4cb   :  { %7344 = vmatprep.subr.bf16.mxu1 %v8347_v28 }
 0x4ce   :  { %7345 = vmatpush3.bf16.msra.mxu1 %v8348_v36 }
 0x4cf   :  { %4655 = vmatprep.subr.bf16.mxu1 %v10368_v42 }
 0x4d1   :  { %4508 = vmatmul.mubr.bf16.vlgmr.msra.gmra.mrb[40].mxu1 %v10212_v53  ;;  %v10399_v53 = vld [vmem:[%s11082_s3 + $0x4a0] ss:$8 sps:$4 sm:$0xff]  }
 0x4d2   :  { %4656 = vmatpush1.bf16.msra.mxu1 %v10373_v44  ;;  %4687 = vmatprep.mubr.bf16.mxu1 %v8502_v1 }
 0x4d3   :  { %4657 = vmatprep.subr.bf16.mxu1 %v10379_v5 }
 0x4d6   :  { %4658 = vmatpush1.bf16.msra.mxu1 %v10386_v13 }
 0x4d7   :  { %4659 = vmatprep.subr.bf16.mxu1 %v10393_v23 }
 0x4da   :  { %4660 = vmatpush1.bf16.msra.mxu1 %v10399_v53 }
 0x4db   :  { %4661 = vmatprep.subr.bf16.mxu1 %v10405_v54 }
 0x4de   :  { %4662 = vmatpush1.bf16.msra.mxu1 %v10411_v26 }
 0x4df   :  { %4663 = vmatprep.subr.bf16.mxu1 %v10417_v8 }
 0x4e2   :  { %4664 = vmatpush1.bf16.msra.mxu1 %v10423_v39 }
 0x4e3   :  { %4665 = vmatprep.subr.bf16.mxu1 %v10429_v29 }
 0x4e6   :  { %4666 = vmatpush1.bf16.msra.mxu1 %v10435_v27 }
 0x4e7   :  { %4667 = vmatprep.subr.bf16.mxu1 %v10441_v40 }
 0x4ea   :  { %4668 = vmatpush1.bf16.msra.mxu1 %v10447_v51 }
 0x4eb   :  { %4669 = vmatprep.subr.bf16.mxu1 %v10453_v57 }
 0x4ee   :  { %4670 = vmatpush1.bf16.msra.mxu1 %v10459_v62 }
 0x4ef   :  { %4711 = vmatprep.subr.bf16.mxu1 %v10368_v42 }
 0x544   :  { %v4423_v2 = vpop.f32.mrb[32].mxu1 }
 0x545   :  { %v4424_v24 = vadd.f32 %v4423_v2, %v3951_v10  ;;  %v4425_v59 = vpop.f32.mrb[33].mxu1 }
 0x546   :  { %v4426_v16 = vadd.f32 %v4425_v59, %v3955_v58  ;;  %v4427_v32 = vpop.f32.mrb[34].mxu1 }
 0x547   :  { %v4526_v38 = vmul.f32 0.01, %v4424_v24  ;;  %v4428_v3 = vadd.f32 %v4427_v32, %v3951_v10  ;;  %v4429_v45 = vpop.f32.mrb[35].mxu1  ;;  %vm4516_vm8 = vcmp.gt.f32.partialorder %v4424_v24, 0.0 }
 0x548   :  { %v4527_v0 = vmul.f32 0.01, %v4426_v16  ;;  %v4430_v7 = vadd.f32 %v4429_v45, %v3955_v58  ;;  %vm4517_vm9 = vcmp.gt.f32.partialorder %v4426_v16, 0.0 }
 0x549   :  { %vm4521_vm10 = vcmp.gt.f32.partialorder %v4428_v3, 0.0  ;;  %v4531_v4 = vmul.f32 0.01, %v4428_v3  ;;  %v4536_v33 = vsel %vm4516_vm8, %v4424_v24, %v4526_v38 }
 0x54a   :  { %vm4522_vm11 = vcmp.gt.f32.partialorder %v4430_v7, 0.0  ;;  %v4532_v30 = vmul.f32 0.01, %v4430_v7  ;;  %v4537_v41 = vsel %vm4517_vm9, %v4426_v16, %v4527_v0  ;;  %v3967_v16 = vrot.slane %v10467_v9, %v64_v55 }
 0x54b   :  { %v4541_v35 = vsel %vm4521_vm10, %v4428_v3, %v4531_v4 }
 0x54c   :  { %v4563_v46 = vpack.c.bf16 %v4541_v35, %v4536_v33  ;;  %v4542_v14 = vsel %vm4522_vm11, %v4430_v7, %v4532_v30 }
 0x54d   :  { %v4710_v19 = vpack.c.bf16 %v4542_v14, %v4537_v41  ;;  %v8392_v41 = vld [vmem:[%s11086_s4 + $0x8] sm:$0xff]   ;;  %v8394_v14 = vld [vmem:[%s11086_s4 + $0x10] sm:$0xff]  }
 0x54e   :  { %4688 = vmatmul.mubr.bf16.vlgmr.msra.gmra.mrb[44].mxu1 %v4563_v46  ;;  %v8393_v46 = vld [vmem:[%s11086_s4 + $0x50] sm:$0xff]  }
 0x54f   :  { %4712 = vmatpush1.bf16.msra.mxu1 %v10373_v44  ;;  %4743 = vmatprep.mubr.bf16.mxu1 %v8502_v1 }
 0x550   :  { %4713 = vmatprep.subr.bf16.mxu1 %v10379_v5 }
 0x553   :  { %4714 = vmatpush1.bf16.msra.mxu1 %v10386_v13 }
 0x554   :  { %4715 = vmatprep.subr.bf16.mxu1 %v10393_v23 }
 0x557   :  { %4716 = vmatpush1.bf16.msra.mxu1 %v10399_v53 }
 0x558   :  { %4717 = vmatprep.subr.bf16.mxu1 %v10405_v54 }
 0x55b   :  { %4718 = vmatpush1.bf16.msra.mxu1 %v10411_v26 }
 0x55c   :  { %4719 = vmatprep.subr.bf16.mxu1 %v10417_v8 }
 0x55f   :  { %4720 = vmatpush1.bf16.msra.mxu1 %v10423_v39 }
 0x560   :  { %4721 = vmatprep.subr.bf16.mxu1 %v10429_v29 }
 0x563   :  { %4722 = vmatpush1.bf16.msra.mxu1 %v10435_v27 }
 0x564   :  { %4723 = vmatprep.subr.bf16.mxu1 %v10441_v40 }
 0x567   :  { %4724 = vmatpush1.bf16.msra.mxu1 %v10447_v51 }
 0x568   :  { %4725 = vmatprep.subr.bf16.mxu1 %v10453_v57 }
 0x56b   :  { %4726 = vmatpush1.bf16.msra.mxu1 %v10459_v62 }
 0x56c   :  { %4767 = vmatprep.subr.bf16.mxu1 %v10368_v42 }
 0x56e   :  { %4744 = vmatmul.mubr.bf16.vlgmr.msra.gmra.mrb[48].mxu1 %v4710_v19  ;;  %v8398_v19 = vld [vmem:[%s11086_s4 + $0x20] sm:$0xff]  }
 0x56f   :  { %4768 = vmatpush1.bf16.msra.mxu1 %v10373_v44  ;;  %4799 = vmatprep.mubr.bf16.mxu1 %v8502_v1 }
 0x570   :  { %4769 = vmatprep.subr.bf16.mxu1 %v10379_v5 }
 0x573   :  { %4770 = vmatpush1.bf16.msra.mxu1 %v10386_v13 }
 0x574   :  { %4771 = vmatprep.subr.bf16.mxu1 %v10393_v23 }
 0x577   :  { %4772 = vmatpush1.bf16.msra.mxu1 %v10399_v53 }
 0x578   :  { %4773 = vmatprep.subr.bf16.mxu1 %v10405_v54 }
 0x57b   :  { %4774 = vmatpush1.bf16.msra.mxu1 %v10411_v26 }
 0x57c   :  { %4775 = vmatprep.subr.bf16.mxu1 %v10417_v8 }
 0x57f   :  { %4776 = vmatpush1.bf16.msra.mxu1 %v10423_v39 }
 0x580   :  { %4777 = vmatprep.subr.bf16.mxu1 %v10429_v29 }
 0x583   :  { %4778 = vmatpush1.bf16.msra.mxu1 %v10435_v27 }
 0x584   :  { %v4466_v25 = vpop.f32.mrb[36].mxu1  ;;  %4779 = vmatprep.subr.bf16.mxu1 %v10441_v40 }
 0x585   :  { %v4467_v12 = vadd.f32 %v4466_v25, %v3959_v21  ;;  %v4468_v15 = vpop.f32.mrb[37].mxu1  ;;  %v8401_v25 = vld [vmem:[%s11086_s4 + $0x70] sm:$0xff]  }
 0x586   :  { %v4469_v63 = vadd.f32 %v4468_v15, %v3963_v6  ;;  %v4470_v11 = vpop.f32.mrb[38].mxu1  ;;  %v8403_v15 = vld [vmem:[%s11086_s4 + $0x78] sm:$0xff]  }
 0x587   :  { %v4528_v48 = vmul.f32 0.01, %v4467_v12  ;;  %v4471_v18 = vadd.f32 %v4470_v11, %v3959_v21  ;;  %v4472_v31 = vpop.f32.mrb[39].mxu1  ;;  %4780 = vmatpush1.bf16.msra.mxu1 %v10447_v51  ;;  %vm4518_vm12 = vcmp.gt.f32.partialorder %v4467_v12, 0.0  ;;  %v8399_v21 = vld [vmem:[%s11086_s4 + $0x68] sm:$0xff]  }
 0x588   :  { %v4529_v56 = vmul.f32 0.01, %v4469_v63  ;;  %v4473_v34 = vadd.f32 %v4472_v31, %v3963_v6  ;;  %4781 = vmatprep.subr.bf16.mxu1 %v10453_v57  ;;  %vm4519_vm13 = vcmp.gt.f32.partialorder %v4469_v63, 0.0  ;;  %v8400_v6 = vld [vmem:[%s11086_s4 + $0x28] sm:$0xff]  }
 0x589   :  { %vm4523_vm14 = vcmp.gt.f32.partialorder %v4471_v18, 0.0  ;;  %v4533_v61 = vmul.f32 0.01, %v4471_v18  ;;  %v4538_v28 = vsel %vm4518_vm12, %v4467_v12, %v4528_v48  ;;  %v8402_v12 = vld [vmem:[%s11086_s4 + $0x30] sm:$0xff]  }
 0x58a   :  { %vm4524_vm15 = vcmp.gt.f32.partialorder %v4473_v34, 0.0  ;;  %v4534_v37 = vmul.f32 0.01, %v4473_v34  ;;  %v4539_v10 = vsel %vm4519_vm13, %v4469_v63, %v4529_v56  ;;  %v8404_v63 = vld [vmem:[%s11086_s4 + $0x38] sm:$0xff]   ;;  %v4562_v56 = vld [vmem:[%s11083_s6 + $0x28] sm:$0x3] }
 0x58b   :  { %v4543_v36 = vsel %vm4523_vm14, %v4471_v18, %v4533_v61  ;;  %4782 = vmatpush1.bf16.msra.mxu1 %v10459_v62  ;;  %v10658_v61 = vrot.slane %v4562_v56, %v8708_v52 }
 0x58c   :  { %v4766_v58 = vpack.c.bf16 %v4543_v36, %v4538_v28  ;;  %v4544_v2 = vsel %vm4524_vm15, %v4473_v34, %v4534_v37  ;;  %4823 = vmatprep.subr.bf16.mxu1 %v10368_v42  ;;  %v10655_v34 = vrot.slane %v4562_v56, %v8702_v50 }
 0x58d   :  { %v4822_v24 = vpack.c.bf16 %v4544_v2, %v4539_v10 }
 0x58e   :  { %4800 = vmatmul.mubr.bf16.vlgmr.msra.gmra.mrb[52].mxu1 %v4766_v58 }
 0x58f   :  { %4824 = vmatpush1.bf16.msra.mxu1 %v10373_v44  ;;  %4855 = vmatprep.mubr.bf16.mxu1 %v8502_v1 }
 0x590   :  { %4825 = vmatprep.subr.bf16.mxu1 %v10379_v5 }
 0x593   :  { %4826 = vmatpush1.bf16.msra.mxu1 %v10386_v13 }
 0x594   :  { %4827 = vmatprep.subr.bf16.mxu1 %v10393_v23 }
 0x597   :  { %4828 = vmatpush1.bf16.msra.mxu1 %v10399_v53 }
 0x598   :  { %4829 = vmatprep.subr.bf16.mxu1 %v10405_v54 }
 0x59b   :  { %4830 = vmatpush1.bf16.msra.mxu1 %v10411_v26 }
 0x59c   :  { %4831 = vmatprep.subr.bf16.mxu1 %v10417_v8 }
 0x59f   :  { %4832 = vmatpush1.bf16.msra.mxu1 %v10423_v39 }
 0x5a0   :  { %4833 = vmatprep.subr.bf16.mxu1 %v10429_v29 }
 0x5a3   :  { %4834 = vmatpush1.bf16.msra.mxu1 %v10435_v27 }
 0x5a4   :  { %v7346_v59 = vpop.f32.mrb[40].mxu1  ;;  %4835 = vmatprep.subr.bf16.mxu1 %v10441_v40 }
 0x5a5   :  { %v7347_v32 = vpop.f32.mrb[41].mxu1 }
 0x5a6   :  { %v7348_v38 = vadd.f32 %v7347_v32, %v7346_v59  ;;  %v7349_v3 = vpop.f32.mrb[42].mxu1 }
 0x5a7   :  { %v7350_v45 = vpop.f32.mrb[43].mxu1  ;;  %4836 = vmatpush1.bf16.msra.mxu1 %v10447_v51 }
 0x5a8   :  { %v4510_v0 = vadd.f32 %v7348_v38, %v3967_v16  ;;  %v7351_v7 = vadd.f32 %v7350_v45, %v7349_v3  ;;  %4837 = vmatprep.subr.bf16.mxu1 %v10453_v57 }
 0x5aa   :  { %v4530_v4 = vmul.f32 0.01, %v4510_v0  ;;  %v4513_v30 = vadd.f32 %v7351_v7, %v3967_v16  ;;  %vm4520_vm0 = vcmp.gt.f32.partialorder %v4510_v0, 0.0 }
 0x5ab   :  { %4838 = vmatpush1.bf16.msra.mxu1 %v10459_v62 }
 0x5ac   :  { %vm4525_vm1 = vcmp.gt.f32.partialorder %v4513_v30, 0.0  ;;  %v4535_v33 = vmul.f32 0.01, %v4513_v30  ;;  %4879 = vmatprep.subr.bf16.mxu1 %v10368_v42  ;;  %v4540_v55 = vsel %vm4520_vm0, %v4510_v0, %v4530_v4  ;;  %v8373_v42 = vld [vmem:[%s11086_s4 + $0xc0] sm:$0xff]  }
 0x5ae   :  { %v4545_v9 = vsel %vm4525_vm1, %v4513_v30, %v4535_v33  ;;  %4856 = vmatmul.mubr.bf16.vlgmr.msra.gmra.mrb[56].mxu1 %v4822_v24 }
 0x5af   :  { %4880 = vmatpush1.bf16.msra.mxu1 %v10373_v44  ;;  %4911 = vmatprep.mubr.bf16.mxu1 %v8502_v1  ;;  %v4878_v35 = vpack.c.bf16 %v4545_v9, %v4540_v55  ;;  %v8374_v44 = vld [vmem:[%s11086_s4 + $0x80] sm:$0xff]  }
 0x5b0   :  { %4881 = vmatprep.subr.bf16.mxu1 %v10379_v5  ;;  %v8375_v5 = vld [vmem:[%s11086_s4 + $0xc8] sm:$0xff]  }
 0x5b3   :  { %4882 = vmatpush1.bf16.msra.mxu1 %v10386_v13  ;;  %v8376_v13 = vld [vmem:[%s11086_s4 + $0x88] sm:$0xff]  }
 0x5b4   :  { %4883 = vmatprep.subr.bf16.mxu1 %v10393_v23  ;;  %v8377_v23 = vld [vmem:[%s11086_s4 + $0xd0] sm:$0xff]  }
 0x5b7   :  { %4884 = vmatpush1.bf16.msra.mxu1 %v10399_v53  ;;  %v8378_v53 = vld [vmem:[%s11086_s4 + $0x90] sm:$0xff]  }
 0x5b8   :  { %4885 = vmatprep.subr.bf16.mxu1 %v10405_v54  ;;  %v8382_v54 = vld [vmem:[%s11086_s4 + $0xa0] sm:$0xff]  }
 0x5bb   :  { %4886 = vmatpush1.bf16.msra.mxu1 %v10411_v26  ;;  %v8383_v26 = vld [vmem:[%s11086_s4 + $0xe8] sm:$0xff]  }
 0x5bc   :  { %4887 = vmatprep.subr.bf16.mxu1 %v10417_v8  ;;  %v8384_v8 = vld [vmem:[%s11086_s4 + $0xa8] sm:$0xff]  }
 0x5bf   :  { %4888 = vmatpush1.bf16.msra.mxu1 %v10423_v39  ;;  %v8385_v39 = vld [vmem:[%s11086_s4 + $0xf0] sm:$0xff]  }
 0x5c0   :  { %4889 = vmatprep.subr.bf16.mxu1 %v10429_v29  ;;  %v8386_v29 = vld [vmem:[%s11086_s4 + $0xb0] sm:$0xff]  }
 0x5c3   :  { %4890 = vmatpush1.bf16.msra.mxu1 %v10435_v27  ;;  %v8387_v27 = vld [vmem:[%s11086_s4 + $0xf8] sm:$0xff]  }
 0x5c4   :  { %4891 = vmatprep.subr.bf16.mxu1 %v10441_v40  ;;  %v8388_v40 = vld [vmem:[%s11086_s4 + $0xb8] sm:$0xff]  }
 0x5c7   :  { %4892 = vmatpush1.bf16.msra.mxu1 %v10447_v51  ;;  %v8389_v51 = vld [vmem:[%s11086_s4 + $0x40] sm:$0xff]  }
 0x5c8   :  { %4893 = vmatprep.subr.bf16.mxu1 %v10453_v57  ;;  %v8390_v57 = vld [vmem:[%s11086_s4] sm:$0xff]  }
 0x5cb   :  { %4894 = vmatpush1.bf16.msra.mxu1 %v10459_v62  ;;  %v8391_v62 = vld [vmem:[%s11086_s4 + $0x48] sm:$0xff]  }
 0x5cc   :  { %7352 = vmatprep.subr.bf16.mxu1 %v8373_v42 }
 0x5ce   :  { %4912 = vmatmul.mubr.bf16.vlgmr.msra.gmra.mrb[60].mxu1 %v4878_v35 }
 0x5cf   :  { %7353 = vmatpush3.bf16.msra.mxu1 %v8374_v44  ;;  %5103 = vmatprep.mubr.bf16.mxu1 %v4967_v22  ;;  %v8381_v22 = vld [vmem:[%s11086_s4 + $0xe0] sm:$0xff]  }
 0x5d0   :  { %7354 = vmatprep.subr.bf16.mxu1 %v8375_v5 }
 0x5d3   :  { %7355 = vmatpush3.bf16.msra.mxu1 %v8376_v13 }
 0x5d4   :  { %7356 = vmatprep.subr.bf16.mxu1 %v8377_v23 }
 0x5d7   :  { %7357 = vmatpush3.bf16.msra.mxu1 %v8378_v53 }
 0x5d8   :  { %7358 = vmatprep.subr.bf16.mxu1 %v8379_v60 }
 0x5db   :  { %7359 = vmatpush3.bf16.msra.mxu1 %v8380_v20 }
 0x5dc   :  { %7360 = vmatprep.subr.bf16.mxu1 %v8381_v22 }
 0x5df   :  { %7361 = vmatpush3.bf16.msra.mxu1 %v8382_v54 }
 0x5e0   :  { %7362 = vmatprep.subr.bf16.mxu1 %v8383_v26 }
 0x5e3   :  { %7363 = vmatpush3.bf16.msra.mxu1 %v8384_v8 }
 0x5e4   :  { %7364 = vmatprep.subr.bf16.mxu1 %v8385_v39 }
 0x5e7   :  { %7365 = vmatpush3.bf16.msra.mxu1 %v8386_v29  ;;  %v8405_v29 = vld [vmem:[%s11082_s3 + $0x500] ss:$8 sps:$4 sm:$0xff]  }
 0x5e8   :  { %7366 = vmatprep.subr.bf16.mxu1 %v8387_v27  ;;  %v8407_v27 = vld [vmem:[%s11082_s3 + $0x504] ss:$8 sps:$4 sm:$0xff]  }
 0x5eb   :  { %7367 = vmatpush3.bf16.msra.mxu1 %v8388_v40  ;;  %v8410_v40 = vld [vmem:[%s11082_s3 + $0x514] ss:$8 sps:$4 sm:$0xff]  }
 0x5ec   :  { %7374 = vmatprep.subr.bf16.mxu1 %v8389_v51 }
 0x5ee   :  { %5104 = vmatmul.mubr.bf16.vlgmr.msra.gmra.mrb[64].mxu1 %v4966_v17  ;;  %v8397_v17 = vld [vmem:[%s11086_s4 + $0x60] sm:$0xff]  }
 0x5ef   :  { %7375 = vmatpush3.bf16.msra.mxu1 %v8390_v57 }
 0x5f0   :  { %7376 = vmatprep.subr.bf16.mxu1 %v8391_v62 }
 0x5f3   :  { %7377 = vmatpush3.bf16.msra.mxu1 %v8392_v41  ;;  %v8408_v41 = vld [vmem:[%s11082_s3 + $0x510] ss:$8 sps:$4 sm:$0xff]  }
 0x5f4   :  { %7378 = vmatprep.subr.bf16.mxu1 %v8393_v46 }
 0x5f7   :  { %7379 = vmatpush3.bf16.msra.mxu1 %v8394_v14 }
 0x5f8   :  { %7380 = vmatprep.subr.bf16.mxu1 %v8395_v43  ;;  %v8413_v43 = vld [vmem:[%s11082_s3 + $0x524] ss:$8 sps:$4 sm:$0xff]  }
 0x5fb   :  { %7381 = vmatpush3.bf16.msra.mxu1 %v8396_v47 }
 0x5fc   :  { %7382 = vmatprep.subr.bf16.mxu1 %v8397_v17 }
 0x5ff   :  { %7383 = vmatpush3.bf16.msra.mxu1 %v8398_v19 }
 0x600   :  { %7384 = vmatprep.subr.bf16.mxu1 %v8399_v21 }
 0x603   :  { %7385 = vmatpush3.bf16.msra.mxu1 %v8400_v6 }
 0x604   :  { %7386 = vmatprep.subr.bf16.mxu1 %v8401_v25 }
 0x607   :  { %7387 = vmatpush3.bf16.msra.mxu1 %v8402_v12  ;;  %v8411_v12 = vld [vmem:[%s11082_s3 + $0x520] ss:$8 sps:$4 sm:$0xff]  }
 0x608   :  { %7388 = vmatprep.subr.bf16.mxu1 %v8403_v15 }
 0x60b   :  { %7389 = vmatpush3.bf16.msra.mxu1 %v8404_v63 }
 0x60c   :  { %5611 = vmatprep.subr.bf16.mxu1 %v8407_v27 }
 0x621   :  { %v4689_v11 = vpop.f32.mrb[44].mxu1 }
 0x622   :  { %v4691_v48 = vpop.f32.mrb[45].mxu1  ;;  %v4690_v37 = vadd.f32 %v4689_v11, %v10655_v34  ;;  %v8416_v11 = vld [vmem:[%s11082_s3 + $0x534] ss:$8 sps:$4 sm:$0xff]  }
 0x623   :  { %v4693_v18 = vpop.f32.mrb[46].mxu1  ;;  %v4692_v28 = vadd.f32 %v4691_v48, %v10658_v61 }
 0x624   :  { %v4695_v31 = vpop.f32.mrb[47].mxu1  ;;  %v4694_v36 = vadd.f32 %v4693_v18, %v10655_v34  ;;  %v4702_v2 = vmul.f32 0.01, %v4690_v37  ;;  %vm4698_vm8 = vcmp.gt.f32.partialorder %v4690_v37, 0.0 }
 0x625   :  { %v4696_v10 = vadd.f32 %v4695_v31, %v10658_v61  ;;  %v4703_v16 = vmul.f32 0.01, %v4692_v28  ;;  %vm4699_vm5 = vcmp.gt.f32.partialorder %v4692_v28, 0.0 }
 0x626   :  { %v4704_v32 = vmul.f32 0.01, %v4694_v36  ;;  %vm4700_vm2 = vcmp.gt.f32.partialorder %v4694_v36, 0.0  ;;  %v10685_v20 = vsel %vm4698_vm8, %v4690_v37, %v4702_v2 }
 0x627   :  { %v4705_v45 = vmul.f32 0.01, %v4696_v10  ;;  %vm4701_vm6 = vcmp.gt.f32.partialorder %v4696_v10, 0.0  ;;  %v10677_v13 = vsel %vm4699_vm5, %v4692_v28, %v4703_v16 }
 0x628   :  { %v10671_v42 = vsel %vm4700_vm2, %v4694_v36, %v4704_v32  ;;  %v8414_v36 = vld [vmem:[%s11082_s3 + $0x530] ss:$8 sps:$4 sm:$0xff]  }
 0x629   :  { %v10679_v23 = vsel %vm4701_vm6, %v4696_v10, %v4705_v45 }
 0x641   :  { %v4745_v58 = vpop.f32.mrb[48].mxu1 }
 0x642   :  { %v4746_v24 = vadd.f32 %v4745_v58, %v10655_v34  ;;  %v4747_v59 = vpop.f32.mrb[49].mxu1  ;;  %v8419_v58 = vld [vmem:[%s11082_s3 + $0x544] ss:$8 sps:$4 sm:$0xff]  }
 0x643   :  { %v4748_v38 = vadd.f32 %v4747_v59, %v10658_v61  ;;  %v4749_v3 = vpop.f32.mrb[50].mxu1  ;;  %v8417_v59 = vld [vmem:[%s11082_s3 + $0x540] ss:$8 sps:$4 sm:$0xff]  }
 0x644   :  { %v4758_v0 = vmul.f32 0.01, %v4746_v24  ;;  %v4750_v7 = vadd.f32 %v4749_v3, %v10655_v34  ;;  %v4751_v4 = vpop.f32.mrb[51].mxu1  ;;  %vm4754_vm3 = vcmp.gt.f32.partialorder %v4746_v24, 0.0 }
 0x645   :  { %vm4755_vm4 = vcmp.gt.f32.partialorder %v4748_v38, 0.0  ;;  %v4759_v30 = vmul.f32 0.01, %v4748_v38  ;;  %v4752_v33 = vadd.f32 %v4751_v4, %v10658_v61 }
 0x646   :  { %vm4756_vm7 = vcmp.gt.f32.partialorder %v4750_v7, 0.0  ;;  %v4760_v55 = vmul.f32 0.01, %v4750_v7  ;;  %v10673_v44 = vsel %vm4754_vm3, %v4746_v24, %v4758_v0 }
 0x647   :  { %v10668_v9 = vsel %vm4755_vm4, %v4748_v38, %v4759_v30  ;;  %vm4757_vm9 = vcmp.gt.f32.partialorder %v4752_v33, 0.0  ;;  %v4761_v35 = vmul.f32 0.01, %v4752_v33  ;;  %v5112_v26 = vadd.f32 %v10673_v44, %v10685_v20 }
 0x648   :  { %v10675_v5 = vsel %vm4756_vm7, %v4750_v7, %v4760_v55  ;;  %v5113_v22 = vadd.f32 %v10668_v9, %v10677_v13 }
 0x649   :  { %v5114_v53 = vadd.f32 %v10675_v5, %v10671_v42  ;;  %v10683_v60 = vsel %vm4757_vm9, %v4752_v33, %v4761_v35 }
 0x64a   :  { %v5115_v54 = vadd.f32 %v10683_v60, %v10679_v23 }
 0x64b   :  { %v5184_v39 = vpack.c.bf16 %v5114_v53, %v5112_v26 }
 0x64c   :  { %v5185_v8 = vpack.c.bf16 %v5115_v54, %v5113_v22 }
 0x64e   :  { %5332 = vmatprep.mubr.bf16.mxu1 %v5185_v8 }
 0x64f   :  { %5333 = vmatmul.mubr.bf16.vlgmr.msra.gmra.mrb[68].mxu1 %v5184_v39 }
 0x650   :  { %5612 = vmatpush1.bf16.msra.mxu1 %v8405_v29 }
 0x651   :  { %5613 = vmatprep.subr.bf16.mxu1 %v8410_v40 }
 0x654   :  { %5614 = vmatpush1.bf16.msra.mxu1 %v8408_v41 }
 0x655   :  { %5615 = vmatprep.subr.bf16.mxu1 %v8413_v43 }
 0x658   :  { %5616 = vmatpush1.bf16.msra.mxu1 %v8411_v12 }
 0x659   :  { %5617 = vmatprep.subr.bf16.mxu1 %v8416_v11 }
 0x65c   :  { %5618 = vmatpush1.bf16.msra.mxu1 %v8414_v36 }
 0x65d   :  { %5619 = vmatprep.subr.bf16.mxu1 %v8419_v58 }
 0x660   :  { %5620 = vmatpush1.bf16.msra.mxu1 %v8417_v59 }
 0x661   :  { %v4801_v51 = vpop.f32.mrb[52].mxu1 }
 0x662   :  { %v4802_v57 = vadd.f32 %v4801_v51, %v10655_v34  ;;  %v4803_v62 = vpop.f32.mrb[53].mxu1 }
 0x663   :  { %v4804_v46 = vadd.f32 %v4803_v62, %v10658_v61  ;;  %v4805_v14 = vpop.f32.mrb[54].mxu1 }
 0x664   :  { %v4814_v47 = vmul.f32 0.01, %v4802_v57  ;;  %v4806_v17 = vadd.f32 %v4805_v14, %v10655_v34  ;;  %v4807_v19 = vpop.f32.mrb[55].mxu1  ;;  %vm4810_vm10 = vcmp.gt.f32.partialorder %v4802_v57, 0.0 }
 0x665   :  { %vm4811_vm11 = vcmp.gt.f32.partialorder %v4804_v46, 0.0  ;;  %v4815_v21 = vmul.f32 0.01, %v4804_v46  ;;  %v4808_v6 = vadd.f32 %v4807_v19, %v10658_v61 }
 0x666   :  { %vm4812_vm12 = vcmp.gt.f32.partialorder %v4806_v17, 0.0  ;;  %v4816_v25 = vmul.f32 0.01, %v4806_v17  ;;  %v10720_v48 = vsel %vm4810_vm10, %v4802_v57, %v4814_v47 }
 0x667   :  { %v10715_v15 = vsel %vm4811_vm11, %v4804_v46, %v4815_v21  ;;  %vm4813_vm13 = vcmp.gt.f32.partialorder %v4808_v6, 0.0  ;;  %v4817_v63 = vmul.f32 0.01, %v4808_v6  ;;  %v5116_v10 = vadd.f32 %v10720_v48, %v10685_v20 }
 0x668   :  { %v10722_v18 = vsel %vm4812_vm12, %v4806_v17, %v4816_v25  ;;  %v5117_v37 = vadd.f32 %v10715_v15, %v10677_v13 }
 0x669   :  { %v10724_v31 = vsel %vm4813_vm13, %v4808_v6, %v4817_v63  ;;  %v5118_v56 = vadd.f32 %v10722_v18, %v10671_v42 }
 0x66a   :  { %v5119_v28 = vadd.f32 %v10724_v31, %v10679_v23 }
 0x66b   :  { %v5186_v24 = vpack.c.bf16 %v5118_v56, %v5116_v10 }
 0x66c   :  { %v5187_v2 = vpack.c.bf16 %v5119_v28, %v5117_v37 }
 0x66e   :  { %5340 = vmatprep.mubr.bf16.mxu1 %v5187_v2 }
 0x66f   :  { %5341 = vmatmul.mubr.bf16.gmra.mrb[72].mxu1 %v5186_v24  ;;  %v5129_v24 = vadd.f32 %v10715_v15, %v10668_v9 }
 0x681   :  { %v4857_v16 = vpop.f32.mrb[56].mxu1 }
 0x682   :  { %v4858_v32 = vadd.f32 %v4857_v16, %v10655_v34  ;;  %v4859_v38 = vpop.f32.mrb[57].mxu1 }
 0x683   :  { %v4860_v3 = vadd.f32 %v4859_v38, %v10658_v61  ;;  %v4861_v45 = vpop.f32.mrb[58].mxu1 }
 0x684   :  { %vm4866_vm14 = vcmp.gt.f32.partialorder %v4858_v32, 0.0  ;;  %v4870_v0 = vmul.f32 0.01, %v4858_v32  ;;  %v4862_v7 = vadd.f32 %v4861_v45, %v10655_v34  ;;  %v4863_v4 = vpop.f32.mrb[59].mxu1 }
 0x685   :  { %vm4867_vm15 = vcmp.gt.f32.partialorder %v4860_v3, 0.0  ;;  %v4871_v30 = vmul.f32 0.01, %v4860_v3  ;;  %v4864_v33 = vadd.f32 %v4863_v4, %v10658_v61 }
 0x686   :  { %v10747_v55 = vsel %vm4866_vm14, %v4858_v32, %v4870_v0  ;;  %vm4868_vm0 = vcmp.gt.f32.partialorder %v4862_v7, 0.0  ;;  %v4872_v35 = vmul.f32 0.01, %v4862_v7  ;;  %v5131_v32 = vadd.f32 %v10724_v31, %v10683_v60 }
 0x687   :  { %v10749_v53 = vsel %vm4867_vm15, %v4860_v3, %v4871_v30  ;;  %vm4869_vm1 = vcmp.gt.f32.partialorder %v4864_v33, 0.0  ;;  %v4873_v22 = vmul.f32 0.01, %v4864_v33  ;;  %v5120_v8 = vadd.f32 %v10747_v55, %v10685_v20  ;;  %v8420_v30 = vld [vmem:[%s11082_s3 + $0x550] ss:$8 sps:$4 sm:$0xff]  }
 0x688   :  { %v10751_v54 = vsel %vm4868_vm0, %v4862_v7, %v4872_v35  ;;  %v5121_v26 = vadd.f32 %v10749_v53, %v10677_v13  ;;  %v10759_v39 = vadd.f32 %v10749_v53, %v10668_v9  ;;  %v10767_v40 = vadd.f32 %v10747_v55, %v10673_v44 }
 0x689   :  { %v10761_v29 = vsel %vm4869_vm1, %v4864_v33, %v4873_v22  ;;  %v5122_v27 = vadd.f32 %v10751_v54, %v10671_v42  ;;  %v10771_v51 = vadd.f32 %v10751_v54, %v10675_v5  ;;  %v10781_v41 = vadd.f32 %v10749_v53, %v10715_v15 }
 0x68a   :  { %v5123_v57 = vadd.f32 %v10761_v29, %v10679_v23  ;;  %v10777_v62 = vadd.f32 %v10761_v29, %v10683_v60  ;;  %v10785_v46 = vadd.f32 %v10761_v29, %v10724_v31  ;;  %v10791_v47 = vadd.f32 %v10747_v55, %v10720_v48 }
 0x68b   :  { %v5188_v14 = vpack.c.bf16 %v5122_v27, %v5120_v8  ;;  %v5194_v43 = vpack.c.bf16 %v10771_v51, %v10767_v40  ;;  %v10795_v17 = vadd.f32 %v10751_v54, %v10722_v18 }
 0x68c   :  { %v5189_v19 = vpack.c.bf16 %v5123_v57, %v5121_v26  ;;  %v5195_v21 = vpack.c.bf16 %v10777_v62, %v10759_v39  ;;  %v5199_v6 = vpack.c.bf16 %v10785_v46, %v10781_v41 }
 0x68d   :  { %v5198_v25 = vpack.c.bf16 %v10795_v17, %v10791_v47 }
 0x68e   :  { %5348 = vmatprep.mubr.bf16.mxu1 %v5189_v19 }
 0x68f   :  { %5349 = vmatmul.mubr.bf16.gmra.mrb[76].mxu1 %v5188_v14 }
 0x6a1   :  { %v4913_v12 = vpop.f32.mrb[60].mxu1 }
 0x6a2   :  { %v4914_v63 = vadd.f32 %v4913_v12, %v10655_v34  ;;  %v4915_v11 = vpop.f32.mrb[61].mxu1 }
 0x6a3   :  { %v4916_v56 = vadd.f32 %v4915_v11, %v10658_v61  ;;  %v4917_v37 = vpop.f32.mrb[62].mxu1 }
 0x6a4   :  { %vm4922_vm2 = vcmp.gt.f32.partialorder %v4914_v63, 0.0  ;;  %v4926_v28 = vmul.f32 0.01, %v4914_v63  ;;  %v4918_v36 = vadd.f32 %v4917_v37, %v10655_v34  ;;  %v4919_v10 = vpop.f32.mrb[63].mxu1  ;;  %v8422_v34 = vld [vmem:[%s11082_s3 + $0x554] ss:$8 sps:$4 sm:$0xff]   ;;  %v5193_v37 = vpack.c.bf16 %v5131_v32, %v5129_v24 }
 0x6a5   :  { %vm4923_vm3 = vcmp.gt.f32.partialorder %v4916_v56, 0.0  ;;  %v4927_v58 = vmul.f32 0.01, %v4916_v56  ;;  %v4920_v2 = vadd.f32 %v4919_v10, %v10658_v61  ;;  %5621 = vmatprep.subr.bf16.mxu1 %v8422_v34 }
 0x6a6   :  { %v4930_v59 = vsel %vm4922_vm2, %v4914_v63, %v4926_v28  ;;  %vm4924_vm4 = vcmp.gt.f32.partialorder %v4918_v36, 0.0  ;;  %v4928_v16 = vmul.f32 0.01, %v4918_v36  ;;  %5622 = vmatpush1.bf16.msra.mxu1 %v8420_v30 }
 0x6a7   :  { %v4931_v38 = vsel %vm4923_vm3, %v4916_v56, %v4927_v58  ;;  %vm4925_vm5 = vcmp.gt.f32.partialorder %v4920_v2, 0.0  ;;  %v4929_v3 = vmul.f32 0.01, %v4920_v2  ;;  %v5124_v45 = vadd.f32 %v4930_v59, %v10685_v20 }
 0x6a8   :  { %v4932_v0 = vsel %vm4924_vm4, %v4918_v36, %v4928_v16  ;;  %v5125_v61 = vadd.f32 %v4931_v38, %v10677_v13  ;;  %v5137_v7 = vadd.f32 %v4931_v38, %v10668_v9  ;;  %v5136_v4 = vadd.f32 %v4930_v59, %v10673_v44 }
 0x6a9   :  { %v4933_v33 = vsel %vm4925_vm5, %v4920_v2, %v4929_v3  ;;  %v5126_v35 = vadd.f32 %v4932_v0, %v10671_v42  ;;  %v5138_v20 = vadd.f32 %v4932_v0, %v10675_v5  ;;  %v5145_v22 = vadd.f32 %v4931_v38, %v10715_v15  ;;  %v8425_v15 = vld [vmem:[%s11082_s3 + $0x564] ss:$8 sps:$4 sm:$0xff]  }
 0x6aa   :  { %v5127_v26 = vadd.f32 %v4933_v33, %v10679_v23  ;;  %v5139_v13 = vadd.f32 %v4933_v33, %v10683_v60  ;;  %v5147_v9 = vadd.f32 %v4933_v33, %v10724_v31  ;;  %v5144_v8 = vadd.f32 %v4930_v59, %v10720_v48  ;;  %v8423_v31 = vld [vmem:[%s11082_s3 + $0x560] ss:$8 sps:$4 sm:$0xff]   ;;  %5623 = vmatprep.subr.bf16.mxu1 %v8425_v15 }
 0x6ab   :  { %v5190_v27 = vpack.c.bf16 %v5126_v35, %v5124_v45  ;;  %v5196_v57 = vpack.c.bf16 %v5138_v20, %v5136_v4  ;;  %v5146_v14 = vadd.f32 %v4932_v0, %v10722_v18  ;;  %v5149_v42 = vadd.f32 %v4931_v38, %v10749_v53  ;;  %v8428_v53 = vld [vmem:[%s11082_s3 + $0x574] ss:$8 sps:$4 sm:$0xff]   ;;  %5624 = vmatpush1.bf16.msra.mxu1 %v8423_v31  ;;  %v8429_v38 = vld [vmem:[%s11086_s4 + $0x140] sm:$0xff]   ;;  %v8431_v45 = vld [vmem:[%s11086_s4 + $0x148] sm:$0xff]  }
 0x6ac   :  { %v5191_v19 = vpack.c.bf16 %v5127_v26, %v5125_v61  ;;  %v5197_v12 = vpack.c.bf16 %v5139_v13, %v5137_v7  ;;  %v5201_v23 = vpack.c.bf16 %v5147_v9, %v5145_v22  ;;  %v5151_v60 = vadd.f32 %v4933_v33, %v10761_v29  ;;  %v8426_v29 = vld [vmem:[%s11082_s3 + $0x570] ss:$8 sps:$4 sm:$0xff]   ;;  %5625 = vmatprep.subr.bf16.mxu1 %v8428_v53  ;;  %v8430_v3 = vld [vmem:[%s11086_s4 + $0x100] sm:$0xff]  }
 0x6ad   :  { %v5200_v63 = vpack.c.bf16 %v5146_v14, %v5144_v8  ;;  %v5148_v11 = vadd.f32 %v4930_v59, %v10747_v55  ;;  %v5150_v56 = vadd.f32 %v4932_v0, %v10751_v54  ;;  %v5130_v55 = vadd.f32 %v10722_v18, %v10675_v5  ;;  %7450 = vmatprep.subr.bf16.mxu0 %v8429_v38  ;;  %v8432_v0 = vld [vmem:[%s11086_s4 + $0x108] sm:$0xff]   ;;  %v8433_v7 = vld [vmem:[%s11086_s4 + $0x150] sm:$0xff]   ;;  %v8435_v26 = vld [vmem:[%s11086_s4 + $0x158] sm:$0xff]  }
 0x6ae   :  { %5356 = vmatprep.mubr.bf16.mxu1 %v5191_v19  ;;  %v5203_v28 = vpack.c.bf16 %v5151_v60, %v5149_v42  ;;  %v5128_v54 = vadd.f32 %v10720_v48, %v10673_v44  ;;  %v7252_v44 = vld [vmem:[%s11083_s6 + $0x2a] ss:$0 sm:$0xff]  ;;  %7451 = vmatpush3.bf16.msra.mxu0 %v8430_v3  ;;  %v8434_v22 = vld [vmem:[%s11086_s4 + $0x110] sm:$0xff]   ;;  %v8438_v19 = vld [vmem:[%s11086_s4 + $0x120] sm:$0xff]  }
 0x6af   :  { %5357 = vmatmul.mubr.bf16.gmra.mrb[80].mxu1 %v5190_v27  ;;  %v5202_v36 = vpack.c.bf16 %v5150_v56, %v5148_v11  ;;  %7452 = vmatprep.subr.bf16.mxu0 %v8431_v45  ;;  %v8436_v27 = vld [vmem:[%s11086_s4 + $0x118] sm:$0xff]  }
 0x6b0   :  { %5364 = vmatprep.mubr.bf16.mxu1 %v5193_v37  ;;  %5626 = vmatpush1.bf16.msra.mxu1 %v8426_v29  ;;  %v5192_v10 = vpack.c.bf16 %v5130_v55, %v5128_v54  ;;  %v8444_v3 = vld [vmem:[%s11086_s4 + $0x138] sm:$0xff]  }
 0x6b2   :  { %7453 = vmatpush3.bf16.msra.mxu0 %v8432_v0 }
 0x6b3   :  { %7454 = vmatprep.subr.bf16.mxu0 %v8433_v7 }
 0x6b6   :  { %7455 = vmatpush3.bf16.msra.mxu0 %v8434_v22 }
 0x6b7   :  { %5365 = vmatmul.mubr.bf16.gmra.mrb[84].mxu1 %v5192_v10  ;;  %7456 = vmatprep.subr.bf16.mxu0 %v8435_v26 }
 0x6b8   :  { %5372 = vmatprep.mubr.bf16.mxu1 %v5195_v21 }
 0x6ba   :  { %7457 = vmatpush3.bf16.msra.mxu0 %v8436_v27 }
 0x6bf   :  { %5373 = vmatmul.mubr.bf16.gmra.mrb[88].mxu1 %v5194_v43 }
 0x6c0   :  { %5380 = vmatprep.mubr.bf16.mxu1 %v5197_v12 }
 0x6c1   :  { %v7368_v58 = vpop.f32.mrb[64].mxu1 }
 0x6c2   :  { %v7369_v2 = vpop.f32.mrb[65].mxu1 }
 0x6c3   :  { %v7370_v24 = vadd.f32 %v7369_v2, %v7368_v58  ;;  %v7371_v59 = vpop.f32.mrb[66].mxu1 }
 0x6c4   :  { %v7372_v5 = vpop.f32.mrb[67].mxu1 }
 0x6c5   :  { %v7373_v18 = vadd.f32 %v7372_v5, %v7371_v59  ;;  %v10865_v40 = vadd.f32 %v7370_v24, %v7252_v44 }
 0x6c7   :  { %5381 = vmatmul.mubr.bf16.gmra.mrb[92].mxu1 %v5196_v57  ;;  %v10867_v46 = vadd.f32 %v7373_v18, %v7252_v44  ;;  %v8437_v57 = vld [vmem:[%s11086_s4 + $0x160] sm:$0xff]   ;;  %v8439_v18 = vld [vmem:[%s11086_s4 + $0x168] sm:$0xff]  }
 0x6c8   :  { %5388 = vmatprep.mubr.bf16.mxu1 %v5199_v6  ;;  %7458 = vmatprep.subr.bf16.mxu0 %v8437_v57  ;;  %v8440_v44 = vld [vmem:[%s11086_s4 + $0x128] sm:$0xff]  }
 0x6c9   :  { %7459 = vmatpush3.bf16.msra.mxu0 %v8438_v19 }
 0x6ca   :  { %7460 = vmatprep.subr.bf16.mxu0 %v8439_v18 }
 0x6cd   :  { %7461 = vmatpush3.bf16.msra.mxu0 %v8440_v44 }
 0x6cf   :  { %5389 = vmatmul.mubr.bf16.gmra.mrb[96].mxu1 %v5198_v25 }
 0x6d0   :  { %5396 = vmatprep.mubr.bf16.mxu1 %v5201_v23 }
 0x6d7   :  { %5397 = vmatmul.mubr.bf16.gmra.mrb[100].mxu1 %v5200_v63 }
 0x6d8   :  { %5404 = vmatprep.mubr.bf16.mxu1 %v5203_v28 }
 0x6df   :  { %5405 = vmatmul.mubr.bf16.gmra.mrb[104].mxu1 %v5202_v36 }
 0x6e0   :  { %5643 = vmatprep.mubr.bf16.mxu1 %v8502_v1 }
 0x722   :  { %v7390_v48 = vpop.f32.mrb[68].mxu1 }
 0x723   :  { %v7391_v39 = vpop.f32.mrb[69].mxu1 }
 0x724   :  { %v7392_v51 = vadd.f32 %v7391_v39, %v7390_v48  ;;  %v7393_v62 = vpop.f32.mrb[70].mxu1 }
 0x725   :  { %v7394_v41 = vpop.f32.mrb[71].mxu1 }
 0x726   :  { %v5413_v43 = vadd.f32 %v7392_v51, %v10865_v40  ;;  %v7395_v47 = vadd.f32 %v7394_v41, %v7393_v62  ;;  %v8441_v41 = vld [vmem:[%s11086_s4 + $0x170] sm:$0xff]  }
 0x727   :  { %7462 = vmatprep.subr.bf16.mxu0 %v8441_v41 }
 0x728   :  { %v5453_v17 = vmul.f32 0.01, %v5413_v43  ;;  %v5414_v21 = vadd.f32 %v7395_v47, %v10867_v46  ;;  %vm5433_vm6 = vcmp.gt.f32.partialorder %v5413_v43, 0.0 }
 0x72a   :  { %vm5434_vm7 = vcmp.gt.f32.partialorder %v5414_v21, 0.0  ;;  %v5454_v6 = vmul.f32 0.01, %v5414_v21  ;;  %v5473_v25 = vsel %vm5433_vm6, %v5413_v43, %v5453_v17  ;;  %v8442_v43 = vld [vmem:[%s11086_s4 + $0x130] sm:$0xff]   ;;  %v8443_v17 = vld [vmem:[%s11086_s4 + $0x178] sm:$0xff]  }
 0x72b   :  { %7463 = vmatpush3.bf16.msra.mxu0 %v8442_v43 }
 0x72c   :  { %v5474_v16 = vsel %vm5434_vm7, %v5414_v21, %v5454_v6  ;;  %7464 = vmatprep.subr.bf16.mxu0 %v8443_v17 }
 0x72d   :  { %v5509_v32 = vpack.c.bf16 %v5474_v16, %v5473_v25 }
 0x72f   :  { %5644 = vmatmul.mubr.bf16.vlgmr.msra.gmra.mrb[108].mxu1 %v5509_v32  ;;  %7465 = vmatpush3.bf16.msra.mxu0 %v8444_v3 }
 0x730   :  { %5653 = vmatprep.mubr.bf16.mxu1 %v8502_v1 }
 0x742   :  { %v7396_v34 = vpop.f32.mrb[72].mxu1 }
 0x743   :  { %v7397_v61 = vpop.f32.mrb[73].mxu1 }
 0x744   :  { %v7398_v4 = vadd.f32 %v7397_v61, %v7396_v34  ;;  %v7399_v30 = vpop.f32.mrb[74].mxu1 }
 0x745   :  { %v7400_v33 = vpop.f32.mrb[75].mxu1 }
 0x746   :  { %v5415_v35 = vadd.f32 %v7398_v4, %v10865_v40  ;;  %v7401_v20 = vadd.f32 %v7400_v33, %v7399_v30 }
 0x748   :  { %v5455_v13 = vmul.f32 0.01, %v5415_v35  ;;  %v5416_v9 = vadd.f32 %v7401_v20, %v10867_v46  ;;  %vm5435_vm8 = vcmp.gt.f32.partialorder %v5415_v35, 0.0 }
 0x74a   :  { %vm5436_vm9 = vcmp.gt.f32.partialorder %v5416_v9, 0.0  ;;  %v5456_v8 = vmul.f32 0.01, %v5416_v9  ;;  %v5475_v14 = vsel %vm5435_vm8, %v5415_v35, %v5455_v13 }
 0x74c   :  { %v5476_v42 = vsel %vm5436_vm9, %v5416_v9, %v5456_v8 }
 0x74d   :  { %v5510_v15 = vpack.c.bf16 %v5476_v42, %v5475_v14 }
 0x74f   :  { %5654 = vmatmul.mubr.bf16.gmra.mrb[112].mxu1 %v5510_v15 }
 0x750   :  { %5663 = vmatprep.mubr.bf16.mxu1 %v8502_v1 }
 0x762   :  { %v7402_v12 = vpop.f32.mrb[76].mxu1 }
 0x763   :  { %v7403_v23 = vpop.f32.mrb[77].mxu1 }
 0x764   :  { %v7404_v60 = vadd.f32 %v7403_v23, %v7402_v12  ;;  %v7405_v31 = vpop.f32.mrb[78].mxu1 }
 0x765   :  { %v7406_v63 = vpop.f32.mrb[79].mxu1 }
 0x766   :  { %v5417_v11 = vadd.f32 %v7404_v60, %v10865_v40  ;;  %v7407_v56 = vadd.f32 %v7406_v63, %v7405_v31 }
 0x768   :  { %v5457_v53 = vmul.f32 0.01, %v5417_v11  ;;  %v5418_v37 = vadd.f32 %v7407_v56, %v10867_v46  ;;  %vm5437_vm10 = vcmp.gt.f32.partialorder %v5417_v11, 0.0 }
 0x76a   :  { %vm5438_vm11 = vcmp.gt.f32.partialorder %v5418_v37, 0.0  ;;  %v5458_v28 = vmul.f32 0.01, %v5418_v37  ;;  %v5477_v29 = vsel %vm5437_vm10, %v5417_v11, %v5457_v53 }
 0x76c   :  { %v5478_v36 = vsel %vm5438_vm11, %v5418_v37, %v5458_v28 }
 0x76d   :  { %v5511_v55 = vpack.c.bf16 %v5478_v36, %v5477_v29 }
 0x76f   :  { %5664 = vmatmul.mubr.bf16.gmra.mrb[116].mxu1 %v5511_v55 }
 0x770   :  { %5673 = vmatprep.mubr.bf16.mxu1 %v8502_v1 }
 0x782   :  { %v7408_v54 = vpop.f32.mrb[80].mxu1 }
 0x783   :  { %v7409_v10 = vpop.f32.mrb[81].mxu1 }
 0x784   :  { %v7410_v58 = vadd.f32 %v7409_v10, %v7408_v54  ;;  %v7411_v2 = vpop.f32.mrb[82].mxu1 }
 0x785   :  { %v7412_v24 = vpop.f32.mrb[83].mxu1 }
 0x786   :  { %v5419_v59 = vadd.f32 %v7410_v58, %v10865_v40  ;;  %v7413_v5 = vadd.f32 %v7412_v24, %v7411_v2 }
 0x788   :  { %v5459_v48 = vmul.f32 0.01, %v5419_v59  ;;  %v5420_v39 = vadd.f32 %v7413_v5, %v10867_v46  ;;  %vm5439_vm12 = vcmp.gt.f32.partialorder %v5419_v59, 0.0 }
 0x78a   :  { %vm5440_vm13 = vcmp.gt.f32.partialorder %v5420_v39, 0.0  ;;  %v5460_v51 = vmul.f32 0.01, %v5420_v39  ;;  %v7414_v62 = vpop.f32.mrb[84].mxu1  ;;  %v5479_v25 = vsel %vm5439_vm12, %v5419_v59, %v5459_v48 }
 0x78b   :  { %v7415_v47 = vpop.f32.mrb[85].mxu1 }
 0x78c   :  { %v7416_v21 = vadd.f32 %v7415_v47, %v7414_v62  ;;  %v7417_v6 = vpop.f32.mrb[86].mxu1  ;;  %v5480_v16 = vsel %vm5440_vm13, %v5420_v39, %v5460_v51 }
 0x78d   :  { %v7418_v32 = vpop.f32.mrb[87].mxu1  ;;  %v5512_v38 = vpack.c.bf16 %v5480_v16, %v5479_v25 }
 0x78e   :  { %v5421_v45 = vadd.f32 %v7416_v21, %v10865_v40  ;;  %v7419_v34 = vadd.f32 %v7418_v32, %v7417_v6 }
 0x78f   :  { %5674 = vmatmul.mubr.bf16.gmra.mrb[120].mxu1 %v5512_v38 }
 0x790   :  { %v5461_v0 = vmul.f32 0.01, %v5421_v45  ;;  %v5422_v61 = vadd.f32 %v7419_v34, %v10867_v46  ;;  %5683 = vmatprep.mubr.bf16.mxu1 %v8502_v1  ;;  %vm5441_vm14 = vcmp.gt.f32.partialorder %v5421_v45, 0.0 }
 0x792   :  { %vm5442_vm15 = vcmp.gt.f32.partialorder %v5422_v61, 0.0  ;;  %v5462_v7 = vmul.f32 0.01, %v5422_v61  ;;  %v7420_v4 = vpop.f32.mrb[88].mxu1  ;;  %v5481_v20 = vsel %vm5441_vm14, %v5421_v45, %v5461_v0 }
 0x793   :  { %v7421_v30 = vpop.f32.mrb[89].mxu1 }
 0x794   :  { %v7422_v33 = vadd.f32 %v7421_v30, %v7420_v4  ;;  %v7423_v35 = vpop.f32.mrb[90].mxu1  ;;  %v5482_v22 = vsel %vm5442_vm15, %v5422_v61, %v5462_v7 }
 0x795   :  { %v7424_v26 = vpop.f32.mrb[91].mxu1  ;;  %v5513_v13 = vpack.c.bf16 %v5482_v22, %v5481_v20 }
 0x796   :  { %v5423_v9 = vadd.f32 %v7422_v33, %v10865_v40  ;;  %v7425_v8 = vadd.f32 %v7424_v26, %v7423_v35 }
 0x797   :  { %5684 = vmatmul.mubr.bf16.gmra.mrb[124].mxu1 %v5513_v13 }
 0x798   :  { %v5463_v27 = vmul.f32 0.01, %v5423_v9  ;;  %v5424_v57 = vadd.f32 %v7425_v8, %v10867_v46  ;;  %5693 = vmatprep.mubr.bf16.mxu1 %v8502_v1  ;;  %vm5443_vm0 = vcmp.gt.f32.partialorder %v5423_v9, 0.0 }
 0x79a   :  { %vm5444_vm1 = vcmp.gt.f32.partialorder %v5424_v57, 0.0  ;;  %v5464_v14 = vmul.f32 0.01, %v5424_v57  ;;  %v7426_v42 = vpop.f32.mrb[92].mxu1  ;;  %v5483_v23 = vsel %vm5443_vm0, %v5423_v9, %v5463_v27  ;;  %v5519_v27 = vld [vmem:[%s11083_s6 + $0x2b] sm:$0x3] }
 0x79b   :  { %v7427_v15 = vpop.f32.mrb[93].mxu1 }
 0x79c   :  { %v7428_v19 = vadd.f32 %v7427_v15, %v7426_v42  ;;  %v7429_v12 = vpop.f32.mrb[94].mxu1  ;;  %v5484_v60 = vsel %vm5444_vm1, %v5424_v57, %v5464_v14  ;;  %v10953_v57 = vrot.slane %v5519_v27, %v8708_v52 }
 0x79d   :  { %v7430_v31 = vpop.f32.mrb[95].mxu1  ;;  %v5514_v63 = vpack.c.bf16 %v5484_v60, %v5483_v23 }
 0x79e   :  { %v5425_v11 = vadd.f32 %v7428_v19, %v10865_v40  ;;  %v7431_v56 = vadd.f32 %v7430_v31, %v7429_v12 }
 0x79f   :  { %5694 = vmatmul.mubr.bf16.gmra.mrb[128].mxu1 %v5514_v63 }
 0x7a0   :  { %v5465_v53 = vmul.f32 0.01, %v5425_v11  ;;  %v5426_v37 = vadd.f32 %v7431_v56, %v10867_v46  ;;  %5703 = vmatprep.mubr.bf16.mxu1 %v8502_v1  ;;  %vm5445_vm2 = vcmp.gt.f32.partialorder %v5425_v11, 0.0 }
 0x7a2   :  { %vm5446_vm3 = vcmp.gt.f32.partialorder %v5426_v37, 0.0  ;;  %v5466_v28 = vmul.f32 0.01, %v5426_v37  ;;  %v7432_v29 = vpop.f32.mrb[96].mxu1  ;;  %v5485_v10 = vsel %vm5445_vm2, %v5425_v11, %v5465_v53 }
 0x7a3   :  { %v7433_v36 = vpop.f32.mrb[97].mxu1 }
 0x7a4   :  { %v7434_v55 = vadd.f32 %v7433_v36, %v7432_v29  ;;  %v7435_v54 = vpop.f32.mrb[98].mxu1  ;;  %v5486_v58 = vsel %vm5446_vm3, %v5426_v37, %v5466_v28 }
 0x7a5   :  { %v7436_v2 = vpop.f32.mrb[99].mxu1  ;;  %v5515_v24 = vpack.c.bf16 %v5486_v58, %v5485_v10 }
 0x7a6   :  { %v5427_v59 = vadd.f32 %v7434_v55, %v10865_v40  ;;  %v7437_v5 = vadd.f32 %v7436_v2, %v7435_v54 }
 0x7a7   :  { %5704 = vmatmul.mubr.bf16.gmra.mrb[132].mxu1 %v5515_v24 }
 0x7a8   :  { %v5467_v18 = vmul.f32 0.01, %v5427_v59  ;;  %v5428_v44 = vadd.f32 %v7437_v5, %v10867_v46  ;;  %5713 = vmatprep.mubr.bf16.mxu1 %v8502_v1  ;;  %vm5447_vm4 = vcmp.gt.f32.partialorder %v5427_v59, 0.0 }
 0x7aa   :  { %vm5448_vm5 = vcmp.gt.f32.partialorder %v5428_v44, 0.0  ;;  %v5468_v48 = vmul.f32 0.01, %v5428_v44  ;;  %v7438_v39 = vpop.f32.mrb[100].mxu1  ;;  %v5487_v43 = vsel %vm5447_vm4, %v5427_v59, %v5467_v18 }
 0x7ab   :  { %v7439_v51 = vpop.f32.mrb[101].mxu1 }
 0x7ac   :  { %v7440_v62 = vadd.f32 %v7439_v51, %v7438_v39  ;;  %v7441_v41 = vpop.f32.mrb[102].mxu1  ;;  %v5488_v47 = vsel %vm5448_vm5, %v5428_v44, %v5468_v48 }
 0x7ad   :  { %v7442_v17 = vpop.f32.mrb[103].mxu1  ;;  %v5516_v21 = vpack.c.bf16 %v5488_v47, %v5487_v43 }
 0x7ae   :  { %v5429_v6 = vadd.f32 %v7440_v62, %v10865_v40  ;;  %v7443_v25 = vadd.f32 %v7442_v17, %v7441_v41 }
 0x7af   :  { %5714 = vmatmul.mubr.bf16.gmra.mrb[136].mxu1 %v5516_v21 }
 0x7b0   :  { %v5469_v16 = vmul.f32 0.01, %v5429_v6  ;;  %v5430_v32 = vadd.f32 %v7443_v25, %v10867_v46  ;;  %5723 = vmatprep.mubr.bf16.mxu1 %v8502_v1  ;;  %vm5449_vm6 = vcmp.gt.f32.partialorder %v5429_v6, 0.0 }
 0x7b2   :  { %vm5450_vm7 = vcmp.gt.f32.partialorder %v5430_v32, 0.0  ;;  %v5470_v38 = vmul.f32 0.01, %v5430_v32  ;;  %v7444_v3 = vpop.f32.mrb[104].mxu1  ;;  %v5489_v61 = vsel %vm5449_vm6, %v5429_v6, %v5469_v16 }
 0x7b3   :  { %v7445_v45 = vpop.f32.mrb[105].mxu1 }
 0x7b4   :  { %v7446_v34 = vadd.f32 %v7445_v45, %v7444_v3  ;;  %v7447_v0 = vpop.f32.mrb[106].mxu1  ;;  %v5490_v7 = vsel %vm5450_vm7, %v5430_v32, %v5470_v38 }
 0x7b5   :  { %v7448_v4 = vpop.f32.mrb[107].mxu1  ;;  %v5517_v30 = vpack.c.bf16 %v5490_v7, %v5489_v61 }
 0x7b6   :  { %v5431_v33 = vadd.f32 %v7446_v34, %v10865_v40  ;;  %v7449_v35 = vadd.f32 %v7448_v4, %v7447_v0  ;;  %v10950_v40 = vrot.slane %v5519_v27, %v8702_v50 }
 0x7b7   :  { %5724 = vmatmul.mubr.bf16.gmra.mrb[140].mxu1 %v5517_v30 }
 0x7b8   :  { %v5471_v20 = vmul.f32 0.01, %v5431_v33  ;;  %v5432_v22 = vadd.f32 %v7449_v35, %v10867_v46  ;;  %5733 = vmatprep.mubr.bf16.mxu1 %v8502_v1  ;;  %vm5451_vm8 = vcmp.gt.f32.partialorder %v5431_v33, 0.0 }
 0x7ba   :  { %vm5452_vm9 = vcmp.gt.f32.partialorder %v5432_v22, 0.0  ;;  %v5472_v26 = vmul.f32 0.01, %v5432_v22  ;;  %v5491_v13 = vsel %vm5451_vm8, %v5431_v33, %v5471_v20 }
 0x7bc   :  { %v5492_v9 = vsel %vm5452_vm9, %v5432_v22, %v5472_v26 }
 0x7bd   :  { %v5518_v8 = vpack.c.bf16 %v5492_v9, %v5491_v13 }
 0x7bf   :  { %5734 = vmatmul.mubr.bf16.gmra.mrb[144].mxu1 %v5518_v8 }
 0x802   :  { %v5645_v46 = vpop.f32.mrb[108].mxu1 }
 0x803   :  { %v5646_v1 = vadd.f32 %v5645_v46, %v10950_v40  ;;  %v5647_v14 = vpop.f32.mrb[109].mxu1 }
 0x804   :  { %v5648_v42 = vadd.f32 %v5647_v14, %v10953_v57  ;;  %v5649_v15 = vpop.f32.mrb[110].mxu1 }
 0x805   :  { %v5784_v19 = vmul.f32 0.01, %v5646_v1  ;;  %v5650_v12 = vadd.f32 %v5649_v15, %v10950_v40  ;;  %v5651_v23 = vpop.f32.mrb[111].mxu1  ;;  %vm5744_vm10 = vcmp.gt.f32.partialorder %v5646_v1, 0.0 }
 0x806   :  { %v5785_v60 = vmul.f32 0.01, %v5648_v42  ;;  %v5652_v31 = vadd.f32 %v5651_v23, %v10953_v57  ;;  %vm5745_vm11 = vcmp.gt.f32.partialorder %v5648_v42, 0.0 }
 0x807   :  { %vm5746_vm12 = vcmp.gt.f32.partialorder %v5650_v12, 0.0  ;;  %v5786_v63 = vmul.f32 0.01, %v5650_v12  ;;  %v5824_v11 = vsel %vm5744_vm10, %v5646_v1, %v5784_v19 }
 0x808   :  { %vm5747_vm13 = vcmp.gt.f32.partialorder %v5652_v31, 0.0  ;;  %v5787_v52 = vmul.f32 0.01, %v5652_v31  ;;  %v5825_v37 = vsel %vm5745_vm11, %v5648_v42, %v5785_v60  ;;  %v8445_v60 = vld [vmem:[%s11086_s4 + $0x180] sm:$0xff]  }
 0x809   :  { %v5826_v56 = vsel %vm5746_vm12, %v5650_v12, %v5786_v63  ;;  %7550 = vmatprep.subr.bf16.mxu1 %v8445_v60 }
 0x80a   :  { %v5896_v53 = vpack.c.bf16 %v5826_v56, %v5824_v11  ;;  %v5827_v28 = vsel %vm5747_vm13, %v5652_v31, %v5787_v52  ;;  %7551 = vmatpush3.bf16.msra.mxu1 %v8445_v60 }
 0x80b   :  { %v5897_v29 = vpack.c.bf16 %v5827_v28, %v5825_v37 }
 0x80d   :  { %6051 = vmatprep.mubr.bf16.mxu0 %v5897_v29 }
 0x80e   :  { %6052 = vmatmul.mubr.bf16.vlgmr.msra.gmra.mrb[28].mxu0 %v5896_v53 }
 0x822   :  { %v5655_v36 = vpop.f32.mrb[112].mxu1 }
 0x823   :  { %v5656_v55 = vadd.f32 %v5655_v36, %v10950_v40  ;;  %v5657_v54 = vpop.f32.mrb[113].mxu1 }
 0x824   :  { %v5658_v10 = vadd.f32 %v5657_v54, %v10953_v57  ;;  %v5659_v58 = vpop.f32.mrb[114].mxu1 }
 0x825   :  { %v5788_v2 = vmul.f32 0.01, %v5656_v55  ;;  %v5660_v24 = vadd.f32 %v5659_v58, %v10950_v40  ;;  %v5661_v59 = vpop.f32.mrb[115].mxu1  ;;  %vm5748_vm14 = vcmp.gt.f32.partialorder %v5656_v55, 0.0 }
 0x826   :  { %v5789_v5 = vmul.f32 0.01, %v5658_v10  ;;  %v5662_v18 = vadd.f32 %v5661_v59, %v10953_v57  ;;  %vm5749_vm15 = vcmp.gt.f32.partialorder %v5658_v10, 0.0 }
 0x827   :  { %vm5750_vm0 = vcmp.gt.f32.partialorder %v5660_v24, 0.0  ;;  %v5790_v44 = vmul.f32 0.01, %v5660_v24  ;;  %v5828_v39 = vsel %vm5748_vm14, %v5656_v55, %v5788_v2  ;;  %v8446_v2 = vld [vmem:[%s11086_s4 + $0x188] sm:$0xff]  }
 0x828   :  { %vm5751_vm1 = vcmp.gt.f32.partialorder %v5662_v18, 0.0  ;;  %v5791_v48 = vmul.f32 0.01, %v5662_v18  ;;  %v5829_v62 = vsel %vm5749_vm15, %v5658_v10, %v5789_v5  ;;  %7552 = vmatprep.subr.bf16.mxu1 %v8446_v2 }
 0x829   :  { %v5830_v51 = vsel %vm5750_vm0, %v5660_v24, %v5790_v44  ;;  %v8447_v24 = vld [vmem:[%s11086_s4 + $0x190] sm:$0xff]   ;;  %7553 = vmatpush3.bf16.msra.mxu1 %v8446_v2 }
 0x82a   :  { %v5831_v41 = vsel %vm5751_vm1, %v5662_v18, %v5791_v48  ;;  %v5898_v43 = vpack.c.bf16 %v5830_v51, %v5828_v39  ;;  %7554 = vmatprep.subr.bf16.mxu1 %v8447_v24 }
 0x82b   :  { %v5899_v47 = vpack.c.bf16 %v5831_v41, %v5829_v62  ;;  %v8448_v41 = vld [vmem:[%s11086_s4 + $0x198] sm:$0xff]  }
 0x82d   :  { %6059 = vmatprep.mubr.bf16.mxu0 %v5899_v47  ;;  %7555 = vmatpush3.bf16.msra.mxu1 %v8447_v24 }
 0x82e   :  { %6060 = vmatmul.mubr.bf16.gmra.mrb[32].mxu0 %v5898_v43  ;;  %7556 = vmatprep.subr.bf16.mxu1 %v8448_v41 }
 0x831   :  { %7557 = vmatpush3.bf16.msra.mxu1 %v8448_v41 }
 0x842   :  { %v5665_v17 = vpop.f32.mrb[116].mxu1 }
 0x843   :  { %v5666_v21 = vadd.f32 %v5665_v17, %v10950_v40  ;;  %v5667_v6 = vpop.f32.mrb[117].mxu1 }
 0x844   :  { %v5668_v25 = vadd.f32 %v5667_v6, %v10953_v57  ;;  %v5669_v16 = vpop.f32.mrb[118].mxu1 }
 0x845   :  { %v5792_v32 = vmul.f32 0.01, %v5666_v21  ;;  %v5670_v38 = vadd.f32 %v5669_v16, %v10950_v40  ;;  %v5671_v3 = vpop.f32.mrb[119].mxu1  ;;  %vm5752_vm2 = vcmp.gt.f32.partialorder %v5666_v21, 0.0 }
 0x846   :  { %v5793_v45 = vmul.f32 0.01, %v5668_v25  ;;  %v5672_v34 = vadd.f32 %v5671_v3, %v10953_v57  ;;  %vm5753_vm3 = vcmp.gt.f32.partialorder %v5668_v25, 0.0 }
 0x847   :  { %vm5754_vm4 = vcmp.gt.f32.partialorder %v5670_v38, 0.0  ;;  %v5794_v0 = vmul.f32 0.01, %v5670_v38  ;;  %v5832_v7 = vsel %vm5752_vm2, %v5666_v21, %v5792_v32 }
 0x848   :  { %vm5755_vm5 = vcmp.gt.f32.partialorder %v5672_v34, 0.0  ;;  %v5795_v61 = vmul.f32 0.01, %v5672_v34  ;;  %v5833_v30 = vsel %vm5753_vm3, %v5668_v25, %v5793_v45  ;;  %v8449_v45 = vld [vmem:[%s11086_s4 + $0x1a0] sm:$0xff]  }
 0x849   :  { %v5834_v4 = vsel %vm5754_vm4, %v5670_v38, %v5794_v0  ;;  %7558 = vmatprep.subr.bf16.mxu1 %v8449_v45 }
 0x84a   :  { %v5835_v33 = vsel %vm5755_vm5, %v5672_v34, %v5795_v61  ;;  %v5900_v35 = vpack.c.bf16 %v5834_v4, %v5832_v7  ;;  %7559 = vmatpush3.bf16.msra.mxu1 %v8449_v45 }
 0x84b   :  { %v5901_v20 = vpack.c.bf16 %v5835_v33, %v5833_v30 }
 0x84d   :  { %6067 = vmatprep.mubr.bf16.mxu0 %v5901_v20 }
 0x84e   :  { %6068 = vmatmul.mubr.bf16.gmra.mrb[36].mxu0 %v5900_v35 }
 0x862   :  { %v5675_v22 = vpop.f32.mrb[120].mxu1 }
 0x863   :  { %v5676_v26 = vadd.f32 %v5675_v22, %v10950_v40  ;;  %v5677_v13 = vpop.f32.mrb[121].mxu1 }
 0x864   :  { %v5678_v9 = vadd.f32 %v5677_v13, %v10953_v57  ;;  %v5679_v8 = vpop.f32.mrb[122].mxu1 }
 0x865   :  { %v5796_v27 = vmul.f32 0.01, %v5676_v26  ;;  %v5680_v46 = vadd.f32 %v5679_v8, %v10950_v40  ;;  %v5681_v1 = vpop.f32.mrb[123].mxu1  ;;  %vm5756_vm6 = vcmp.gt.f32.partialorder %v5676_v26, 0.0 }
 0x866   :  { %v5797_v14 = vmul.f32 0.01, %v5678_v9  ;;  %v5682_v42 = vadd.f32 %v5681_v1, %v10953_v57  ;;  %vm5757_vm7 = vcmp.gt.f32.partialorder %v5678_v9, 0.0 }
 0x867   :  { %vm5758_vm8 = vcmp.gt.f32.partialorder %v5680_v46, 0.0  ;;  %v5798_v15 = vmul.f32 0.01, %v5680_v46  ;;  %v5836_v12 = vsel %vm5756_vm6, %v5676_v26, %v5796_v27 }
 0x868   :  { %vm5759_vm9 = vcmp.gt.f32.partialorder %v5682_v42, 0.0  ;;  %v5799_v19 = vmul.f32 0.01, %v5682_v42  ;;  %v5837_v63 = vsel %vm5757_vm7, %v5678_v9, %v5797_v14 }
 0x869   :  { %v5838_v23 = vsel %vm5758_vm8, %v5680_v46, %v5798_v15 }
 0x86a   :  { %v5685_v31 = vpop.f32.mrb[124].mxu1  ;;  %v5839_v52 = vsel %vm5759_vm9, %v5682_v42, %v5799_v19  ;;  %v5902_v11 = vpack.c.bf16 %v5838_v23, %v5836_v12 }
 0x86b   :  { %v5686_v56 = vadd.f32 %v5685_v31, %v10950_v40  ;;  %v5687_v53 = vpop.f32.mrb[125].mxu1  ;;  %v5903_v37 = vpack.c.bf16 %v5839_v52, %v5837_v63 }
 0x86c   :  { %v5688_v28 = vadd.f32 %v5687_v53, %v10953_v57  ;;  %v5689_v29 = vpop.f32.mrb[126].mxu1 }
 0x86d   :  { %v5800_v36 = vmul.f32 0.01, %v5686_v56  ;;  %v5690_v55 = vadd.f32 %v5689_v29, %v10950_v40  ;;  %v5691_v54 = vpop.f32.mrb[127].mxu1  ;;  %6075 = vmatprep.mubr.bf16.mxu0 %v5903_v37  ;;  %vm5760_vm10 = vcmp.gt.f32.partialorder %v5686_v56, 0.0 }
 0x86e   :  { %v5801_v10 = vmul.f32 0.01, %v5688_v28  ;;  %v5692_v58 = vadd.f32 %v5691_v54, %v10953_v57  ;;  %6076 = vmatmul.mubr.bf16.gmra.mrb[40].mxu0 %v5902_v11  ;;  %vm5761_vm11 = vcmp.gt.f32.partialorder %v5688_v28, 0.0 }
 0x86f   :  { %vm5762_vm12 = vcmp.gt.f32.partialorder %v5690_v55, 0.0  ;;  %v5802_v59 = vmul.f32 0.01, %v5690_v55  ;;  %v5840_v18 = vsel %vm5760_vm10, %v5686_v56, %v5800_v36 }
 0x870   :  { %vm5763_vm13 = vcmp.gt.f32.partialorder %v5692_v58, 0.0  ;;  %v5803_v5 = vmul.f32 0.01, %v5692_v58  ;;  %v5841_v39 = vsel %vm5761_vm11, %v5688_v28, %v5801_v10  ;;  %v8450_v10 = vld [vmem:[%s11086_s4 + $0x1a8] sm:$0xff]  }
 0x871   :  { %v5842_v44 = vsel %vm5762_vm12, %v5690_v55, %v5802_v59  ;;  %7560 = vmatprep.subr.bf16.mxu1 %v8450_v10 }
 0x872   :  { %v5695_v48 = vpop.f32.mrb[128].mxu1  ;;  %v5843_v51 = vsel %vm5763_vm13, %v5692_v58, %v5803_v5  ;;  %v5904_v62 = vpack.c.bf16 %v5842_v44, %v5840_v18  ;;  %7561 = vmatpush3.bf16.msra.mxu1 %v8450_v10 }
 0x873   :  { %v5696_v43 = vadd.f32 %v5695_v48, %v10950_v40  ;;  %v5697_v47 = vpop.f32.mrb[129].mxu1  ;;  %v5905_v17 = vpack.c.bf16 %v5843_v51, %v5841_v39  ;;  %v8451_v39 = vld [vmem:[%s11086_s4 + $0x1b0] sm:$0xff]  }
 0x874   :  { %v5698_v21 = vadd.f32 %v5697_v47, %v10953_v57  ;;  %v5699_v6 = vpop.f32.mrb[130].mxu1  ;;  %7562 = vmatprep.subr.bf16.mxu1 %v8451_v39 }
 0x875   :  { %v5804_v25 = vmul.f32 0.01, %v5696_v43  ;;  %v5700_v16 = vadd.f32 %v5699_v6, %v10950_v40  ;;  %v5701_v32 = vpop.f32.mrb[131].mxu1  ;;  %6083 = vmatprep.mubr.bf16.mxu0 %v5905_v17  ;;  %vm5764_vm14 = vcmp.gt.f32.partialorder %v5696_v43, 0.0  ;;  %v8452_v17 = vld [vmem:[%s11086_s4 + $0x1b8] sm:$0xff]  }
 0x876   :  { %v5805_v38 = vmul.f32 0.01, %v5698_v21  ;;  %v5702_v3 = vadd.f32 %v5701_v32, %v10953_v57  ;;  %6084 = vmatmul.mubr.bf16.gmra.mrb[44].mxu0 %v5904_v62  ;;  %vm5765_vm15 = vcmp.gt.f32.partialorder %v5698_v21, 0.0  ;;  %7563 = vmatpush3.bf16.msra.mxu1 %v8451_v39 }
 0x877   :  { %vm5766_vm0 = vcmp.gt.f32.partialorder %v5700_v16, 0.0  ;;  %v5806_v34 = vmul.f32 0.01, %v5700_v16  ;;  %v5844_v61 = vsel %vm5764_vm14, %v5696_v43, %v5804_v25  ;;  %7564 = vmatprep.subr.bf16.mxu1 %v8452_v17 }
 0x878   :  { %vm5767_vm1 = vcmp.gt.f32.partialorder %v5702_v3, 0.0  ;;  %v5807_v0 = vmul.f32 0.01, %v5702_v3  ;;  %v5845_v30 = vsel %vm5765_vm15, %v5698_v21, %v5805_v38 }
 0x879   :  { %v5846_v7 = vsel %vm5766_vm0, %v5700_v16, %v5806_v34 }
 0x87a   :  { %v5705_v4 = vpop.f32.mrb[132].mxu1  ;;  %v5847_v33 = vsel %vm5767_vm1, %v5702_v3, %v5807_v0  ;;  %v5906_v35 = vpack.c.bf16 %v5846_v7, %v5844_v61  ;;  %7565 = vmatpush3.bf16.msra.mxu1 %v8452_v17 }
 0x87b   :  { %v5706_v20 = vadd.f32 %v5705_v4, %v10950_v40  ;;  %v5707_v22 = vpop.f32.mrb[133].mxu1  ;;  %v5907_v26 = vpack.c.bf16 %v5847_v33, %v5845_v30 }
 0x87c   :  { %v5708_v13 = vadd.f32 %v5707_v22, %v10953_v57  ;;  %v5709_v9 = vpop.f32.mrb[134].mxu1 }
 0x87d   :  { %v5808_v8 = vmul.f32 0.01, %v5706_v20  ;;  %v5710_v27 = vadd.f32 %v5709_v9, %v10950_v40  ;;  %v5711_v46 = vpop.f32.mrb[135].mxu1  ;;  %6091 = vmatprep.mubr.bf16.mxu0 %v5907_v26  ;;  %vm5768_vm2 = vcmp.gt.f32.partialorder %v5706_v20, 0.0 }
 0x87e   :  { %v5809_v1 = vmul.f32 0.01, %v5708_v13  ;;  %v5712_v14 = vadd.f32 %v5711_v46, %v10953_v57  ;;  %6092 = vmatmul.mubr.bf16.gmra.mrb[48].mxu0 %v5906_v35  ;;  %vm5769_vm3 = vcmp.gt.f32.partialorder %v5708_v13, 0.0 }
 0x87f   :  { %vm5770_vm4 = vcmp.gt.f32.partialorder %v5710_v27, 0.0  ;;  %v5810_v42 = vmul.f32 0.01, %v5710_v27  ;;  %v5848_v19 = vsel %vm5768_vm2, %v5706_v20, %v5808_v8 }
 0x880   :  { %vm5771_vm5 = vcmp.gt.f32.partialorder %v5712_v14, 0.0  ;;  %v5811_v15 = vmul.f32 0.01, %v5712_v14  ;;  %v5849_v60 = vsel %vm5769_vm3, %v5708_v13, %v5809_v1 }
 0x881   :  { %v5850_v12 = vsel %vm5770_vm4, %v5710_v27, %v5810_v42 }
 0x882   :  { %v5715_v23 = vpop.f32.mrb[136].mxu1  ;;  %v5851_v31 = vsel %vm5771_vm5, %v5712_v14, %v5811_v15  ;;  %v5908_v63 = vpack.c.bf16 %v5850_v12, %v5848_v19 }
 0x883   :  { %v5716_v52 = vadd.f32 %v5715_v23, %v10950_v40  ;;  %v5717_v11 = vpop.f32.mrb[137].mxu1  ;;  %v5909_v56 = vpack.c.bf16 %v5851_v31, %v5849_v60  ;;  %v11022_v60 = vld [vmem:[%s11083_s6 + $0x2d] ss:$0 sm:$0xff] }
 0x884   :  { %v5718_v53 = vadd.f32 %v5717_v11, %v10953_v57  ;;  %v5719_v37 = vpop.f32.mrb[138].mxu1 }
 0x885   :  { %v5812_v28 = vmul.f32 0.01, %v5716_v52  ;;  %v5720_v29 = vadd.f32 %v5719_v37, %v10950_v40  ;;  %v5721_v36 = vpop.f32.mrb[139].mxu1  ;;  %6099 = vmatprep.mubr.bf16.mxu0 %v5909_v56  ;;  %vm5772_vm6 = vcmp.gt.f32.partialorder %v5716_v52, 0.0 }
 0x886   :  { %v5813_v55 = vmul.f32 0.01, %v5718_v53  ;;  %v5722_v54 = vadd.f32 %v5721_v36, %v10953_v57  ;;  %6100 = vmatmul.mubr.bf16.gmra.mrb[52].mxu0 %v5908_v63  ;;  %vm5773_vm7 = vcmp.gt.f32.partialorder %v5718_v53, 0.0 }
 0x887   :  { %vm5774_vm8 = vcmp.gt.f32.partialorder %v5720_v29, 0.0  ;;  %v5814_v58 = vmul.f32 0.01, %v5720_v29  ;;  %v5852_v24 = vsel %vm5772_vm6, %v5716_v52, %v5812_v28 }
 0x888   :  { %vm5775_vm9 = vcmp.gt.f32.partialorder %v5722_v54, 0.0  ;;  %v5815_v2 = vmul.f32 0.01, %v5722_v54  ;;  %v5853_v18 = vsel %vm5773_vm7, %v5718_v53, %v5813_v55 }
 0x889   :  { %v5854_v59 = vsel %vm5774_vm8, %v5720_v29, %v5814_v58 }
 0x88a   :  { %v5725_v5 = vpop.f32.mrb[140].mxu1  ;;  %v5855_v44 = vsel %vm5775_vm9, %v5722_v54, %v5815_v2  ;;  %v5910_v48 = vpack.c.bf16 %v5854_v59, %v5852_v24 }
 0x88b   :  { %v5726_v51 = vadd.f32 %v5725_v5, %v10950_v40  ;;  %v5727_v62 = vpop.f32.mrb[141].mxu1  ;;  %v5911_v41 = vpack.c.bf16 %v5855_v44, %v5853_v18 }
 0x88c   :  { %v5728_v43 = vadd.f32 %v5727_v62, %v10953_v57  ;;  %v5729_v47 = vpop.f32.mrb[142].mxu1 }
 0x88d   :  { %v5816_v21 = vmul.f32 0.01, %v5726_v51  ;;  %v5730_v6 = vadd.f32 %v5729_v47, %v10950_v40  ;;  %v5731_v25 = vpop.f32.mrb[143].mxu1  ;;  %6107 = vmatprep.mubr.bf16.mxu0 %v5911_v41  ;;  %vm5776_vm10 = vcmp.gt.f32.partialorder %v5726_v51, 0.0 }
 0x88e   :  { %v5817_v16 = vmul.f32 0.01, %v5728_v43  ;;  %v5732_v32 = vadd.f32 %v5731_v25, %v10953_v57  ;;  %6108 = vmatmul.mubr.bf16.gmra.mrb[56].mxu0 %v5910_v48  ;;  %vm5777_vm11 = vcmp.gt.f32.partialorder %v5728_v43, 0.0 }
 0x88f   :  { %vm5778_vm12 = vcmp.gt.f32.partialorder %v5730_v6, 0.0  ;;  %v5818_v38 = vmul.f32 0.01, %v5730_v6  ;;  %v5856_v45 = vsel %vm5776_vm10, %v5726_v51, %v5816_v21 }
 0x890   :  { %vm5779_vm13 = vcmp.gt.f32.partialorder %v5732_v32, 0.0  ;;  %v5819_v3 = vmul.f32 0.01, %v5732_v32  ;;  %v5857_v61 = vsel %vm5777_vm11, %v5728_v43, %v5817_v16 }
 0x891   :  { %v5858_v34 = vsel %vm5778_vm12, %v5730_v6, %v5818_v38 }
 0x892   :  { %v5735_v0 = vpop.f32.mrb[144].mxu1  ;;  %v5859_v7 = vsel %vm5779_vm13, %v5732_v32, %v5819_v3  ;;  %v5912_v4 = vpack.c.bf16 %v5858_v34, %v5856_v45 }
 0x893   :  { %v5736_v30 = vadd.f32 %v5735_v0, %v10950_v40  ;;  %v5737_v33 = vpop.f32.mrb[145].mxu1  ;;  %v5913_v35 = vpack.c.bf16 %v5859_v7, %v5857_v61 }
 0x894   :  { %v5738_v20 = vadd.f32 %v5737_v33, %v10953_v57  ;;  %v5739_v22 = vpop.f32.mrb[146].mxu1 }
 0x895   :  { %v5820_v26 = vmul.f32 0.01, %v5736_v30  ;;  %v5740_v13 = vadd.f32 %v5739_v22, %v10950_v40  ;;  %v5741_v9 = vpop.f32.mrb[147].mxu1  ;;  %6115 = vmatprep.mubr.bf16.mxu0 %v5913_v35  ;;  %vm5780_vm14 = vcmp.gt.f32.partialorder %v5736_v30, 0.0 }
 0x896   :  { %v5821_v8 = vmul.f32 0.01, %v5738_v20  ;;  %v5742_v27 = vadd.f32 %v5741_v9, %v10953_v57  ;;  %6116 = vmatmul.mubr.bf16.gmra.mrb[60].mxu0 %v5912_v4  ;;  %vm5781_vm15 = vcmp.gt.f32.partialorder %v5738_v20, 0.0 }
 0x897   :  { %vm5782_vm0 = vcmp.gt.f32.partialorder %v5740_v13, 0.0  ;;  %v5822_v46 = vmul.f32 0.01, %v5740_v13  ;;  %v5860_v14 = vsel %vm5780_vm14, %v5736_v30, %v5820_v26 }
 0x898   :  { %vm5783_vm1 = vcmp.gt.f32.partialorder %v5742_v27, 0.0  ;;  %v5823_v1 = vmul.f32 0.01, %v5742_v27  ;;  %v5861_v15 = vsel %vm5781_vm15, %v5738_v20, %v5821_v8 }
 0x899   :  { %v5862_v42 = vsel %vm5782_vm0, %v5740_v13, %v5822_v46 }
 0x89a   :  { %v5863_v19 = vsel %vm5783_vm1, %v5742_v27, %v5823_v1  ;;  %v5914_v12 = vpack.c.bf16 %v5862_v42, %v5860_v14 }
 0x89b   :  { %v5915_v23 = vpack.c.bf16 %v5863_v19, %v5861_v15 }
 0x89d   :  { %6123 = vmatprep.mubr.bf16.mxu0 %v5915_v23 }
 0x89e   :  { %6124 = vmatmul.mubr.bf16.gmra.mrb[64].mxu0 %v5914_v12 }
 0x8e1   :  { %v7466_v40 = vpop.f32.mrb[28].mxu0 }
 0x8e2   :  { %v7467_v57 = vpop.f32.mrb[29].mxu0 }
 0x8e3   :  { %v7468_v31 = vadd.f32 %v7467_v57, %v7466_v40  ;;  %v7469_v63 = vpop.f32.mrb[30].mxu0 }
 0x8e4   :  { %v7470_v52 = vpop.f32.mrb[31].mxu0 }
 0x8e5   :  { %v6054_v11 = vadd.f32 %v7468_v31, %v11022_v60  ;;  %v7471_v56 = vadd.f32 %v7470_v52, %v7469_v63 }
 0x8e7   :  { %v6152_v53 = vmul.f32 0.01, %v6054_v11  ;;  %v6057_v37 = vadd.f32 %v7471_v56, %v11022_v60  ;;  %vm6132_vm2 = vcmp.gt.f32.partialorder %v6054_v11, 0.0 }
 0x8e9   :  { %vm6133_vm3 = vcmp.gt.f32.partialorder %v6057_v37, 0.0  ;;  %v6153_v28 = vmul.f32 0.01, %v6057_v37  ;;  %v6172_v29 = vsel %vm6132_vm2, %v6054_v11, %v6152_v53 }
 0x8eb   :  { %v6173_v36 = vsel %vm6133_vm3, %v6057_v37, %v6153_v28 }
 0x8ec   :  { %v6208_v55 = vpack.c.bf16 %v6173_v36, %v6172_v29 }
 0x8ee   :  { %7566 = vmatprep.mubr.bf16.mxu1 %v6208_v55 }
 0x901   :  { %v7472_v54 = vpop.f32.mrb[32].mxu0 }
 0x902   :  { %v7473_v10 = vpop.f32.mrb[33].mxu0 }
 0x903   :  { %v7474_v58 = vadd.f32 %v7473_v10, %v7472_v54  ;;  %v7475_v2 = vpop.f32.mrb[34].mxu0 }
 0x904   :  { %v7476_v24 = vpop.f32.mrb[35].mxu0 }
 0x905   :  { %v6062_v59 = vadd.f32 %v7474_v58, %v11022_v60  ;;  %v7477_v5 = vadd.f32 %v7476_v24, %v7475_v2 }
 0x907   :  { %v6154_v18 = vmul.f32 0.01, %v6062_v59  ;;  %v6065_v44 = vadd.f32 %v7477_v5, %v11022_v60  ;;  %vm6134_vm4 = vcmp.gt.f32.partialorder %v6062_v59, 0.0 }
 0x909   :  { %vm6135_vm5 = vcmp.gt.f32.partialorder %v6065_v44, 0.0  ;;  %v6155_v48 = vmul.f32 0.01, %v6065_v44  ;;  %v6174_v39 = vsel %vm6134_vm4, %v6062_v59, %v6154_v18 }
 0x90b   :  { %v6175_v51 = vsel %vm6135_vm5, %v6065_v44, %v6155_v48 }
 0x90c   :  { %v6209_v62 = vpack.c.bf16 %v6175_v51, %v6174_v39 }
 0x90e   :  { %7567 = vmatmul.mubr.bf16.vlgmr.msra.gmra.mrb[148].mxu1 %v6209_v62 }
 0x921   :  { %v7478_v41 = vpop.f32.mrb[36].mxu0 }
 0x922   :  { %v7479_v43 = vpop.f32.mrb[37].mxu0 }
 0x923   :  { %v7480_v47 = vadd.f32 %v7479_v43, %v7478_v41  ;;  %v7481_v17 = vpop.f32.mrb[38].mxu0 }
 0x924   :  { %v7482_v21 = vpop.f32.mrb[39].mxu0 }
 0x925   :  { %v6070_v6 = vadd.f32 %v7480_v47, %v11022_v60  ;;  %v7483_v25 = vadd.f32 %v7482_v21, %v7481_v17 }
 0x927   :  { %v6156_v16 = vmul.f32 0.01, %v6070_v6  ;;  %v6073_v32 = vadd.f32 %v7483_v25, %v11022_v60  ;;  %vm6136_vm6 = vcmp.gt.f32.partialorder %v6070_v6, 0.0 }
 0x929   :  { %vm6137_vm7 = vcmp.gt.f32.partialorder %v6073_v32, 0.0  ;;  %v6157_v38 = vmul.f32 0.01, %v6073_v32  ;;  %v6176_v3 = vsel %vm6136_vm6, %v6070_v6, %v6156_v16 }
 0x92b   :  { %v6177_v45 = vsel %vm6137_vm7, %v6073_v32, %v6157_v38 }
 0x92c   :  { %v6210_v34 = vpack.c.bf16 %v6177_v45, %v6176_v3 }
 0x92e   :  { %7570 = vmatprep.mubr.bf16.mxu1 %v6210_v34 }
 0x941   :  { %v7484_v0 = vpop.f32.mrb[40].mxu0 }
 0x942   :  { %v7485_v61 = vpop.f32.mrb[41].mxu0 }
 0x943   :  { %v7486_v7 = vadd.f32 %v7485_v61, %v7484_v0  ;;  %v7487_v4 = vpop.f32.mrb[42].mxu0 }
 0x944   :  { %v7488_v30 = vpop.f32.mrb[43].mxu0 }
 0x945   :  { %v6078_v33 = vadd.f32 %v7486_v7, %v11022_v60  ;;  %v7489_v35 = vadd.f32 %v7488_v30, %v7487_v4 }
 0x947   :  { %v6158_v20 = vmul.f32 0.01, %v6078_v33  ;;  %v6081_v22 = vadd.f32 %v7489_v35, %v11022_v60  ;;  %vm6138_vm8 = vcmp.gt.f32.partialorder %v6078_v33, 0.0 }
 0x949   :  { %vm6139_vm9 = vcmp.gt.f32.partialorder %v6081_v22, 0.0  ;;  %v6159_v26 = vmul.f32 0.01, %v6081_v22  ;;  %v7490_v13 = vpop.f32.mrb[44].mxu0  ;;  %v6178_v46 = vsel %vm6138_vm8, %v6078_v33, %v6158_v20 }
 0x94a   :  { %v7491_v9 = vpop.f32.mrb[45].mxu0 }
 0x94b   :  { %v7492_v8 = vadd.f32 %v7491_v9, %v7490_v13  ;;  %v7493_v27 = vpop.f32.mrb[46].mxu0  ;;  %v6179_v1 = vsel %vm6139_vm9, %v6081_v22, %v6159_v26 }
 0x94c   :  { %v7494_v14 = vpop.f32.mrb[47].mxu0  ;;  %v6211_v42 = vpack.c.bf16 %v6179_v1, %v6178_v46 }
 0x94d   :  { %v6086_v15 = vadd.f32 %v7492_v8, %v11022_v60  ;;  %v7495_v19 = vadd.f32 %v7494_v14, %v7493_v27 }
 0x94e   :  { %7571 = vmatmul.mubr.bf16.gmra.mrb[152].mxu1 %v6211_v42 }
 0x94f   :  { %v6160_v12 = vmul.f32 0.01, %v6086_v15  ;;  %v6089_v23 = vadd.f32 %v7495_v19, %v11022_v60  ;;  %vm6140_vm10 = vcmp.gt.f32.partialorder %v6086_v15, 0.0 }
 0x951   :  { %vm6141_vm11 = vcmp.gt.f32.partialorder %v6089_v23, 0.0  ;;  %v6161_v40 = vmul.f32 0.01, %v6089_v23  ;;  %v7496_v57 = vpop.f32.mrb[48].mxu0  ;;  %v6180_v11 = vsel %vm6140_vm10, %v6086_v15, %v6160_v12 }
 0x952   :  { %v7497_v31 = vpop.f32.mrb[49].mxu0 }
 0x953   :  { %v7498_v63 = vadd.f32 %v7497_v31, %v7496_v57  ;;  %v7499_v52 = vpop.f32.mrb[50].mxu0  ;;  %v6181_v56 = vsel %vm6141_vm11, %v6089_v23, %v6161_v40 }
 0x954   :  { %v7500_v53 = vpop.f32.mrb[51].mxu0  ;;  %v6212_v37 = vpack.c.bf16 %v6181_v56, %v6180_v11 }
 0x955   :  { %v6094_v28 = vadd.f32 %v7498_v63, %v11022_v60  ;;  %v7501_v29 = vadd.f32 %v7500_v53, %v7499_v52 }
 0x956   :  { %7574 = vmatprep.mubr.bf16.mxu1 %v6212_v37 }
 0x957   :  { %v6162_v36 = vmul.f32 0.01, %v6094_v28  ;;  %v6097_v55 = vadd.f32 %v7501_v29, %v11022_v60  ;;  %vm6142_vm12 = vcmp.gt.f32.partialorder %v6094_v28, 0.0 }
 0x959   :  { %vm6143_vm13 = vcmp.gt.f32.partialorder %v6097_v55, 0.0  ;;  %v6163_v54 = vmul.f32 0.01, %v6097_v55  ;;  %v7502_v10 = vpop.f32.mrb[52].mxu0  ;;  %v6182_v59 = vsel %vm6142_vm12, %v6094_v28, %v6162_v36 }
 0x95a   :  { %v7503_v58 = vpop.f32.mrb[53].mxu0 }
 0x95b   :  { %v7504_v2 = vadd.f32 %v7503_v58, %v7502_v10  ;;  %v7505_v24 = vpop.f32.mrb[54].mxu0  ;;  %v6183_v5 = vsel %vm6143_vm13, %v6097_v55, %v6163_v54 }
 0x95c   :  { %v7506_v18 = vpop.f32.mrb[55].mxu0  ;;  %v6213_v44 = vpack.c.bf16 %v6183_v5, %v6182_v59 }
 0x95d   :  { %v6102_v48 = vadd.f32 %v7504_v2, %v11022_v60  ;;  %v7507_v39 = vadd.f32 %v7506_v18, %v7505_v24 }
 0x95e   :  { %7575 = vmatmul.mubr.bf16.gmra.mrb[156].mxu1 %v6213_v44 }
 0x95f   :  { %v6164_v51 = vmul.f32 0.01, %v6102_v48  ;;  %v6105_v62 = vadd.f32 %v7507_v39, %v11022_v60  ;;  %vm6144_vm14 = vcmp.gt.f32.partialorder %v6102_v48, 0.0 }
 0x961   :  { %vm6145_vm15 = vcmp.gt.f32.partialorder %v6105_v62, 0.0  ;;  %v6165_v41 = vmul.f32 0.01, %v6105_v62  ;;  %v7508_v43 = vpop.f32.mrb[56].mxu0  ;;  %v6184_v6 = vsel %vm6144_vm14, %v6102_v48, %v6164_v51 }
 0x962   :  { %v7509_v47 = vpop.f32.mrb[57].mxu0 }
 0x963   :  { %v7510_v17 = vadd.f32 %v7509_v47, %v7508_v43  ;;  %v7511_v21 = vpop.f32.mrb[58].mxu0  ;;  %v6185_v25 = vsel %vm6145_vm15, %v6105_v62, %v6165_v41 }
 0x964   :  { %v7512_v16 = vpop.f32.mrb[59].mxu0  ;;  %v6214_v32 = vpack.c.bf16 %v6185_v25, %v6184_v6 }
 0x965   :  { %v6110_v38 = vadd.f32 %v7510_v17, %v11022_v60  ;;  %v7513_v3 = vadd.f32 %v7512_v16, %v7511_v21 }
 0x966   :  { %7578 = vmatprep.mubr.bf16.mxu1 %v6214_v32 }
 0x967   :  { %v6166_v45 = vmul.f32 0.01, %v6110_v38  ;;  %v6113_v34 = vadd.f32 %v7513_v3, %v11022_v60  ;;  %vm6146_vm0 = vcmp.gt.f32.partialorder %v6110_v38, 0.0 }
 0x969   :  { %vm6147_vm1 = vcmp.gt.f32.partialorder %v6113_v34, 0.0  ;;  %v6167_v0 = vmul.f32 0.01, %v6113_v34  ;;  %v7514_v61 = vpop.f32.mrb[60].mxu0  ;;  %v6186_v33 = vsel %vm6146_vm0, %v6110_v38, %v6166_v45 }
 0x96a   :  { %v7515_v7 = vpop.f32.mrb[61].mxu0 }
 0x96b   :  { %v7516_v4 = vadd.f32 %v7515_v7, %v7514_v61  ;;  %v7517_v30 = vpop.f32.mrb[62].mxu0  ;;  %v6187_v35 = vsel %vm6147_vm1, %v6113_v34, %v6167_v0 }
 0x96c   :  { %v7518_v20 = vpop.f32.mrb[63].mxu0  ;;  %v6215_v22 = vpack.c.bf16 %v6187_v35, %v6186_v33 }
 0x96d   :  { %v6118_v26 = vadd.f32 %v7516_v4, %v11022_v60  ;;  %v7519_v13 = vadd.f32 %v7518_v20, %v7517_v30 }
 0x96e   :  { %7579 = vmatmul.mubr.bf16.gmra.mrb[160].mxu1 %v6215_v22 }
 0x96f   :  { %v6168_v9 = vmul.f32 0.01, %v6118_v26  ;;  %v6121_v8 = vadd.f32 %v7519_v13, %v11022_v60  ;;  %vm6148_vm2 = vcmp.gt.f32.partialorder %v6118_v26, 0.0 }
 0x971   :  { %vm6149_vm3 = vcmp.gt.f32.partialorder %v6121_v8, 0.0  ;;  %v6169_v27 = vmul.f32 0.01, %v6121_v8  ;;  %v7520_v46 = vpop.f32.mrb[64].mxu0  ;;  %v6188_v15 = vsel %vm6148_vm2, %v6118_v26, %v6168_v9 }
 0x972   :  { %v7521_v1 = vpop.f32.mrb[65].mxu0 }
 0x973   :  { %v7522_v14 = vadd.f32 %v7521_v1, %v7520_v46  ;;  %v7523_v42 = vpop.f32.mrb[66].mxu0  ;;  %v6189_v19 = vsel %vm6149_vm3, %v6121_v8, %v6169_v27 }
 0x974   :  { %v7524_v12 = vpop.f32.mrb[67].mxu0  ;;  %v6216_v23 = vpack.c.bf16 %v6189_v19, %v6188_v15 }
 0x975   :  { %v6126_v40 = vadd.f32 %v7522_v14, %v11022_v60  ;;  %v7525_v57 = vadd.f32 %v7524_v12, %v7523_v42 }
 0x976   :  { %7582 = vmatprep.mubr.bf16.mxu1 %v6216_v23 }
 0x977   :  { %v6170_v31 = vmul.f32 0.01, %v6126_v40  ;;  %v6129_v63 = vadd.f32 %v7525_v57, %v11022_v60  ;;  %vm6150_vm4 = vcmp.gt.f32.partialorder %v6126_v40, 0.0 }
 0x979   :  { %vm6151_vm5 = vcmp.gt.f32.partialorder %v6129_v63, 0.0  ;;  %v6171_v52 = vmul.f32 0.01, %v6129_v63  ;;  %v6190_v11 = vsel %vm6150_vm4, %v6126_v40, %v6170_v31 }
 0x97b   :  { %v6191_v56 = vsel %vm6151_vm5, %v6129_v63, %v6171_v52 }
 0x97c   :  { %v6217_v53 = vpack.c.bf16 %v6191_v56, %v6190_v11 }
 0x97e   :  { %7583 = vmatmul.mubr.bf16.gmra.mrb[164].mxu1 %v6217_v53 }
 0x9e1   :  { %v7568_v37 = vpop.f32.mrb[148].mxu1 }
 0x9e2   :  { %v6309_v28 = vadd.f32 -0.079873525, %v7568_v37  ;;  %v6300_v29 = vpop.f32.mrb[149].mxu1 }
 0x9e3   :  { %v6301_v36 = vadd.f32 -0.079873525, %v6300_v29  ;;  %v7569_v55 = vpop.f32.mrb[150].mxu1 }
 0x9e4   :  { %v6381_v54 = vmul.f32 0.5, %v6309_v28  ;;  %v6312_v10 = vadd.f32 -0.079873525, %v7569_v55  ;;  %v6303_v58 = vpop.f32.mrb[151].mxu1 }
 0x9e5   :  { %v6379_v2 = vmul.f32 0.5, %v6301_v36  ;;  %v6304_v24 = vadd.f32 -0.079873525, %v6303_v58 }
 0x9e6   :  { %8462 = vtanh.f32 %v6381_v54  ;;  %v6382_v59 = vmul.f32 0.5, %v6312_v10 }
 0x9e7   :  { %8464 = vtanh.f32 %v6379_v2  ;;  %v6380_v60 = vmul.f32 0.5, %v6304_v24 }
 0x9e8   :  { %8466 = vtanh.f32 %v6382_v59 }
 0x9e9   :  { %8468 = vtanh.f32 %v6380_v60 }
 0x9f0   :  { %v8463_v5 = vpop.eup %8462 }
 0x9f1   :  { %v8465_v18 = vpop.eup %8464  ;;  %v6421_v44 = vadd.f32 1.0, %v8463_v5 }
 0x9f2   :  { %v8467_v48 = vpop.eup %8466  ;;  %v6419_v39 = vadd.f32 1.0, %v8465_v18 }
 0x9f3   :  { %v8469_v51 = vpop.eup %8468  ;;  %v6422_v62 = vadd.f32 1.0, %v8467_v48  ;;  %v6441_v41 = vmul.f32 0.5, %v6421_v44 }
 0x9f4   :  { %v6420_v43 = vadd.f32 1.0, %v8469_v51  ;;  %v6439_v47 = vmul.f32 0.5, %v6419_v39 }
 0x9f5   :  { %6546 = vperm.xlu1 %7622, %v6441_v41   ;;  %v6442_v17 = vmul.f32 0.5, %v6422_v62 }
 0x9f6   :  { %6536 = vperm.xlu0 %7623, %v6439_v47   ;;  %v6440_v21 = vmul.f32 0.5, %v6420_v43 }
 0x9f9   :  { %6551 = vperm.xlu1 %7622, %v6442_v17  }
 0x9fa   :  { %6541 = vperm.xlu0 %7623, %v6440_v21  }
 0xa21   :  { %v7572_v6 = vpop.f32.mrb[152].mxu1 }
 0xa22   :  { %v6325_v25 = vadd.f32 -0.079873525, %v7572_v6  ;;  %v6316_v16 = vpop.f32.mrb[153].mxu1 }
 0xa23   :  { %v6317_v32 = vadd.f32 -0.079873525, %v6316_v16  ;;  %v7573_v38 = vpop.f32.mrb[154].mxu1 }
 0xa24   :  { %v6385_v3 = vmul.f32 0.5, %v6325_v25  ;;  %v6328_v45 = vadd.f32 -0.079873525, %v7573_v38  ;;  %v6319_v34 = vpop.f32.mrb[155].mxu1 }
 0xa25   :  { %v6383_v0 = vmul.f32 0.5, %v6317_v32  ;;  %v6320_v61 = vadd.f32 -0.079873525, %v6319_v34 }
 0xa26   :  { %8470 = vtanh.f32 %v6385_v3  ;;  %v6386_v7 = vmul.f32 0.5, %v6328_v45 }
 0xa27   :  { %8472 = vtanh.f32 %v6383_v0  ;;  %v6384_v4 = vmul.f32 0.5, %v6320_v61 }
 0xa28   :  { %8474 = vtanh.f32 %v6386_v7 }
 0xa29   :  { %8476 = vtanh.f32 %v6384_v4 }
 0xa30   :  { %v8471_v30 = vpop.eup %8470 }
 0xa31   :  { %v8473_v33 = vpop.eup %8472  ;;  %v6425_v35 = vadd.f32 1.0, %v8471_v30  ;;  %v7576_v20 = vpop.f32.mrb[156].mxu1 }
 0xa32   :  { %v8475_v22 = vpop.eup %8474  ;;  %v6341_v26 = vadd.f32 -0.079873525, %v7576_v20  ;;  %v6332_v13 = vpop.f32.mrb[157].mxu1  ;;  %v6423_v8 = vadd.f32 1.0, %v8473_v33 }
 0xa33   :  { %v8477_v9 = vpop.eup %8476  ;;  %v6426_v27 = vadd.f32 1.0, %v8475_v22  ;;  %v6333_v46 = vadd.f32 -0.079873525, %v6332_v13  ;;  %v7577_v1 = vpop.f32.mrb[158].mxu1  ;;  %v6445_v14 = vmul.f32 0.5, %v6425_v35 }
 0xa34   :  { %v6389_v42 = vmul.f32 0.5, %v6341_v26  ;;  %v6344_v15 = vadd.f32 -0.079873525, %v7577_v1  ;;  %v6335_v19 = vpop.f32.mrb[159].mxu1  ;;  %v6424_v12 = vadd.f32 1.0, %v8477_v9  ;;  %v6443_v52 = vmul.f32 0.5, %v6423_v8 }
 0xa35   :  { %v6387_v23 = vmul.f32 0.5, %v6333_v46  ;;  %v6336_v40 = vadd.f32 -0.079873525, %v6335_v19  ;;  %6566 = vperm.xlu0 %7623, %v6445_v14   ;;  %v6446_v57 = vmul.f32 0.5, %v6426_v27 }
 0xa36   :  { %8478 = vtanh.f32 %v6389_v42  ;;  %v6390_v31 = vmul.f32 0.5, %v6344_v15  ;;  %v6444_v11 = vmul.f32 0.5, %v6424_v12 }
 0xa37   :  { %8480 = vtanh.f32 %v6387_v23  ;;  %v6388_v63 = vmul.f32 0.5, %v6336_v40  ;;  %6571 = vperm.xlu1 %7622, %v6446_v57  }
 0xa38   :  { %8482 = vtanh.f32 %v6390_v31 }
 0xa39   :  { %8484 = vtanh.f32 %v6388_v63  ;;  %6556 = vperm.xlu0 %7623, %v6443_v52   ;;  %v8505_v52 = vmov 1966171168  }
 0xa3b   :  { %6561 = vperm.xlu1 %7622, %v6444_v11   ;;  %v6465_v11 = vunpack.c.l.s4 %v8505_v52 }
 0xa40   :  { %v8479_v56 = vpop.eup %8478 }
 0xa41   :  { %v8481_v53 = vpop.eup %8480  ;;  %v6429_v37 = vadd.f32 1.0, %v8479_v56  ;;  %v7580_v28 = vpop.f32.mrb[160].mxu1 }
 0xa42   :  { %v8483_v29 = vpop.eup %8482  ;;  %v6357_v36 = vadd.f32 -0.079873525, %v7580_v28  ;;  %v6348_v55 = vpop.f32.mrb[161].mxu1  ;;  %v6427_v10 = vadd.f32 1.0, %v8481_v53  ;;  %v6466_v53 = vunpack.c.0.s8 %v6465_v11 }
 0xa43   :  { %v8485_v54 = vpop.eup %8484  ;;  %v6430_v58 = vadd.f32 1.0, %v8483_v29  ;;  %v6349_v2 = vadd.f32 -0.079873525, %v6348_v55  ;;  %v7581_v24 = vpop.f32.mrb[162].mxu1  ;;  %v6449_v59 = vmul.f32 0.5, %v6429_v37  ;;  %v6459_v29 = vld [vmem:[%s11087_s5] sm:$0xff] }
 0xa44   :  { %v6393_v60 = vmul.f32 0.5, %v6357_v36  ;;  %v6360_v5 = vadd.f32 -0.079873525, %v7581_v24  ;;  %v6351_v18 = vpop.f32.mrb[163].mxu1  ;;  %v6428_v44 = vadd.f32 1.0, %v8485_v54  ;;  %v6447_v43 = vmul.f32 0.5, %v6427_v10 }
 0xa45   :  { %v6391_v48 = vmul.f32 0.5, %v6349_v2  ;;  %v6352_v39 = vadd.f32 -0.079873525, %v6351_v18  ;;  %6586 = vperm.xlu0 %7623, %v6449_v59   ;;  %v6450_v51 = vmul.f32 0.5, %v6430_v58  ;;  %v11045_v28 = vsub.s32 %v6466_v53, %v8699_v49 }
 0xa46   :  { %8486 = vtanh.f32 %v6393_v60  ;;  %v6394_v62 = vmul.f32 0.5, %v6360_v5  ;;  %v6448_v47 = vmul.f32 0.5, %v6428_v44  ;;  %v6463_v18 = vcombine.high %v6459_v29, %v6459_v29 }
 0xa47   :  { %8488 = vtanh.f32 %v6391_v48  ;;  %v6392_v41 = vmul.f32 0.5, %v6352_v39  ;;  %6591 = vperm.xlu1 %7622, %v6450_v51   ;;  %v6470_v54 = vrot.slane %v6459_v29, %v11045_v28 }
 0xa48   :  { %8490 = vtanh.f32 %v6394_v62  ;;  %v6477_v51 = vrot.slane %v6463_v18, %v11045_v28 }
 0xa49   :  { %8492 = vtanh.f32 %v6392_v41  ;;  %6576 = vperm.xlu0 %7623, %v6447_v43   ;;  %v6478_v2 = vcombine.high %v6470_v54, %v6470_v54  ;;  %v6486_v60 = vrot.slane %v6470_v54, %v11045_v28 }
 0xa4b   :  { %6581 = vperm.xlu1 %7622, %v6448_v47   ;;  %v6500_v59 = vrot.slane %v6478_v2, %v11045_v28  ;;  %v6508_v49 = vcombine.high %v6486_v60, %v6486_v60  ;;  %v6637_v39 = vrot.slane %v6486_v60, %v8702_v50 }
 0xa4d   :  { %v6641_v48 = vrot.slane %v6500_v59, %v8702_v50  ;;  %v6645_v41 = vrot.slane %v6508_v49, %v8702_v50 }
 0xa50   :  { %v8487_v17 = vpop.eup %8486 }
 0xa51   :  { %v8489_v21 = vpop.eup %8488  ;;  %v6433_v6 = vadd.f32 1.0, %v8487_v17  ;;  %v7584_v25 = vpop.f32.mrb[164].mxu1  ;;  %v6510_v17 = vcombine.high %v6500_v59, %v6500_v59 }
 0xa52   :  { %v8491_v16 = vpop.eup %8490  ;;  %v6373_v32 = vadd.f32 -0.079873525, %v7584_v25  ;;  %v6364_v38 = vpop.f32.mrb[165].mxu1  ;;  %v6431_v45 = vadd.f32 1.0, %v8489_v21  ;;  %v6493_v21 = vrot.slane %v6477_v51, %v11045_v28 }
 0xa53   :  { %v8493_v3 = vpop.eup %8492  ;;  %v6434_v34 = vadd.f32 1.0, %v8491_v16  ;;  %v6365_v0 = vadd.f32 -0.079873525, %v6364_v38  ;;  %v7585_v61 = vpop.f32.mrb[166].mxu1  ;;  %v6453_v7 = vmul.f32 0.5, %v6433_v6  ;;  %v6479_v6 = vcombine.high %v6477_v51, %v6477_v51 }
 0xa54   :  { %v6397_v4 = vmul.f32 0.5, %v6373_v32  ;;  %v6376_v30 = vadd.f32 -0.079873525, %v7585_v61  ;;  %v6367_v33 = vpop.f32.mrb[167].mxu1  ;;  %v6432_v35 = vadd.f32 1.0, %v8493_v3  ;;  %v6451_v8 = vmul.f32 0.5, %v6431_v45 }
 0xa55   :  { %v6395_v20 = vmul.f32 0.5, %v6365_v0  ;;  %v6368_v22 = vadd.f32 -0.079873525, %v6367_v33  ;;  %6606 = vperm.xlu0 %7623, %v6453_v7   ;;  %v6454_v26 = vmul.f32 0.5, %v6434_v34  ;;  %v6649_v34 = vrot.slane %v6510_v17, %v8702_v50 }
 0xa56   :  { %8494 = vtanh.f32 %v6397_v4  ;;  %v6398_v13 = vmul.f32 0.5, %v6376_v30  ;;  %v6452_v27 = vmul.f32 0.5, %v6432_v35  ;;  %v6653_v61 = vrot.slane %v6493_v21, %v8702_v50 }
 0xa57   :  { %8496 = vtanh.f32 %v6395_v20  ;;  %v6396_v9 = vmul.f32 0.5, %v6368_v22  ;;  %6611 = vperm.xlu1 %7622, %v6454_v26   ;;  %v6507_v7 = vrot.slane %v6479_v6, %v11045_v28  ;;  %v6509_v35 = vcombine.high %v6493_v21, %v6493_v21 }
 0xa58   :  { %8498 = vtanh.f32 %v6398_v13 }
 0xa59   :  { %8500 = vtanh.f32 %v6396_v9  ;;  %6596 = vperm.xlu0 %7623, %v6451_v8   ;;  %v7326_v9 = vld.sshfl [vmem:[%s11087_s5 + $0x8] sm:$0x11 pattern:$0x75316420]  ;;  %v6657_v8 = vrot.slane %v6507_v7, %v8702_v50 }
 0xa5b   :  { %6601 = vperm.xlu1 %7622, %v6452_v27  }
 0xa60   :  { %v8495_v46 = vpop.eup %8494 }
 0xa61   :  { %v8497_v1 = vpop.eup %8496  ;;  %v6437_v19 = vadd.f32 1.0, %v8495_v46 }
 0xa62   :  { %v8499_v14 = vpop.eup %8498  ;;  %v6435_v42 = vadd.f32 1.0, %v8497_v1 }
 0xa63   :  { %v8501_v15 = vpop.eup %8500  ;;  %v6438_v40 = vadd.f32 1.0, %v8499_v14  ;;  %v6457_v31 = vmul.f32 0.5, %v6437_v19  ;;  %v6661_v14 = vrot.slane %v6509_v35, %v8702_v50  ;;  %v6526_v19 = vrot.slane %v7326_v9, %v11045_v28 }
 0xa64   :  { %v6436_v12 = vadd.f32 1.0, %v8501_v15  ;;  %v6455_v23 = vmul.f32 0.5, %v6435_v42  ;;  %v6511_v42 = vcombine.high %v6507_v7, %v6507_v7 }
 0xa65   :  { %v6458_v63 = vmul.f32 0.5, %v6438_v40  ;;  %v6519_v40 = vcombine.high %v7326_v9, %v7326_v9 }
 0xa66   :  { %6616 = vperm.xlu0 %7623, %v6455_v23   ;;  %v6456_v57 = vmul.f32 0.5, %v6436_v12  ;;  %v6665_v11 = vrot.slane %v6511_v42, %v8702_v50 }
 0xa68   :  { %6621 = vperm.xlu1 %7622, %v6456_v57  }
 0xa6a   :  { %6626 = vperm.xlu0 %7623, %v6457_v31  }
 0xa6c   :  { %6631 = vperm.xlu1 %7622, %v6458_v63  }
 0xa74   :  { %v6547_v37 = vpop.permute.xlu1 %6546 }
 0xa75   :  { %v6537_v56 = vpop.permute.xlu0 %6536  ;;  %v6686_v43 = vmul.f32 %v6641_v48, %v6547_v37 }
 0xa76   :  { %v6684_v47 = vmul.f32 %v6637_v39, %v6537_v56  ;;  %v6669_v56 = vrot.slane %v6526_v19, %v8702_v50 }
 0xa78   :  { %v6552_v55 = vpop.permute.xlu1 %6551  ;;  %v6705_v45 = vadd.f32 %v6686_v43, %v6684_v47 }
 0xa79   :  { %v6542_v36 = vpop.permute.xlu0 %6541  ;;  %v6687_v16 = vmul.f32 %v6641_v48, %v6552_v55 }
 0xa7a   :  { %v6685_v32 = vmul.f32 %v6637_v39, %v6542_v36  ;;  %v6533_v36 = vrot.slane %v6519_v40, %v11045_v28  ;;  %v7327_v28 = vld [vmem:[%s11083_s6 + $0x2e] ss:$0 sm:$0xff] }
 0xa7c   :  { %v6714_v30 = vadd.f32 %v6687_v16, %v6685_v32  ;;  %v6673_v59 = vrot.slane %v6533_v36, %v8702_v50 }
 0xab4   :  { %v6567_v10 = vpop.permute.xlu0 %6566 }
 0xab5   :  { %v6690_v22 = vmul.f32 %v6649_v34, %v6567_v10 }
 0xab6   :  { %v6572_v58 = vpop.permute.xlu1 %6571 }
 0xab7   :  { %v6691_v27 = vmul.f32 %v6649_v34, %v6572_v58 }
 0xab8   :  { %v6557_v24 = vpop.permute.xlu0 %6556 }
 0xab9   :  { %v6688_v38 = vmul.f32 %v6645_v41, %v6557_v24 }
 0xaba   :  { %v6562_v5 = vpop.permute.xlu1 %6561 }
 0xabb   :  { %v6689_v0 = vmul.f32 %v6645_v41, %v6562_v5  ;;  %v6706_v33 = vadd.f32 %v6705_v45, %v6688_v38 }
 0xabd   :  { %v6715_v26 = vadd.f32 %v6714_v30, %v6689_v0  ;;  %v6707_v46 = vadd.f32 %v6706_v33, %v6690_v22 }
 0xabf   :  { %v6716_v23 = vadd.f32 %v6715_v26, %v6691_v27 }
 0xac4   :  { %v6587_v44 = vpop.permute.xlu0 %6586 }
 0xac5   :  { %v6694_v31 = vmul.f32 %v6657_v8, %v6587_v44 }
 0xac6   :  { %v6592_v62 = vpop.permute.xlu1 %6591 }
 0xac7   :  { %v6695_v53 = vmul.f32 %v6657_v8, %v6592_v62 }
 0xac8   :  { %v6577_v25 = vpop.permute.xlu0 %6576 }
 0xac9   :  { %v6692_v13 = vmul.f32 %v6653_v61, %v6577_v25 }
 0xaca   :  { %v6582_v3 = vpop.permute.xlu1 %6581 }
 0xacb   :  { %v6693_v1 = vmul.f32 %v6653_v61, %v6582_v3  ;;  %v6708_v12 = vadd.f32 %v6707_v46, %v6692_v13 }
 0xacd   :  { %v6717_v63 = vadd.f32 %v6716_v23, %v6693_v1  ;;  %v6709_v37 = vadd.f32 %v6708_v12, %v6694_v31 }
 0xacf   :  { %v6718_v54 = vadd.f32 %v6717_v63, %v6695_v53 }
 0xad4   :  { %v6607_v4 = vpop.permute.xlu0 %6606 }
 0xad5   :  { %v6698_v58 = vmul.f32 %v6665_v11, %v6607_v4 }
 0xad6   :  { %v6612_v20 = vpop.permute.xlu1 %6611 }
 0xad7   :  { %v6699_v5 = vmul.f32 %v6665_v11, %v6612_v20 }
 0xad8   :  { %v6597_v15 = vpop.permute.xlu0 %6596 }
 0xad9   :  { %v6696_v52 = vmul.f32 %v6661_v14, %v6597_v15 }
 0xada   :  { %v6602_v57 = vpop.permute.xlu1 %6601 }
 0xadb   :  { %v6697_v29 = vmul.f32 %v6661_v14, %v6602_v57  ;;  %v6710_v55 = vadd.f32 %v6709_v37, %v6696_v52 }
 0xadd   :  { %v6719_v2 = vadd.f32 %v6718_v54, %v6697_v29  ;;  %v6711_v18 = vadd.f32 %v6710_v55, %v6698_v58 }
 0xadf   :  { %v6720_v39 = vadd.f32 %v6719_v2, %v6699_v5 }
 0xae5   :  { %v6617_v10 = vpop.permute.xlu0 %6616 }
 0xae6   :  { %v6700_v24 = vmul.f32 %v6669_v56, %v6617_v10 }
 0xae7   :  { %v6622_v60 = vpop.permute.xlu1 %6621 }
 0xae8   :  { %v6701_v49 = vmul.f32 %v6669_v56, %v6622_v60  ;;  %v6712_v48 = vadd.f32 %v6711_v18, %v6700_v24 }
 0xae9   :  { %v6627_v44 = vpop.permute.xlu0 %6626 }
 0xaea   :  { %v6702_v51 = vmul.f32 %v6673_v59, %v6627_v44  ;;  %v6721_v41 = vadd.f32 %v6720_v39, %v6701_v49 }
 0xaeb   :  { %v6632_v62 = vpop.permute.xlu1 %6631 }
 0xaec   :  { %v6713_v43 = vadd.f32 %v6712_v48, %v6702_v51  ;;  %v6703_v47 = vmul.f32 %v6673_v59, %v6632_v62 }
 0xaee   :  { %v6729_v17 = vadd.f32 %v7327_v28, %v6713_v43  ;;  %v6722_v21 = vadd.f32 %v6721_v41, %v6703_v47 }
 0xaf0   :  { %6731 = vst [vmem:[%s11088_s8] sm:$0xff] %v6729_v17  ;;  %v6730_v50 = vadd.f32 %v7327_v28, %v6722_v21 }
 0xaf2   :  { %6732 = vst [vmem:[%s11088_s8 + $0x8] sm:$0xff] %v6730_v50 }

</bundles_post_ra>
